<compile_context>
chip_gen: v6e
topology: v6e:2x2x1
jax: 0.10.0
libtpu: 0.0.40
codegen_flags: <defaults>
</compile_context>

<pallas_src>
import functools

import jax
import jax.numpy as jnp
from jax import lax
from jax.experimental import pallas as pl
from jax.experimental.pallas import tpu as pltpu

BN_EPS = 1e-5
GIN_EPS = 0.0          # GINConv default eps (train_eps=False)

LANE = 128
SUBLANE = 8
NUM_PHASES = 6         # z1a | bn+z1b | bn->h1 | z2a | bn+z2b | bn->h2 + jump-lin


def _round_up(v, m):
    return (v + m - 1) // m * m


def _pad2(a, rows, cols):
    r, c = a.shape
    return jnp.pad(a, ((0, rows - r), (0, cols - c)))


def block_kernel(adj_ref, x_ref,
                 w1a_ref, b1a_ref, g1a_ref, be1a_ref,
                 w1b_ref, b1b_ref, g1b_ref, be1b_ref,
                 w2a_ref, b2a_ref, g2a_ref, be2a_ref,
                 w2b_ref, b2b_ref, g2b_ref, be2b_ref,
                 wl_ref, bl_ref,
                 out_ref,
                 z_s, h1_s, sum_a, ssq_a, sum_b, ssq_b,
                 *, tm, n_real, n_pad):
    phase = pl.program_id(0)
    t = pl.program_id(1)
    row0 = pl.multiple_of(t * tm, tm)
    rows = pl.ds(row0, tm)
    pad = n_pad - n_real                      # static
    inv_n = 1.0 / float(n_real)

    def accum(sum_ref, ssq_ref, z, bias):
        # Shifted one-pass moments (shift = bias row), accumulated across node tiles.
        d = z - bias

        @pl.when(t == 0)
        def _():
            sum_ref[...] = jnp.zeros_like(sum_ref)
            ssq_ref[...] = jnp.zeros_like(ssq_ref)

        sum_ref[...] += jnp.sum(d, axis=0, keepdims=True)
        ssq_ref[...] += jnp.sum(d * d, axis=0, keepdims=True)

    def bn_relu(z, sum_ref, ssq_ref, bias, gamma, beta):
        # Finalize batch moments (training-mode, biased variance) and apply BN+ReLU
        # to this tile. Padded rows of every pre-BN activation are identical
        # (adjacency pad rows/cols are zero), so their contribution is corrected
        # analytically instead of with a full-tile select.
        s = sum_ref[...]
        ss = ssq_ref[...]
        if pad > 0:
            c = z_s[n_pad - 1:n_pad, :] - bias    # one (padded) row of the same z
            s = s - pad * c
            ss = ss - pad * (c * c)
        mean_d = s * inv_n
        var = jnp.maximum(ss * inv_n - mean_d * mean_d, 0.0)
        mu = mean_d + bias
        zn = (z - mu) * lax.rsqrt(var + BN_EPS)
        return jnp.maximum(zn * gamma + beta, 0.0)

    # ---- phase 0: z1a = (A @ x) @ w1a + b1a ; accumulate moments (A) ----------
    @pl.when(phase == 0)
    def _():
        agg = jnp.dot(adj_ref[...], x_ref[...],
                      preferred_element_type=jnp.float32)
        z = jnp.dot(agg.astype(jnp.bfloat16), w1a_ref[...],
                    preferred_element_type=jnp.float32) + b1a_ref[...]
        accum(sum_a, ssq_a, z, b1a_ref[...])
        z_s[rows, :] = z

    # ---- phase 1: h = BN+ReLU(z1a) ; z1b = h @ w1b + b1b ; moments (B) --------
    @pl.when(phase == 1)
    def _():
        h = bn_relu(z_s[rows, :], sum_a, ssq_a,
                    b1a_ref[...], g1a_ref[...], be1a_ref[...])
        z = jnp.dot(h.astype(jnp.bfloat16), w1b_ref[...],
                    preferred_element_type=jnp.float32) + b1b_ref[...]
        accum(sum_b, ssq_b, z, b1b_ref[...])
        z_s[rows, :] = z

    # ---- phase 2: h1 = BN+ReLU(z1b) -> bf16 node-resident scratch -------------
    @pl.when(phase == 2)
    def _():
        h1 = bn_relu(z_s[rows, :], sum_b, ssq_b,
                     b1b_ref[...], g1b_ref[...], be1b_ref[...])
        h1_s[rows, :] = h1.astype(jnp.bfloat16)

    # ---- phase 3: z2a = (A @ h1) @ w2a + b2a ; moments (A) --------------------
    @pl.when(phase == 3)
    def _():
        agg = jnp.dot(adj_ref[...], h1_s[...],
                      preferred_element_type=jnp.float32)
        z = jnp.dot(agg.astype(jnp.bfloat16), w2a_ref[...],
                    preferred_element_type=jnp.float32) + b2a_ref[...]
        accum(sum_a, ssq_a, z, b2a_ref[...])
        z_s[rows, :] = z

    # ---- phase 4: h = BN+ReLU(z2a) ; z2b = h @ w2b + b2b ; moments (B) --------
    @pl.when(phase == 4)
    def _():
        h = bn_relu(z_s[rows, :], sum_a, ssq_a,
                    b2a_ref[...], g2a_ref[...], be2a_ref[...])
        z = jnp.dot(h.astype(jnp.bfloat16), w2b_ref[...],
                    preferred_element_type=jnp.float32) + b2b_ref[...]
        accum(sum_b, ssq_b, z, b2b_ref[...])
        z_s[rows, :] = z

    # ---- phase 5: h2 = BN+ReLU(z2b) ; out = [h1 | h2] @ wl + bl (K = 2H) ------
    @pl.when(phase == NUM_PHASES - 1)
    def _():
        h2 = bn_relu(z_s[rows, :], sum_b, ssq_b,
                     b2b_ref[...], g2b_ref[...], be2b_ref[...])
        cat = jnp.concatenate([h1_s[rows, :], h2.astype(jnp.bfloat16)], axis=-1)
        res = jnp.dot(cat, wl_ref[...],
                      preferred_element_type=jnp.float32) + bl_ref[...]
        out_ref[...] = res.astype(out_ref.dtype)


def build_adjacency(edge_index, num_nodes, num_nodes_padded):
    """Dense GIN adjacency (counts multi-edges) with (1+eps)*I folded in, bf16.

    For static graphs build this ONCE and reuse it across forward calls.
    """
    src, dst = edge_index[0], edge_index[1]
    adj = jnp.zeros((num_nodes_padded, num_nodes_padded), jnp.float32)
    adj = adj.at[dst, src].add(1.0)                       # message j -> i
    diag = jnp.arange(num_nodes, dtype=jnp.int32)
    adj = adj.at[diag, diag].add(1.0 + GIN_EPS)           # self term
    return adj.astype(jnp.bfloat16)                       # small counts are exact


def _vmem_limit_bytes():
    # Generation-aware scoped-VMEM cap: ~3/4 of physical VMEM, never above
    # ~112 MiB (v5e/v6e have 128 MiB physical, v7x only 64 MiB).
    try:
        cap = int(pltpu.get_tpu_info().vmem_capacity_bytes)
    except Exception:
        cap = 64 * 1024 * 1024            # conservative (v7x) fallback
    return int(min(cap * 3 // 4, 112 * 1024 * 1024))


def block_forward(x, adj_padded, params, output_dim, *, tm=256,
                  out_dtype=jnp.float32):
    """x: [N, input_dim] f32, adj_padded: [Np, Np] bf16 from build_adjacency."""
    N, fin = x.shape
    n_pad = adj_padded.shape[0]
    tm = min(tm, n_pad)
    assert tm % (2 * SUBLANE) == 0, "tile rows must be a multiple of 16 (bf16 packing)"
    assert n_pad % tm == 0, "padded node count must be a multiple of the node tile"
    num_tiles = n_pad // tm
    f_pad = _round_up(fin, LANE)

    (w1a, b1a, g1a, be1a, w1b, b1b, g1b, be1b,
     w2a, b2a, g2a, be2a, w2b, b2b, g2b, be2b, wl, bl) = params
    hidden = w1a.shape[1]
    h_pad = _round_up(hidden, LANE)
    o_pad = _round_up(output_dim, LANE)

    xp = _pad2(x, n_pad, f_pad).astype(jnp.bfloat16)

    def wm(m, r, c):                       # weight matrices -> bf16, padded
        return _pad2(m, r, c).astype(jnp.bfloat16)

    def vrow(m, c):                        # bias / gamma / beta -> f32, padded
        return _pad2(m, 1, c)

    # Jump-linear weight stays un-split; rows laid out to match the
    # lane-concatenated [h1 | h2] activation (single K = 2*h_pad MXU matmul).
    wl_p = jnp.zeros((2 * h_pad, o_pad), jnp.float32)
    wl_p = wl_p.at[:hidden, :output_dim].set(wl[:hidden])
    wl_p = wl_p.at[h_pad:h_pad + hidden, :output_dim].set(wl[hidden:])
    wl_p = wl_p.astype(jnp.bfloat16)

    args = (adj_padded, xp,
            wm(w1a, f_pad, h_pad), vrow(b1a, h_pad), vrow(g1a, h_pad), vrow(be1a, h_pad),
            wm(w1b, h_pad, h_pad), vrow(b1b, h_pad), vrow(g1b, h_pad), vrow(be1b, h_pad),
            wm(w2a, h_pad, h_pad), vrow(b2a, h_pad), vrow(g2a, h_pad), vrow(be2a, h_pad),
            wm(w2b, h_pad, h_pad), vrow(b2b, h_pad), vrow(g2b, h_pad), vrow(be2b, h_pad),
            wl_p, vrow(bl, o_pad))

    def adj_map(p, t):
        # Adjacency row-slabs are only consumed in phases 0 and 3; hold the
        # block index elsewhere so the pipeline does not re-fetch them.
        return (jnp.where(jnp.logical_or(p == 0, p == 3), t, 0), 0)

    def const_map(p, t):
        return (0, 0)

    def out_map(p, t):
        # Output is only written in the last phase; hold block 0 before that so
        # no garbage tiles are ever written back to HBM.
        return (jnp.where(p == NUM_PHASES - 1, t, 0), 0)

    in_specs = [pl.BlockSpec((tm, n_pad), adj_map)]
    in_specs += [pl.BlockSpec(a.shape, const_map) for a in args[1:]]

    flops = 2 * n_pad * (n_pad * f_pad            # agg1
                         + f_pad * h_pad          # lin1a
                         + h_pad * h_pad          # lin1b
                         + n_pad * h_pad          # agg2
                         + 2 * h_pad * h_pad      # lin2a, lin2b
                         + 2 * h_pad * o_pad)     # jump linear (K = 2H)
    bytes_accessed = int(2 * n_pad * n_pad * 2    # adjacency streamed twice
                         + sum(a.size * a.dtype.itemsize for a in args[1:])
                         + n_pad * o_pad * jnp.dtype(out_dtype).itemsize)
    cost = pl.CostEstimate(flops=int(flops),
                           transcendentals=int(4 * num_tiles * h_pad),
                           bytes_accessed=bytes_accessed)

    out = pl.pallas_call(
        functools.partial(block_kernel, tm=tm, n_real=N, n_pad=n_pad),
        out_shape=jax.ShapeDtypeStruct((n_pad, o_pad), out_dtype),
        grid=(NUM_PHASES, num_tiles),
        in_specs=in_specs,
        out_specs=pl.BlockSpec((tm, o_pad), out_map),
        scratch_shapes=[
            pltpu.VMEM((n_pad, h_pad), jnp.float32),   # pre-BN activations (z)
            pltpu.VMEM((n_pad, h_pad), jnp.bfloat16),  # h1 (layer-1 output)
            pltpu.VMEM((1, h_pad), jnp.float32),       # shifted sum   (ping)
            pltpu.VMEM((1, h_pad), jnp.float32),       # shifted sumsq (ping)
            pltpu.VMEM((1, h_pad), jnp.float32),       # shifted sum   (pong)
            pltpu.VMEM((1, h_pad), jnp.float32),       # shifted sumsq (pong)
        ],
        compiler_params=pltpu.CompilerParams(
            dimension_semantics=("arbitrary", "arbitrary"),
            vmem_limit_bytes=_vmem_limit_bytes()),
        cost_estimate=cost,
    )(*args)

    return out[:N, :output_dim]


def init_params(key, input_dim, output_dim, num_layer=2):
    """Deterministic synthetic parameters matching Block(input_dim, _, output_dim)."""
    hidden = output_dim  # num_layer == 2 forces hidden_dim = output_dim
    keys = iter(jax.random.split(key, 32))

    def lin(fan_in, fan_out):
        w = 0.1 * jax.random.normal(next(keys), (fan_in, fan_out), jnp.float32)
        b = 0.05 * jax.random.normal(next(keys), (1, fan_out), jnp.float32)
        return w, b

    def bn(dim):
        g = 1.0 + 0.1 * jax.random.normal(next(keys), (1, dim), jnp.float32)
        be = 0.05 * jax.random.normal(next(keys), (1, dim), jnp.float32)
        return g, be

    # GIN layer 1 MLP: Linear(in,H)-BN-ReLU-Linear(H,H)-BN-ReLU
    w1a, b1a = lin(input_dim, hidden); g1a, be1a = bn(hidden)
    w1b, b1b = lin(hidden, hidden);    g1b, be1b = bn(hidden)
    # GIN layer 2 MLP: Linear(H,H)-BN-ReLU-Linear(H,H)-BN-ReLU
    w2a, b2a = lin(hidden, hidden);    g2a, be2a = bn(hidden)
    w2b, b2b = lin(hidden, hidden);    g2b, be2b = bn(hidden)
    # jump='cat' + lin: Linear(hidden*(num_layer-1)+output_dim, output_dim) = Linear(2H, H)
    wl, bl = lin(hidden * (num_layer - 1) + output_dim, output_dim)

    return (w1a, b1a, g1a, be1a, w1b, b1b, g1b, be1b,
            w2a, b2a, g2a, be2a, w2b, b2b, g2b, be2b,
            wl, bl)


if __name__ == "__main__":
    key = jax.random.PRNGKey(0)
    k_x, k_p = jax.random.split(key)

    # Small but lane-dense demo dims (feature dims multiple of 128).
    N = 256           # number of graph nodes
    INPUT_DIM = 128
    OUTPUT_DIM = 128  # hidden_dim == output_dim (num_layer=2 path)
    TM = 128          # node-tile rows (2 tiles -> exercises the tiled/phased path)

    x = jax.random.normal(k_x, (N, INPUT_DIM), jnp.float32)

    # Deterministic ring graph (bidirectional edges): edge_index [2, 2N]
    idx = jnp.arange(N, dtype=jnp.int32)
    src = jnp.concatenate([idx, (idx + 1) % N])
    dst = jnp.concatenate([(idx + 1) % N, idx])
    edge_index = jnp.stack([src, dst], axis=0)

    params = init_params(k_p, INPUT_DIM, OUTPUT_DIM)

    # Adjacency built once (outside the kernel call path; cacheable for static graphs).
    n_pad = _round_up(max(N, TM), TM)
    adj = build_adjacency(edge_index, N, n_pad)
    adj = jax.block_until_ready(adj)

    out = block_forward(x, adj, params, OUTPUT_DIM, tm=TM)
    out = jax.block_until_ready(out)
    assert out.shape == (N, OUTPUT_DIM), out.shape
    assert jnp.all(jnp.isfinite(out))
    print("KERNEL_OK")
</pallas_src>

<mosaic_0001>
module attributes {stable_mosaic.version = 11 : i64} {
  func.func @block_kernel(%arg0: i32, %arg1: i32, %arg2: memref<128x256xbf16, #tpu.memory_space<vmem>>, %arg3: memref<256x128xbf16, #tpu.memory_space<vmem>>, %arg4: memref<128x128xbf16, #tpu.memory_space<vmem>>, %arg5: memref<1x128xf32, #tpu.memory_space<vmem>>, %arg6: memref<1x128xf32, #tpu.memory_space<vmem>>, %arg7: memref<1x128xf32, #tpu.memory_space<vmem>>, %arg8: memref<128x128xbf16, #tpu.memory_space<vmem>>, %arg9: memref<1x128xf32, #tpu.memory_space<vmem>>, %arg10: memref<1x128xf32, #tpu.memory_space<vmem>>, %arg11: memref<1x128xf32, #tpu.memory_space<vmem>>, %arg12: memref<128x128xbf16, #tpu.memory_space<vmem>>, %arg13: memref<1x128xf32, #tpu.memory_space<vmem>>, %arg14: memref<1x128xf32, #tpu.memory_space<vmem>>, %arg15: memref<1x128xf32, #tpu.memory_space<vmem>>, %arg16: memref<128x128xbf16, #tpu.memory_space<vmem>>, %arg17: memref<1x128xf32, #tpu.memory_space<vmem>>, %arg18: memref<1x128xf32, #tpu.memory_space<vmem>>, %arg19: memref<1x128xf32, #tpu.memory_space<vmem>>, %arg20: memref<256x128xbf16, #tpu.memory_space<vmem>>, %arg21: memref<1x128xf32, #tpu.memory_space<vmem>>, %arg22: memref<128x128xf32, #tpu.memory_space<vmem>>, %arg23: memref<256x128xf32, #tpu.memory_space<vmem>>, %arg24: memref<256x128xbf16, #tpu.memory_space<vmem>>, %arg25: memref<1x128xf32, #tpu.memory_space<vmem>>, %arg26: memref<1x128xf32, #tpu.memory_space<vmem>>, %arg27: memref<1x128xf32, #tpu.memory_space<vmem>>, %arg28: memref<1x128xf32, #tpu.memory_space<vmem>>) attributes {dimension_semantics = [#tpu.dimension_semantics<arbitrary>, #tpu.dimension_semantics<arbitrary>], iteration_bounds = array<i64: 6, 2>, scalar_prefetch = 0 : i64, scratch_operands = 6 : i64, tpu.core_type = #tpu.core_type<tc>, window_params = [{transform_indices = @transform_0, window_bounds = array<i64: 128, 256>}, {pipeline_mode = #tpu.pipeline_mode<synchronous>, transform_indices = @transform_1, window_bounds = array<i64: 256, 128>}, {pipeline_mode = #tpu.pipeline_mode<synchronous>, transform_indices = @transform_2, window_bounds = array<i64: 128, 128>}, {pipeline_mode = #tpu.pipeline_mode<synchronous>, transform_indices = @transform_3, window_bounds = array<i64: 1, 128>}, {pipeline_mode = #tpu.pipeline_mode<synchronous>, transform_indices = @transform_4, window_bounds = array<i64: 1, 128>}, {pipeline_mode = #tpu.pipeline_mode<synchronous>, transform_indices = @transform_5, window_bounds = array<i64: 1, 128>}, {pipeline_mode = #tpu.pipeline_mode<synchronous>, transform_indices = @transform_6, window_bounds = array<i64: 128, 128>}, {pipeline_mode = #tpu.pipeline_mode<synchronous>, transform_indices = @transform_7, window_bounds = array<i64: 1, 128>}, {pipeline_mode = #tpu.pipeline_mode<synchronous>, transform_indices = @transform_8, window_bounds = array<i64: 1, 128>}, {pipeline_mode = #tpu.pipeline_mode<synchronous>, transform_indices = @transform_9, window_bounds = array<i64: 1, 128>}, {pipeline_mode = #tpu.pipeline_mode<synchronous>, transform_indices = @transform_10, window_bounds = array<i64: 128, 128>}, {pipeline_mode = #tpu.pipeline_mode<synchronous>, transform_indices = @transform_11, window_bounds = array<i64: 1, 128>}, {pipeline_mode = #tpu.pipeline_mode<synchronous>, transform_indices = @transform_12, window_bounds = array<i64: 1, 128>}, {pipeline_mode = #tpu.pipeline_mode<synchronous>, transform_indices = @transform_13, window_bounds = array<i64: 1, 128>}, {pipeline_mode = #tpu.pipeline_mode<synchronous>, transform_indices = @transform_14, window_bounds = array<i64: 128, 128>}, {pipeline_mode = #tpu.pipeline_mode<synchronous>, transform_indices = @transform_15, window_bounds = array<i64: 1, 128>}, {pipeline_mode = #tpu.pipeline_mode<synchronous>, transform_indices = @transform_16, window_bounds = array<i64: 1, 128>}, {pipeline_mode = #tpu.pipeline_mode<synchronous>, transform_indices = @transform_17, window_bounds = array<i64: 1, 128>}, {pipeline_mode = #tpu.pipeline_mode<synchronous>, transform_indices = @transform_18, window_bounds = array<i64: 256, 128>}, {pipeline_mode = #tpu.pipeline_mode<synchronous>, transform_indices = @transform_19, window_bounds = array<i64: 1, 128>}, {transform_indices = @transform_20, window_bounds = array<i64: 128, 128>}]} {
    %c128_i32 = arith.constant 128 : i32
    %0 = arith.muli %arg1, %c128_i32 : i32
    %1 = tpu.assume_multiple %0, 128 : i32
    %c0_i32 = arith.constant 0 : i32
    %2 = arith.cmpi eq, %arg0, %c0_i32 : i32
    %3 = arith.extui %2 : i1 to i32
    %c0_i32_0 = arith.constant 0 : i32
    %4 = arith.cmpi ne, %3, %c0_i32_0 : i32
    scf.if %4 {
      %c0 = arith.constant 0 : index
      %c0_6 = arith.constant 0 : index
      %20 = vector.load %arg2[%c0, %c0_6] : memref<128x256xbf16, #tpu.memory_space<vmem>>, vector<128x256xbf16>
      %c0_7 = arith.constant 0 : index
      %c0_8 = arith.constant 0 : index
      %21 = vector.load %arg3[%c0_7, %c0_8] : memref<256x128xbf16, #tpu.memory_space<vmem>>, vector<256x128xbf16>
      %cst = arith.constant dense<0.000000e+00> : vector<128x128xf32>
      %22 = tpu.matmul %20, %21, %cst {dimension_numbers = #tpu.dot_dimension_numbers<[1], [0], [0], [1], [0, 0, 1, 1], [], []>} : vector<128x256xbf16>, vector<256x128xbf16>, vector<128x128xf32> -> vector<128x128xf32>
      %23 = arith.truncf %22 : vector<128x128xf32> to vector<128x128xbf16>
      %c0_9 = arith.constant 0 : index
      %c0_10 = arith.constant 0 : index
      %24 = vector.load %arg4[%c0_9, %c0_10] : memref<128x128xbf16, #tpu.memory_space<vmem>>, vector<128x128xbf16>
      %cst_11 = arith.constant dense<0.000000e+00> : vector<128x128xf32>
      %25 = tpu.matmul %23, %24, %cst_11 {dimension_numbers = #tpu.dot_dimension_numbers<[1], [0], [0], [1], [0, 0, 1, 1], [], []>} : vector<128x128xbf16>, vector<128x128xbf16>, vector<128x128xf32> -> vector<128x128xf32>
      %c0_12 = arith.constant 0 : index
      %c0_13 = arith.constant 0 : index
      %26 = vector.load %arg5[%c0_12, %c0_13] : memref<1x128xf32, #tpu.memory_space<vmem>>, vector<1x128xf32>
      %27 = vector.broadcast %26 : vector<1x128xf32> to vector<128x128xf32>
      %28 = arith.addf %25, %27 : vector<128x128xf32>
      %c0_14 = arith.constant 0 : index
      %c0_15 = arith.constant 0 : index
      %29 = vector.load %arg5[%c0_14, %c0_15] : memref<1x128xf32, #tpu.memory_space<vmem>>, vector<1x128xf32>
      %30 = vector.broadcast %29 : vector<1x128xf32> to vector<128x128xf32>
      %31 = arith.subf %28, %30 : vector<128x128xf32>
      %c0_i32_16 = arith.constant 0 : i32
      %32 = arith.cmpi eq, %arg1, %c0_i32_16 : i32
      %33 = arith.extui %32 : i1 to i32
      %c0_i32_17 = arith.constant 0 : i32
      %34 = arith.cmpi ne, %33, %c0_i32_17 : i32
      scf.if %34 {
        %cst_29 = arith.constant 0.000000e+00 : f32
        %48 = vector.broadcast %cst_29 : f32 to vector<1x128xf32>
        %c0_30 = arith.constant 0 : index
        %c0_31 = arith.constant 0 : index
        %49 = vector.load %arg25[%c0_30, %c0_31] : memref<1x128xf32, #tpu.memory_space<vmem>>, vector<1x128xf32>
        tpu.vector_store %arg25[%c0_30, %c0_31], %48 {strides = array<i32>} : memref<1x128xf32, #tpu.memory_space<vmem>>, vector<1x128xf32>,
        %cst_32 = arith.constant 0.000000e+00 : f32
        %50 = vector.broadcast %cst_32 : f32 to vector<1x128xf32>
        %c0_33 = arith.constant 0 : index
        %c0_34 = arith.constant 0 : index
        %51 = vector.load %arg26[%c0_33, %c0_34] : memref<1x128xf32, #tpu.memory_space<vmem>>, vector<1x128xf32>
        tpu.vector_store %arg26[%c0_33, %c0_34], %50 {strides = array<i32>} : memref<1x128xf32, #tpu.memory_space<vmem>>, vector<1x128xf32>,
      } else {
      }
      %c0_18 = arith.constant 0 : index
      %c0_19 = arith.constant 0 : index
      %35 = vector.load %arg25[%c0_18, %c0_19] : memref<1x128xf32, #tpu.memory_space<vmem>>, vector<1x128xf32>
      %cst_20 = arith.constant dense<0.000000e+00> : vector<128xf32>
      %36 = vector.multi_reduction <add>, %31, %cst_20 [0] : vector<128x128xf32> to vector<128xf32>
      %37 = vector.shape_cast %36 : vector<128xf32> to vector<1x128xf32>
      %38 = arith.addf %35, %37 : vector<1x128xf32>
      %c0_21 = arith.constant 0 : index
      %c0_22 = arith.constant 0 : index
      %39 = vector.load %arg25[%c0_21, %c0_22] : memref<1x128xf32, #tpu.memory_space<vmem>>, vector<1x128xf32>
      tpu.vector_store %arg25[%c0_21, %c0_22], %38 {strides = array<i32>} : memref<1x128xf32, #tpu.memory_space<vmem>>, vector<1x128xf32>,
      %c0_23 = arith.constant 0 : index
      %c0_24 = arith.constant 0 : index
      %40 = vector.load %arg26[%c0_23, %c0_24] : memref<1x128xf32, #tpu.memory_space<vmem>>, vector<1x128xf32>
      %41 = arith.mulf %31, %31 : vector<128x128xf32>
      %cst_25 = arith.constant dense<0.000000e+00> : vector<128xf32>
      %42 = vector.multi_reduction <add>, %41, %cst_25 [0] : vector<128x128xf32> to vector<128xf32>
      %43 = vector.shape_cast %42 : vector<128xf32> to vector<1x128xf32>
      %44 = arith.addf %40, %43 : vector<1x128xf32>
      %c0_26 = arith.constant 0 : index
      %c0_27 = arith.constant 0 : index
      %45 = vector.load %arg26[%c0_26, %c0_27] : memref<1x128xf32, #tpu.memory_space<vmem>>, vector<1x128xf32>
      tpu.vector_store %arg26[%c0_26, %c0_27], %44 {strides = array<i32>} : memref<1x128xf32, #tpu.memory_space<vmem>>, vector<1x128xf32>,
      %46 = arith.index_cast %1 : i32 to index
      %c0_28 = arith.constant 0 : index
      %47 = vector.load %arg23[%46, %c0_28] : memref<256x128xf32, #tpu.memory_space<vmem>>, vector<128x128xf32>
      tpu.vector_store %arg23[%46, %c0_28], %28 {strides = array<i32>} : memref<256x128xf32, #tpu.memory_space<vmem>>, vector<128x128xf32>,
    } else {
    }
    %c1_i32 = arith.constant 1 : i32
    %5 = arith.cmpi eq, %arg0, %c1_i32 : i32
    %6 = arith.extui %5 : i1 to i32
    %c0_i32_1 = arith.constant 0 : i32
    %7 = arith.cmpi ne, %6, %c0_i32_1 : i32
    scf.if %7 {
      %20 = arith.index_cast %1 : i32 to index
      %c0 = arith.constant 0 : index
      %21 = vector.load %arg23[%20, %c0] : memref<256x128xf32, #tpu.memory_space<vmem>>, vector<128x128xf32>
      %c0_6 = arith.constant 0 : index
      %c0_7 = arith.constant 0 : index
      %22 = vector.load %arg5[%c0_6, %c0_7] : memref<1x128xf32, #tpu.memory_space<vmem>>, vector<1x128xf32>
      %c0_8 = arith.constant 0 : index
      %c0_9 = arith.constant 0 : index
      %23 = vector.load %arg6[%c0_8, %c0_9] : memref<1x128xf32, #tpu.memory_space<vmem>>, vector<1x128xf32>
      %c0_10 = arith.constant 0 : index
      %c0_11 = arith.constant 0 : index
      %24 = vector.load %arg7[%c0_10, %c0_11] : memref<1x128xf32, #tpu.memory_space<vmem>>, vector<1x128xf32>
      %c0_12 = arith.constant 0 : index
      %c0_13 = arith.constant 0 : index
      %25 = vector.load %arg25[%c0_12, %c0_13] : memref<1x128xf32, #tpu.memory_space<vmem>>, vector<1x128xf32>
      %c0_14 = arith.constant 0 : index
      %c0_15 = arith.constant 0 : index
      %26 = vector.load %arg26[%c0_14, %c0_15] : memref<1x128xf32, #tpu.memory_space<vmem>>, vector<1x128xf32>
      %cst = arith.constant 3.906250e-03 : f32
      %27 = vector.broadcast %cst : f32 to vector<1x128xf32>
      %28 = arith.mulf %25, %27 : vector<1x128xf32>
      %cst_16 = arith.constant 3.906250e-03 : f32
      %29 = vector.broadcast %cst_16 : f32 to vector<1x128xf32>
      %30 = arith.mulf %26, %29 : vector<1x128xf32>
      %31 = arith.mulf %28, %28 : vector<1x128xf32>
      %32 = arith.subf %30, %31 : vector<1x128xf32>
      %cst_17 = arith.constant 0.000000e+00 : f32
      %33 = vector.broadcast %cst_17 : f32 to vector<1x128xf32>
      %34 = arith.maximumf %32, %33 : vector<1x128xf32>
      %35 = arith.addf %28, %22 : vector<1x128xf32>
      %36 = vector.broadcast %35 : vector<1x128xf32> to vector<128x128xf32>
      %37 = arith.subf %21, %36 : vector<128x128xf32>
      %cst_18 = arith.constant 9.99999974E-6 : f32
      %38 = vector.broadcast %cst_18 : f32 to vector<1x128xf32>
      %39 = arith.addf %34, %38 : vector<1x128xf32>
      %40 = math.rsqrt %39 : vector<1x128xf32>
      %41 = vector.broadcast %40 : vector<1x128xf32> to vector<128x128xf32>
      %42 = arith.mulf %37, %41 : vector<128x128xf32>
      %43 = vector.broadcast %23 : vector<1x128xf32> to vector<128x128xf32>
      %44 = arith.mulf %42, %43 : vector<128x128xf32>
      %45 = vector.broadcast %24 : vector<1x128xf32> to vector<128x128xf32>
      %46 = arith.addf %44, %45 : vector<128x128xf32>
      %cst_19 = arith.constant 0.000000e+00 : f32
      %47 = vector.broadcast %cst_19 : f32 to vector<128x128xf32>
      %48 = arith.maximumf %46, %47 : vector<128x128xf32>
      %49 = arith.truncf %48 : vector<128x128xf32> to vector<128x128xbf16>
      %c0_20 = arith.constant 0 : index
      %c0_21 = arith.constant 0 : index
      %50 = vector.load %arg8[%c0_20, %c0_21] : memref<128x128xbf16, #tpu.memory_space<vmem>>, vector<128x128xbf16>
      %cst_22 = arith.constant dense<0.000000e+00> : vector<128x128xf32>
      %51 = tpu.matmul %49, %50, %cst_22 {dimension_numbers = #tpu.dot_dimension_numbers<[1], [0], [0], [1], [0, 0, 1, 1], [], []>} : vector<128x128xbf16>, vector<128x128xbf16>, vector<128x128xf32> -> vector<128x128xf32>
      %c0_23 = arith.constant 0 : index
      %c0_24 = arith.constant 0 : index
      %52 = vector.load %arg9[%c0_23, %c0_24] : memref<1x128xf32, #tpu.memory_space<vmem>>, vector<1x128xf32>
      %53 = vector.broadcast %52 : vector<1x128xf32> to vector<128x128xf32>
      %54 = arith.addf %51, %53 : vector<128x128xf32>
      %c0_25 = arith.constant 0 : index
      %c0_26 = arith.constant 0 : index
      %55 = vector.load %arg9[%c0_25, %c0_26] : memref<1x128xf32, #tpu.memory_space<vmem>>, vector<1x128xf32>
      %56 = vector.broadcast %55 : vector<1x128xf32> to vector<128x128xf32>
      %57 = arith.subf %54, %56 : vector<128x128xf32>
      %c0_i32_27 = arith.constant 0 : i32
      %58 = arith.cmpi eq, %arg1, %c0_i32_27 : i32
      %59 = arith.extui %58 : i1 to i32
      %c0_i32_28 = arith.constant 0 : i32
      %60 = arith.cmpi ne, %59, %c0_i32_28 : i32
      scf.if %60 {
        %cst_40 = arith.constant 0.000000e+00 : f32
        %74 = vector.broadcast %cst_40 : f32 to vector<1x128xf32>
        %c0_41 = arith.constant 0 : index
        %c0_42 = arith.constant 0 : index
        %75 = vector.load %arg27[%c0_41, %c0_42] : memref<1x128xf32, #tpu.memory_space<vmem>>, vector<1x128xf32>
        tpu.vector_store %arg27[%c0_41, %c0_42], %74 {strides = array<i32>} : memref<1x128xf32, #tpu.memory_space<vmem>>, vector<1x128xf32>,
        %cst_43 = arith.constant 0.000000e+00 : f32
        %76 = vector.broadcast %cst_43 : f32 to vector<1x128xf32>
        %c0_44 = arith.constant 0 : index
        %c0_45 = arith.constant 0 : index
        %77 = vector.load %arg28[%c0_44, %c0_45] : memref<1x128xf32, #tpu.memory_space<vmem>>, vector<1x128xf32>
        tpu.vector_store %arg28[%c0_44, %c0_45], %76 {strides = array<i32>} : memref<1x128xf32, #tpu.memory_space<vmem>>, vector<1x128xf32>,
      } else {
      }
      %c0_29 = arith.constant 0 : index
      %c0_30 = arith.constant 0 : index
      %61 = vector.load %arg27[%c0_29, %c0_30] : memref<1x128xf32, #tpu.memory_space<vmem>>, vector<1x128xf32>
      %cst_31 = arith.constant dense<0.000000e+00> : vector<128xf32>
      %62 = vector.multi_reduction <add>, %57, %cst_31 [0] : vector<128x128xf32> to vector<128xf32>
      %63 = vector.shape_cast %62 : vector<128xf32> to vector<1x128xf32>
      %64 = arith.addf %61, %63 : vector<1x128xf32>
      %c0_32 = arith.constant 0 : index
      %c0_33 = arith.constant 0 : index
      %65 = vector.load %arg27[%c0_32, %c0_33] : memref<1x128xf32, #tpu.memory_space<vmem>>, vector<1x128xf32>
      tpu.vector_store %arg27[%c0_32, %c0_33], %64 {strides = array<i32>} : memref<1x128xf32, #tpu.memory_space<vmem>>, vector<1x128xf32>,
      %c0_34 = arith.constant 0 : index
      %c0_35 = arith.constant 0 : index
      %66 = vector.load %arg28[%c0_34, %c0_35] : memref<1x128xf32, #tpu.memory_space<vmem>>, vector<1x128xf32>
      %67 = arith.mulf %57, %57 : vector<128x128xf32>
      %cst_36 = arith.constant dense<0.000000e+00> : vector<128xf32>
      %68 = vector.multi_reduction <add>, %67, %cst_36 [0] : vector<128x128xf32> to vector<128xf32>
      %69 = vector.shape_cast %68 : vector<128xf32> to vector<1x128xf32>
      %70 = arith.addf %66, %69 : vector<1x128xf32>
      %c0_37 = arith.constant 0 : index
      %c0_38 = arith.constant 0 : index
      %71 = vector.load %arg28[%c0_37, %c0_38] : memref<1x128xf32, #tpu.memory_space<vmem>>, vector<1x128xf32>
      tpu.vector_store %arg28[%c0_37, %c0_38], %70 {strides = array<i32>} : memref<1x128xf32, #tpu.memory_space<vmem>>, vector<1x128xf32>,
      %72 = arith.index_cast %1 : i32 to index
      %c0_39 = arith.constant 0 : index
      %73 = vector.load %arg23[%72, %c0_39] : memref<256x128xf32, #tpu.memory_space<vmem>>, vector<128x128xf32>
      tpu.vector_store %arg23[%72, %c0_39], %54 {strides = array<i32>} : memref<256x128xf32, #tpu.memory_space<vmem>>, vector<128x128xf32>,
    } else {
    }
    %c2_i32 = arith.constant 2 : i32
    %8 = arith.cmpi eq, %arg0, %c2_i32 : i32
    %9 = arith.extui %8 : i1 to i32
    %c0_i32_2 = arith.constant 0 : i32
    %10 = arith.cmpi ne, %9, %c0_i32_2 : i32
    scf.if %10 {
      %20 = arith.index_cast %1 : i32 to index
      %c0 = arith.constant 0 : index
      %21 = vector.load %arg23[%20, %c0] : memref<256x128xf32, #tpu.memory_space<vmem>>, vector<128x128xf32>
      %c0_6 = arith.constant 0 : index
      %c0_7 = arith.constant 0 : index
      %22 = vector.load %arg9[%c0_6, %c0_7] : memref<1x128xf32, #tpu.memory_space<vmem>>, vector<1x128xf32>
      %c0_8 = arith.constant 0 : index
      %c0_9 = arith.constant 0 : index
      %23 = vector.load %arg10[%c0_8, %c0_9] : memref<1x128xf32, #tpu.memory_space<vmem>>, vector<1x128xf32>
      %c0_10 = arith.constant 0 : index
      %c0_11 = arith.constant 0 : index
      %24 = vector.load %arg11[%c0_10, %c0_11] : memref<1x128xf32, #tpu.memory_space<vmem>>, vector<1x128xf32>
      %c0_12 = arith.constant 0 : index
      %c0_13 = arith.constant 0 : index
      %25 = vector.load %arg27[%c0_12, %c0_13] : memref<1x128xf32, #tpu.memory_space<vmem>>, vector<1x128xf32>
      %c0_14 = arith.constant 0 : index
      %c0_15 = arith.constant 0 : index
      %26 = vector.load %arg28[%c0_14, %c0_15] : memref<1x128xf32, #tpu.memory_space<vmem>>, vector<1x128xf32>
      %cst = arith.constant 3.906250e-03 : f32
      %27 = vector.broadcast %cst : f32 to vector<1x128xf32>
      %28 = arith.mulf %25, %27 : vector<1x128xf32>
      %cst_16 = arith.constant 3.906250e-03 : f32
      %29 = vector.broadcast %cst_16 : f32 to vector<1x128xf32>
      %30 = arith.mulf %26, %29 : vector<1x128xf32>
      %31 = arith.mulf %28, %28 : vector<1x128xf32>
      %32 = arith.subf %30, %31 : vector<1x128xf32>
      %cst_17 = arith.constant 0.000000e+00 : f32
      %33 = vector.broadcast %cst_17 : f32 to vector<1x128xf32>
      %34 = arith.maximumf %32, %33 : vector<1x128xf32>
      %35 = arith.addf %28, %22 : vector<1x128xf32>
      %36 = vector.broadcast %35 : vector<1x128xf32> to vector<128x128xf32>
      %37 = arith.subf %21, %36 : vector<128x128xf32>
      %cst_18 = arith.constant 9.99999974E-6 : f32
      %38 = vector.broadcast %cst_18 : f32 to vector<1x128xf32>
      %39 = arith.addf %34, %38 : vector<1x128xf32>
      %40 = math.rsqrt %39 : vector<1x128xf32>
      %41 = vector.broadcast %40 : vector<1x128xf32> to vector<128x128xf32>
      %42 = arith.mulf %37, %41 : vector<128x128xf32>
      %43 = vector.broadcast %23 : vector<1x128xf32> to vector<128x128xf32>
      %44 = arith.mulf %42, %43 : vector<128x128xf32>
      %45 = vector.broadcast %24 : vector<1x128xf32> to vector<128x128xf32>
      %46 = arith.addf %44, %45 : vector<128x128xf32>
      %cst_19 = arith.constant 0.000000e+00 : f32
      %47 = vector.broadcast %cst_19 : f32 to vector<128x128xf32>
      %48 = arith.maximumf %46, %47 : vector<128x128xf32>
      %49 = arith.truncf %48 : vector<128x128xf32> to vector<128x128xbf16>
      %50 = arith.index_cast %1 : i32 to index
      %c0_20 = arith.constant 0 : index
      %51 = vector.load %arg24[%50, %c0_20] : memref<256x128xbf16, #tpu.memory_space<vmem>>, vector<128x128xbf16>
      tpu.vector_store %arg24[%50, %c0_20], %49 {strides = array<i32>} : memref<256x128xbf16, #tpu.memory_space<vmem>>, vector<128x128xbf16>,
    } else {
    }
    %c3_i32 = arith.constant 3 : i32
    %11 = arith.cmpi eq, %arg0, %c3_i32 : i32
    %12 = arith.extui %11 : i1 to i32
    %c0_i32_3 = arith.constant 0 : i32
    %13 = arith.cmpi ne, %12, %c0_i32_3 : i32
    scf.if %13 {
      %c0 = arith.constant 0 : index
      %c0_6 = arith.constant 0 : index
      %20 = vector.load %arg2[%c0, %c0_6] : memref<128x256xbf16, #tpu.memory_space<vmem>>, vector<128x256xbf16>
      %c0_7 = arith.constant 0 : index
      %c0_8 = arith.constant 0 : index
      %21 = vector.load %arg24[%c0_7, %c0_8] : memref<256x128xbf16, #tpu.memory_space<vmem>>, vector<256x128xbf16>
      %cst = arith.constant dense<0.000000e+00> : vector<128x128xf32>
      %22 = tpu.matmul %20, %21, %cst {dimension_numbers = #tpu.dot_dimension_numbers<[1], [0], [0], [1], [0, 0, 1, 1], [], []>} : vector<128x256xbf16>, vector<256x128xbf16>, vector<128x128xf32> -> vector<128x128xf32>
      %23 = arith.truncf %22 : vector<128x128xf32> to vector<128x128xbf16>
      %c0_9 = arith.constant 0 : index
      %c0_10 = arith.constant 0 : index
      %24 = vector.load %arg12[%c0_9, %c0_10] : memref<128x128xbf16, #tpu.memory_space<vmem>>, vector<128x128xbf16>
      %cst_11 = arith.constant dense<0.000000e+00> : vector<128x128xf32>
      %25 = tpu.matmul %23, %24, %cst_11 {dimension_numbers = #tpu.dot_dimension_numbers<[1], [0], [0], [1], [0, 0, 1, 1], [], []>} : vector<128x128xbf16>, vector<128x128xbf16>, vector<128x128xf32> -> vector<128x128xf32>
      %c0_12 = arith.constant 0 : index
      %c0_13 = arith.constant 0 : index
      %26 = vector.load %arg13[%c0_12, %c0_13] : memref<1x128xf32, #tpu.memory_space<vmem>>, vector<1x128xf32>
      %27 = vector.broadcast %26 : vector<1x128xf32> to vector<128x128xf32>
      %28 = arith.addf %25, %27 : vector<128x128xf32>
      %c0_14 = arith.constant 0 : index
      %c0_15 = arith.constant 0 : index
      %29 = vector.load %arg13[%c0_14, %c0_15] : memref<1x128xf32, #tpu.memory_space<vmem>>, vector<1x128xf32>
      %30 = vector.broadcast %29 : vector<1x128xf32> to vector<128x128xf32>
      %31 = arith.subf %28, %30 : vector<128x128xf32>
      %c0_i32_16 = arith.constant 0 : i32
      %32 = arith.cmpi eq, %arg1, %c0_i32_16 : i32
      %33 = arith.extui %32 : i1 to i32
      %c0_i32_17 = arith.constant 0 : i32
      %34 = arith.cmpi ne, %33, %c0_i32_17 : i32
      scf.if %34 {
        %cst_29 = arith.constant 0.000000e+00 : f32
        %48 = vector.broadcast %cst_29 : f32 to vector<1x128xf32>
        %c0_30 = arith.constant 0 : index
        %c0_31 = arith.constant 0 : index
        %49 = vector.load %arg25[%c0_30, %c0_31] : memref<1x128xf32, #tpu.memory_space<vmem>>, vector<1x128xf32>
        tpu.vector_store %arg25[%c0_30, %c0_31], %48 {strides = array<i32>} : memref<1x128xf32, #tpu.memory_space<vmem>>, vector<1x128xf32>,
        %cst_32 = arith.constant 0.000000e+00 : f32
        %50 = vector.broadcast %cst_32 : f32 to vector<1x128xf32>
        %c0_33 = arith.constant 0 : index
        %c0_34 = arith.constant 0 : index
        %51 = vector.load %arg26[%c0_33, %c0_34] : memref<1x128xf32, #tpu.memory_space<vmem>>, vector<1x128xf32>
        tpu.vector_store %arg26[%c0_33, %c0_34], %50 {strides = array<i32>} : memref<1x128xf32, #tpu.memory_space<vmem>>, vector<1x128xf32>,
      } else {
      }
      %c0_18 = arith.constant 0 : index
      %c0_19 = arith.constant 0 : index
      %35 = vector.load %arg25[%c0_18, %c0_19] : memref<1x128xf32, #tpu.memory_space<vmem>>, vector<1x128xf32>
      %cst_20 = arith.constant dense<0.000000e+00> : vector<128xf32>
      %36 = vector.multi_reduction <add>, %31, %cst_20 [0] : vector<128x128xf32> to vector<128xf32>
      %37 = vector.shape_cast %36 : vector<128xf32> to vector<1x128xf32>
      %38 = arith.addf %35, %37 : vector<1x128xf32>
      %c0_21 = arith.constant 0 : index
      %c0_22 = arith.constant 0 : index
      %39 = vector.load %arg25[%c0_21, %c0_22] : memref<1x128xf32, #tpu.memory_space<vmem>>, vector<1x128xf32>
      tpu.vector_store %arg25[%c0_21, %c0_22], %38 {strides = array<i32>} : memref<1x128xf32, #tpu.memory_space<vmem>>, vector<1x128xf32>,
      %c0_23 = arith.constant 0 : index
      %c0_24 = arith.constant 0 : index
      %40 = vector.load %arg26[%c0_23, %c0_24] : memref<1x128xf32, #tpu.memory_space<vmem>>, vector<1x128xf32>
      %41 = arith.mulf %31, %31 : vector<128x128xf32>
      %cst_25 = arith.constant dense<0.000000e+00> : vector<128xf32>
      %42 = vector.multi_reduction <add>, %41, %cst_25 [0] : vector<128x128xf32> to vector<128xf32>
      %43 = vector.shape_cast %42 : vector<128xf32> to vector<1x128xf32>
      %44 = arith.addf %40, %43 : vector<1x128xf32>
      %c0_26 = arith.constant 0 : index
      %c0_27 = arith.constant 0 : index
      %45 = vector.load %arg26[%c0_26, %c0_27] : memref<1x128xf32, #tpu.memory_space<vmem>>, vector<1x128xf32>
      tpu.vector_store %arg26[%c0_26, %c0_27], %44 {strides = array<i32>} : memref<1x128xf32, #tpu.memory_space<vmem>>, vector<1x128xf32>,
      %46 = arith.index_cast %1 : i32 to index
      %c0_28 = arith.constant 0 : index
      %47 = vector.load %arg23[%46, %c0_28] : memref<256x128xf32, #tpu.memory_space<vmem>>, vector<128x128xf32>
      tpu.vector_store %arg23[%46, %c0_28], %28 {strides = array<i32>} : memref<256x128xf32, #tpu.memory_space<vmem>>, vector<128x128xf32>,
    } else {
    }
    %c4_i32 = arith.constant 4 : i32
    %14 = arith.cmpi eq, %arg0, %c4_i32 : i32
    %15 = arith.extui %14 : i1 to i32
    %c0_i32_4 = arith.constant 0 : i32
    %16 = arith.cmpi ne, %15, %c0_i32_4 : i32
    scf.if %16 {
      %20 = arith.index_cast %1 : i32 to index
      %c0 = arith.constant 0 : index
      %21 = vector.load %arg23[%20, %c0] : memref<256x128xf32, #tpu.memory_space<vmem>>, vector<128x128xf32>
      %c0_6 = arith.constant 0 : index
      %c0_7 = arith.constant 0 : index
      %22 = vector.load %arg13[%c0_6, %c0_7] : memref<1x128xf32, #tpu.memory_space<vmem>>, vector<1x128xf32>
      %c0_8 = arith.constant 0 : index
      %c0_9 = arith.constant 0 : index
      %23 = vector.load %arg14[%c0_8, %c0_9] : memref<1x128xf32, #tpu.memory_space<vmem>>, vector<1x128xf32>
      %c0_10 = arith.constant 0 : index
      %c0_11 = arith.constant 0 : index
      %24 = vector.load %arg15[%c0_10, %c0_11] : memref<1x128xf32, #tpu.memory_space<vmem>>, vector<1x128xf32>
      %c0_12 = arith.constant 0 : index
      %c0_13 = arith.constant 0 : index
      %25 = vector.load %arg25[%c0_12, %c0_13] : memref<1x128xf32, #tpu.memory_space<vmem>>, vector<1x128xf32>
      %c0_14 = arith.constant 0 : index
      %c0_15 = arith.constant 0 : index
      %26 = vector.load %arg26[%c0_14, %c0_15] : memref<1x128xf32, #tpu.memory_space<vmem>>, vector<1x128xf32>
      %cst = arith.constant 3.906250e-03 : f32
      %27 = vector.broadcast %cst : f32 to vector<1x128xf32>
      %28 = arith.mulf %25, %27 : vector<1x128xf32>
      %cst_16 = arith.constant 3.906250e-03 : f32
      %29 = vector.broadcast %cst_16 : f32 to vector<1x128xf32>
      %30 = arith.mulf %26, %29 : vector<1x128xf32>
      %31 = arith.mulf %28, %28 : vector<1x128xf32>
      %32 = arith.subf %30, %31 : vector<1x128xf32>
      %cst_17 = arith.constant 0.000000e+00 : f32
      %33 = vector.broadcast %cst_17 : f32 to vector<1x128xf32>
      %34 = arith.maximumf %32, %33 : vector<1x128xf32>
      %35 = arith.addf %28, %22 : vector<1x128xf32>
      %36 = vector.broadcast %35 : vector<1x128xf32> to vector<128x128xf32>
      %37 = arith.subf %21, %36 : vector<128x128xf32>
      %cst_18 = arith.constant 9.99999974E-6 : f32
      %38 = vector.broadcast %cst_18 : f32 to vector<1x128xf32>
      %39 = arith.addf %34, %38 : vector<1x128xf32>
      %40 = math.rsqrt %39 : vector<1x128xf32>
      %41 = vector.broadcast %40 : vector<1x128xf32> to vector<128x128xf32>
      %42 = arith.mulf %37, %41 : vector<128x128xf32>
      %43 = vector.broadcast %23 : vector<1x128xf32> to vector<128x128xf32>
      %44 = arith.mulf %42, %43 : vector<128x128xf32>
      %45 = vector.broadcast %24 : vector<1x128xf32> to vector<128x128xf32>
      %46 = arith.addf %44, %45 : vector<128x128xf32>
      %cst_19 = arith.constant 0.000000e+00 : f32
      %47 = vector.broadcast %cst_19 : f32 to vector<128x128xf32>
      %48 = arith.maximumf %46, %47 : vector<128x128xf32>
      %49 = arith.truncf %48 : vector<128x128xf32> to vector<128x128xbf16>
      %c0_20 = arith.constant 0 : index
      %c0_21 = arith.constant 0 : index
      %50 = vector.load %arg16[%c0_20, %c0_21] : memref<128x128xbf16, #tpu.memory_space<vmem>>, vector<128x128xbf16>
      %cst_22 = arith.constant dense<0.000000e+00> : vector<128x128xf32>
      %51 = tpu.matmul %49, %50, %cst_22 {dimension_numbers = #tpu.dot_dimension_numbers<[1], [0], [0], [1], [0, 0, 1, 1], [], []>} : vector<128x128xbf16>, vector<128x128xbf16>, vector<128x128xf32> -> vector<128x128xf32>
      %c0_23 = arith.constant 0 : index
      %c0_24 = arith.constant 0 : index
      %52 = vector.load %arg17[%c0_23, %c0_24] : memref<1x128xf32, #tpu.memory_space<vmem>>, vector<1x128xf32>
      %53 = vector.broadcast %52 : vector<1x128xf32> to vector<128x128xf32>
      %54 = arith.addf %51, %53 : vector<128x128xf32>
      %c0_25 = arith.constant 0 : index
      %c0_26 = arith.constant 0 : index
      %55 = vector.load %arg17[%c0_25, %c0_26] : memref<1x128xf32, #tpu.memory_space<vmem>>, vector<1x128xf32>
      %56 = vector.broadcast %55 : vector<1x128xf32> to vector<128x128xf32>
      %57 = arith.subf %54, %56 : vector<128x128xf32>
      %c0_i32_27 = arith.constant 0 : i32
      %58 = arith.cmpi eq, %arg1, %c0_i32_27 : i32
      %59 = arith.extui %58 : i1 to i32
      %c0_i32_28 = arith.constant 0 : i32
      %60 = arith.cmpi ne, %59, %c0_i32_28 : i32
      scf.if %60 {
        %cst_40 = arith.constant 0.000000e+00 : f32
        %74 = vector.broadcast %cst_40 : f32 to vector<1x128xf32>
        %c0_41 = arith.constant 0 : index
        %c0_42 = arith.constant 0 : index
        %75 = vector.load %arg27[%c0_41, %c0_42] : memref<1x128xf32, #tpu.memory_space<vmem>>, vector<1x128xf32>
        tpu.vector_store %arg27[%c0_41, %c0_42], %74 {strides = array<i32>} : memref<1x128xf32, #tpu.memory_space<vmem>>, vector<1x128xf32>,
        %cst_43 = arith.constant 0.000000e+00 : f32
        %76 = vector.broadcast %cst_43 : f32 to vector<1x128xf32>
        %c0_44 = arith.constant 0 : index
        %c0_45 = arith.constant 0 : index
        %77 = vector.load %arg28[%c0_44, %c0_45] : memref<1x128xf32, #tpu.memory_space<vmem>>, vector<1x128xf32>
        tpu.vector_store %arg28[%c0_44, %c0_45], %76 {strides = array<i32>} : memref<1x128xf32, #tpu.memory_space<vmem>>, vector<1x128xf32>,
      } else {
      }
      %c0_29 = arith.constant 0 : index
      %c0_30 = arith.constant 0 : index
      %61 = vector.load %arg27[%c0_29, %c0_30] : memref<1x128xf32, #tpu.memory_space<vmem>>, vector<1x128xf32>
      %cst_31 = arith.constant dense<0.000000e+00> : vector<128xf32>
      %62 = vector.multi_reduction <add>, %57, %cst_31 [0] : vector<128x128xf32> to vector<128xf32>
      %63 = vector.shape_cast %62 : vector<128xf32> to vector<1x128xf32>
      %64 = arith.addf %61, %63 : vector<1x128xf32>
      %c0_32 = arith.constant 0 : index
      %c0_33 = arith.constant 0 : index
      %65 = vector.load %arg27[%c0_32, %c0_33] : memref<1x128xf32, #tpu.memory_space<vmem>>, vector<1x128xf32>
      tpu.vector_store %arg27[%c0_32, %c0_33], %64 {strides = array<i32>} : memref<1x128xf32, #tpu.memory_space<vmem>>, vector<1x128xf32>,
      %c0_34 = arith.constant 0 : index
      %c0_35 = arith.constant 0 : index
      %66 = vector.load %arg28[%c0_34, %c0_35] : memref<1x128xf32, #tpu.memory_space<vmem>>, vector<1x128xf32>
      %67 = arith.mulf %57, %57 : vector<128x128xf32>
      %cst_36 = arith.constant dense<0.000000e+00> : vector<128xf32>
      %68 = vector.multi_reduction <add>, %67, %cst_36 [0] : vector<128x128xf32> to vector<128xf32>
      %69 = vector.shape_cast %68 : vector<128xf32> to vector<1x128xf32>
      %70 = arith.addf %66, %69 : vector<1x128xf32>
      %c0_37 = arith.constant 0 : index
      %c0_38 = arith.constant 0 : index
      %71 = vector.load %arg28[%c0_37, %c0_38] : memref<1x128xf32, #tpu.memory_space<vmem>>, vector<1x128xf32>
      tpu.vector_store %arg28[%c0_37, %c0_38], %70 {strides = array<i32>} : memref<1x128xf32, #tpu.memory_space<vmem>>, vector<1x128xf32>,
      %72 = arith.index_cast %1 : i32 to index
      %c0_39 = arith.constant 0 : index
      %73 = vector.load %arg23[%72, %c0_39] : memref<256x128xf32, #tpu.memory_space<vmem>>, vector<128x128xf32>
      tpu.vector_store %arg23[%72, %c0_39], %54 {strides = array<i32>} : memref<256x128xf32, #tpu.memory_space<vmem>>, vector<128x128xf32>,
    } else {
    }
    %c5_i32 = arith.constant 5 : i32
    %17 = arith.cmpi eq, %arg0, %c5_i32 : i32
    %18 = arith.extui %17 : i1 to i32
    %c0_i32_5 = arith.constant 0 : i32
    %19 = arith.cmpi ne, %18, %c0_i32_5 : i32
    scf.if %19 {
      %20 = arith.index_cast %1 : i32 to index
      %c0 = arith.constant 0 : index
      %21 = vector.load %arg23[%20, %c0] : memref<256x128xf32, #tpu.memory_space<vmem>>, vector<128x128xf32>
      %c0_6 = arith.constant 0 : index
      %c0_7 = arith.constant 0 : index
      %22 = vector.load %arg17[%c0_6, %c0_7] : memref<1x128xf32, #tpu.memory_space<vmem>>, vector<1x128xf32>
      %c0_8 = arith.constant 0 : index
      %c0_9 = arith.constant 0 : index
      %23 = vector.load %arg18[%c0_8, %c0_9] : memref<1x128xf32, #tpu.memory_space<vmem>>, vector<1x128xf32>
      %c0_10 = arith.constant 0 : index
      %c0_11 = arith.constant 0 : index
      %24 = vector.load %arg19[%c0_10, %c0_11] : memref<1x128xf32, #tpu.memory_space<vmem>>, vector<1x128xf32>
      %c0_12 = arith.constant 0 : index
      %c0_13 = arith.constant 0 : index
      %25 = vector.load %arg27[%c0_12, %c0_13] : memref<1x128xf32, #tpu.memory_space<vmem>>, vector<1x128xf32>
      %c0_14 = arith.constant 0 : index
      %c0_15 = arith.constant 0 : index
      %26 = vector.load %arg28[%c0_14, %c0_15] : memref<1x128xf32, #tpu.memory_space<vmem>>, vector<1x128xf32>
      %cst = arith.constant 3.906250e-03 : f32
      %27 = vector.broadcast %cst : f32 to vector<1x128xf32>
      %28 = arith.mulf %25, %27 : vector<1x128xf32>
      %cst_16 = arith.constant 3.906250e-03 : f32
      %29 = vector.broadcast %cst_16 : f32 to vector<1x128xf32>
      %30 = arith.mulf %26, %29 : vector<1x128xf32>
      %31 = arith.mulf %28, %28 : vector<1x128xf32>
      %32 = arith.subf %30, %31 : vector<1x128xf32>
      %cst_17 = arith.constant 0.000000e+00 : f32
      %33 = vector.broadcast %cst_17 : f32 to vector<1x128xf32>
      %34 = arith.maximumf %32, %33 : vector<1x128xf32>
      %35 = arith.addf %28, %22 : vector<1x128xf32>
      %36 = vector.broadcast %35 : vector<1x128xf32> to vector<128x128xf32>
      %37 = arith.subf %21, %36 : vector<128x128xf32>
      %cst_18 = arith.constant 9.99999974E-6 : f32
      %38 = vector.broadcast %cst_18 : f32 to vector<1x128xf32>
      %39 = arith.addf %34, %38 : vector<1x128xf32>
      %40 = math.rsqrt %39 : vector<1x128xf32>
      %41 = vector.broadcast %40 : vector<1x128xf32> to vector<128x128xf32>
      %42 = arith.mulf %37, %41 : vector<128x128xf32>
      %43 = vector.broadcast %23 : vector<1x128xf32> to vector<128x128xf32>
      %44 = arith.mulf %42, %43 : vector<128x128xf32>
      %45 = vector.broadcast %24 : vector<1x128xf32> to vector<128x128xf32>
      %46 = arith.addf %44, %45 : vector<128x128xf32>
      %cst_19 = arith.constant 0.000000e+00 : f32
      %47 = vector.broadcast %cst_19 : f32 to vector<128x128xf32>
      %48 = arith.maximumf %46, %47 : vector<128x128xf32>
      %49 = arith.index_cast %1 : i32 to index
      %c0_20 = arith.constant 0 : index
      %50 = vector.load %arg24[%49, %c0_20] : memref<256x128xbf16, #tpu.memory_space<vmem>>, vector<128x128xbf16>
      %51 = arith.truncf %48 : vector<128x128xf32> to vector<128x128xbf16>
      %52 = tpu.concatenate %50, %51 in 1 : vector<128x128xbf16>, vector<128x128xbf16> -> vector<128x256xbf16>
      %c0_21 = arith.constant 0 : index
      %c0_22 = arith.constant 0 : index
      %53 = vector.load %arg20[%c0_21, %c0_22] : memref<256x128xbf16, #tpu.memory_space<vmem>>, vector<256x128xbf16>
      %cst_23 = arith.constant dense<0.000000e+00> : vector<128x128xf32>
      %54 = tpu.matmul %52, %53, %cst_23 {dimension_numbers = #tpu.dot_dimension_numbers<[1], [0], [0], [1], [0, 0, 1, 1], [], []>} : vector<128x256xbf16>, vector<256x128xbf16>, vector<128x128xf32> -> vector<128x128xf32>
      %c0_24 = arith.constant 0 : index
      %c0_25 = arith.constant 0 : index
      %55 = vector.load %arg21[%c0_24, %c0_25] : memref<1x128xf32, #tpu.memory_space<vmem>>, vector<1x128xf32>
      %56 = vector.broadcast %55 : vector<1x128xf32> to vector<128x128xf32>
      %57 = arith.addf %54, %56 : vector<128x128xf32>
      %c0_26 = arith.constant 0 : index
      %c0_27 = arith.constant 0 : index
      %58 = vector.load %arg22[%c0_26, %c0_27] : memref<128x128xf32, #tpu.memory_space<vmem>>, vector<128x128xf32>
      tpu.vector_store %arg22[%c0_26, %c0_27], %57 {strides = array<i32>} : memref<128x128xf32, #tpu.memory_space<vmem>>, vector<128x128xf32>,
    } else {
    }
    return
  }
  func.func @transform_0(%arg0: i32, %arg1: i32) -> (i32, i32) {
    %c0_i32 = arith.constant 0 : i32
    %0 = arith.cmpi eq, %arg0, %c0_i32 : i32
    %c3_i32 = arith.constant 3 : i32
    %1 = arith.cmpi eq, %arg0, %c3_i32 : i32
    %2 = arith.ori %0, %1 : i1
    %c0_i32_0 = arith.constant 0 : i32
    %3 = arith.select %2, %arg1, %c0_i32_0 : i32
    %c0_i32_1 = arith.constant 0 : i32
    %c0_i32_2 = arith.constant 0 : i32
    return %3, %c0_i32_1 : i32, i32
  }
  func.func @transform_1(%arg0: i32, %arg1: i32) -> (i32, i32) {
    %c0_i32 = arith.constant 0 : i32
    %c0_i32_0 = arith.constant 0 : i32
    %c0_i32_1 = arith.constant 0 : i32
    return %c0_i32, %c0_i32_0 : i32, i32
  }
  func.func @transform_2(%arg0: i32, %arg1: i32) -> (i32, i32) {
    %c0_i32 = arith.constant 0 : i32
    %c0_i32_0 = arith.constant 0 : i32
    %c0_i32_1 = arith.constant 0 : i32
    return %c0_i32, %c0_i32_0 : i32, i32
  }
  func.func @transform_3(%arg0: i32, %arg1: i32) -> (i32, i32) {
    %c0_i32 = arith.constant 0 : i32
    %c0_i32_0 = arith.constant 0 : i32
    %c0_i32_1 = arith.constant 0 : i32
    return %c0_i32, %c0_i32_0 : i32, i32
  }
  func.func @transform_4(%arg0: i32, %arg1: i32) -> (i32, i32) {
    %c0_i32 = arith.constant 0 : i32
    %c0_i32_0 = arith.constant 0 : i32
    %c0_i32_1 = arith.constant 0 : i32
    return %c0_i32, %c0_i32_0 : i32, i32
  }
  func.func @transform_5(%arg0: i32, %arg1: i32) -> (i32, i32) {
    %c0_i32 = arith.constant 0 : i32
    %c0_i32_0 = arith.constant 0 : i32
    %c0_i32_1 = arith.constant 0 : i32
    return %c0_i32, %c0_i32_0 : i32, i32
  }
  func.func @transform_6(%arg0: i32, %arg1: i32) -> (i32, i32) {
    %c0_i32 = arith.constant 0 : i32
    %c0_i32_0 = arith.constant 0 : i32
    %c0_i32_1 = arith.constant 0 : i32
    return %c0_i32, %c0_i32_0 : i32, i32
  }
  func.func @transform_7(%arg0: i32, %arg1: i32) -> (i32, i32) {
    %c0_i32 = arith.constant 0 : i32
    %c0_i32_0 = arith.constant 0 : i32
    %c0_i32_1 = arith.constant 0 : i32
    return %c0_i32, %c0_i32_0 : i32, i32
  }
  func.func @transform_8(%arg0: i32, %arg1: i32) -> (i32, i32) {
    %c0_i32 = arith.constant 0 : i32
    %c0_i32_0 = arith.constant 0 : i32
    %c0_i32_1 = arith.constant 0 : i32
    return %c0_i32, %c0_i32_0 : i32, i32
  }
  func.func @transform_9(%arg0: i32, %arg1: i32) -> (i32, i32) {
    %c0_i32 = arith.constant 0 : i32
    %c0_i32_0 = arith.constant 0 : i32
    %c0_i32_1 = arith.constant 0 : i32
    return %c0_i32, %c0_i32_0 : i32, i32
  }
  func.func @transform_10(%arg0: i32, %arg1: i32) -> (i32, i32) {
    %c0_i32 = arith.constant 0 : i32
    %c0_i32_0 = arith.constant 0 : i32
    %c0_i32_1 = arith.constant 0 : i32
    return %c0_i32, %c0_i32_0 : i32, i32
  }
  func.func @transform_11(%arg0: i32, %arg1: i32) -> (i32, i32) {
    %c0_i32 = arith.constant 0 : i32
    %c0_i32_0 = arith.constant 0 : i32
    %c0_i32_1 = arith.constant 0 : i32
    return %c0_i32, %c0_i32_0 : i32, i32
  }
  func.func @transform_12(%arg0: i32, %arg1: i32) -> (i32, i32) {
    %c0_i32 = arith.constant 0 : i32
    %c0_i32_0 = arith.constant 0 : i32
    %c0_i32_1 = arith.constant 0 : i32
    return %c0_i32, %c0_i32_0 : i32, i32
  }
  func.func @transform_13(%arg0: i32, %arg1: i32) -> (i32, i32) {
    %c0_i32 = arith.constant 0 : i32
    %c0_i32_0 = arith.constant 0 : i32
    %c0_i32_1 = arith.constant 0 : i32
    return %c0_i32, %c0_i32_0 : i32, i32
  }
  func.func @transform_14(%arg0: i32, %arg1: i32) -> (i32, i32) {
    %c0_i32 = arith.constant 0 : i32
    %c0_i32_0 = arith.constant 0 : i32
    %c0_i32_1 = arith.constant 0 : i32
    return %c0_i32, %c0_i32_0 : i32, i32
  }
  func.func @transform_15(%arg0: i32, %arg1: i32) -> (i32, i32) {
    %c0_i32 = arith.constant 0 : i32
    %c0_i32_0 = arith.constant 0 : i32
    %c0_i32_1 = arith.constant 0 : i32
    return %c0_i32, %c0_i32_0 : i32, i32
  }
  func.func @transform_16(%arg0: i32, %arg1: i32) -> (i32, i32) {
    %c0_i32 = arith.constant 0 : i32
    %c0_i32_0 = arith.constant 0 : i32
    %c0_i32_1 = arith.constant 0 : i32
    return %c0_i32, %c0_i32_0 : i32, i32
  }
  func.func @transform_17(%arg0: i32, %arg1: i32) -> (i32, i32) {
    %c0_i32 = arith.constant 0 : i32
    %c0_i32_0 = arith.constant 0 : i32
    %c0_i32_1 = arith.constant 0 : i32
    return %c0_i32, %c0_i32_0 : i32, i32
  }
  func.func @transform_18(%arg0: i32, %arg1: i32) -> (i32, i32) {
    %c0_i32 = arith.constant 0 : i32
    %c0_i32_0 = arith.constant 0 : i32
    %c0_i32_1 = arith.constant 0 : i32
    return %c0_i32, %c0_i32_0 : i32, i32
  }
  func.func @transform_19(%arg0: i32, %arg1: i32) -> (i32, i32) {
    %c0_i32 = arith.constant 0 : i32
    %c0_i32_0 = arith.constant 0 : i32
    %c0_i32_1 = arith.constant 0 : i32
    return %c0_i32, %c0_i32_0 : i32, i32
  }
  func.func @transform_20(%arg0: i32, %arg1: i32) -> (i32, i32) {
    %c5_i32 = arith.constant 5 : i32
    %0 = arith.cmpi eq, %arg0, %c5_i32 : i32
    %c0_i32 = arith.constant 0 : i32
    %1 = arith.select %0, %arg1, %c0_i32 : i32
    %c0_i32_0 = arith.constant 0 : i32
    %c0_i32_1 = arith.constant 0 : i32
    return %1, %c0_i32_0 : i32, i32
  }
}

</mosaic_0001>

<bundles_post_ra>
// kernel: tpu_custom_call.1
= control target key start
LH: loop header
LB: loop body
LE: loop exit
PB: predicated region body
PF: predicated region fallthrough
CT: control target
= control target key end

     0   :  { %s6217_s0 = inlined_call_operand.hbm [shape: bf16[256,256], index: 0, kind: input, shape index: {}]   ;;  %s6218_s1 = inlined_call_operand.hbm [shape: bf16[256,128], index: 1, kind: input, shape index: {}]   ;;  %s6219_s2 = inlined_call_operand.hbm [shape: bf16[128,128], index: 2, kind: input, shape index: {}]   ;;  %s6220_s3 = inlined_call_operand.vmem [shape: f32[1,128], index: 3, kind: input, shape index: {}]   ;;  %s6221_s4 = inlined_call_operand.vmem [shape: f32[1,128], index: 4, kind: input, shape index: {}]   ;;  %s6222_s5 = inlined_call_operand.vmem [shape: f32[1,128], index: 5, kind: input, shape index: {}]   ;;  %s6223_s6 = inlined_call_operand.hbm [shape: bf16[128,128], index: 6, kind: input, shape index: {}]   ;;  %s6224_s7 = inlined_call_operand.vmem [shape: f32[1,128], index: 7, kind: input, shape index: {}]   ;;  %s6225_s8 = inlined_call_operand.vmem [shape: f32[1,128], index: 8, kind: input, shape index: {}]   ;;  %s6226_s9 = inlined_call_operand.vmem [shape: f32[1,128], index: 9, kind: input, shape index: {}]   ;;  %s6227_s10 = inlined_call_operand.hbm [shape: bf16[128,128], index: 10, kind: input, shape index: {}]   ;;  %s6228_s11 = inlined_call_operand.vmem [shape: f32[1,128], index: 11, kind: input, shape index: {}]   ;;  %s6229_s12 = inlined_call_operand.vmem [shape: f32[1,128], index: 12, kind: input, shape index: {}]   ;;  %s6230_s13 = inlined_call_operand.vmem [shape: f32[1,128], index: 13, kind: input, shape index: {}]   ;;  %s6231_s14 = inlined_call_operand.hbm [shape: bf16[128,128], index: 14, kind: input, shape index: {}]   ;;  %s6232_s15 = inlined_call_operand.vmem [shape: f32[1,128], index: 15, kind: input, shape index: {}]   ;;  %s6233_s16 = inlined_call_operand.vmem [shape: f32[1,128], index: 16, kind: input, shape index: {}]   ;;  %s6234_s17 = inlined_call_operand.vmem [shape: f32[1,128], index: 17, kind: input, shape index: {}]   ;;  %s6235_s18 = inlined_call_operand.hbm [shape: bf16[256,128], index: 18, kind: input, shape index: {}]   ;;  %s6236_s19 = inlined_call_operand.vmem [shape: f32[1,128], index: 19, kind: input, shape index: {}]   ;;  %s6237_s20 = inlined_call_operand.hbm [shape: f32[256,128], index: 20, kind: output, shape index: {}]  }
   0x1   :  { %6245 = sst [smem:[#allocation30_spill]] %s6217_s0 }
   0x2   :  { %6246 = sst [smem:[#allocation31_spill]] %s6218_s1 }
   0x3   :  { %6247 = sst [smem:[#allocation32_spill]] %s6219_s2 }
   0x4   :  { %6248 = sst [smem:[#allocation33_spill]] %s6220_s3 }
   0x5   :  { %6249 = sst [smem:[#allocation34_spill]] %s6221_s4 }
   0x6   :  { %6250 = sst [smem:[#allocation35_spill]] %s6223_s6 }
   0x7   :  { %6251 = sst [smem:[#allocation36_spill]] %s6224_s7 }
   0x8   :  { %6252 = sst [smem:[#allocation37_spill]] %s6225_s8 }
   0x9   :  { %6253 = sst [smem:[#allocation38_spill]] %s6226_s9 }
   0xa   :  { %6254 = sst [smem:[#allocation39_spill]] %s6227_s10 }
   0xb   :  { %6255 = sst [smem:[#allocation40_spill]] %s6228_s11 }
   0xc   :  { %6256 = sst [smem:[#allocation41_spill]] %s6229_s12 }
   0xd   :  { %6257 = sst [smem:[#allocation42_spill]] %s6230_s13 }
   0xe   :  { %6258 = sst [smem:[#allocation43_spill]] %s6231_s14 }
   0xf   :  { %6259 = sst [smem:[#allocation44_spill]] %s6232_s15 }
  0x10   :  { %6260 = sst [smem:[#allocation45_spill]] %s6233_s16 }
  0x11   :  { %6261 = sst [smem:[#allocation46_spill]] %s6234_s17 }
  0x12   :  { %6262 = sst [smem:[#allocation47_spill]] %s6235_s18 }
  0x13   :  { %6263 = sst [smem:[#allocation48_spill]] %s6236_s19 }
  0x14   :  { %6264 = sst [smem:[#allocation49_spill]] %s6237_s20 }
  0x15   :  { %25 = vsyncpa [#allocation9], 0 }
  0x16   :  { %27 = vsyncpa [#allocation9 + $0x1], 0 }
  0x17   :  { %28 = vsyncpa [#allocation12], 0 }
  0x18   :  { %29 = vsyncpa [#allocation15], 0 }
  0x19   :  { %30 = vsyncpa [#allocation18], 0 }
  0x1a   :  { %31 = vsyncpa [#allocation10], 0 }
  0x1b   :  { %33 = vsyncpa [#allocation10 + $0x1], 0  ;;  %s5117_s1 = smov 0   ;;  %s5119_s22 = smov 0  }
  0x1c   :  { %s5121_s23 = smov 0   ;;  %s5123_s24 = smov 0  }
  0x1d   :  { %s5125_s2 = smov 0   ;;  %s5127_s25 = smov 0  }
  0x1e   :  { %s5129_s3 = smov 0   ;;  %s5131_s26 = smov 0  }
  0x1f   :  { %s5133_s27 = smov 0   ;;  %s5135_s28 = smov 0  }
  0x20   :  { %s5137_s4 = smov 0  }
  0x21 LB: > { %6265 = sst [smem:[#allocation26_spill]] %s4984_s27  ;;  %s6239_s29 = sadd.s32 4294967295, %s4992_s4   ;;  %s4992_s4 = sphi %s5137_s4, %s39_s4   ;;  %s4988_s28 = sphi %s5135_s28, %s6309_s28   ;;  %s4984_s27 = sphi %s5133_s27, %s6308_s27   ;;  %s4980_s26 = sphi %s5131_s26, %s6307_s26   ;;  %s4976_s3 = sphi %s5129_s3, %s6306_s3   ;;  %s4972_s25 = sphi %s5127_s25, %s6315_s25   ;;  %s4968_s2 = sphi %s5125_s2, %s6314_s2   ;;  %s4964_s24 = sphi %s5123_s24, %s6313_s24   ;;  %s4960_s23 = sphi %s5121_s23, %s6312_s23   ;;  %s4956_s22 = sphi %s5119_s22, %s6311_s22   ;;  %s4952_s1 = sphi %s5117_s1, %s6310_s1  }
  0x22   : > { %6266 = sst [smem:[#allocation27_spill]] %s4988_s28  ;;  %p3673_p0 = scmp.ge.s32.totalorder %s4992_s4, 1 }
  0x23   : > { %p5176_p1 = scmp.eq.s32.totalorder %s6239_s29, 0  ;;  %p519_p2 = scmp.lt.s32.totalorder %s4992_s4, 13 }
  0x24   : > { %s4994_s21 = smov [#allocation11]   ;;  %s4995_s29 = smov [#allocation14]  }
  0x25   : > { %p5181_p3 = pnand %p3673_p0, %p519_p2  ;;  %s531_s20 = sshll.u32 %s4994_s21, 4  ;;  %s532_s20 = int_to_ptr.vmem [resolvable:$true] %s531_s20 }
  0x26   : > { %s566_s17 = sshll.u32 %s4995_s29, 4  ;;  %s4996_s16 = smov [#allocation17]   ;;  %s567_s17 = int_to_ptr.vmem [resolvable:$true] %s566_s17 }
  0x27   : > { %p4387_p4 = pneg %p5181_p3  ;;  %s610_s15 = sshll.u32 %s4996_s16, 4  ;;  %s611_s15 = int_to_ptr.vmem [resolvable:$true] %s610_s15 }
  0x28   : > { %s4687_s21 = scalar_lea.vmem %s532_s20, 2048  ;;  %p4695_p10 = scmp.lt.s32.totalorder %s532_s20, %s532_s20 }
  0x29   : > { %p5189_p5 = pnand %p4387_p4, %p5176_p1  ;;  %p4688_p7 = scmp.ne.s32.totalorder %s532_s20, %s4687_s21 }
  0x2a   : > { %p4696_p11 = scmp.lt.s32.totalorder %s4687_s21, %s4687_s21 }
  0x2b   : > { %p5195_p6 = pneg %p5189_p5 }
  0x2c   : > { %p4697_p12 = por %p4696_p11, %p4695_p10 }
  0x2d   : > { %p4690_p8 = pnand %p4688_p7, %p5195_p6 }
  0x2f   : > { %p4691_p9 = pneg %p4690_p8 }
  0x31   : > { %p4698_p13 = pnand %p4697_p12, %p4691_p9 }
  0x33   : > { %4701 = shalt.err (!%p4698_p13)
}
  0x34   : > { %s4997_s29 = smov 64   ;;  %s4998_s16 = smov 4  }
  0x35   : > { %s6271_s9 = sld [smem:[#allocation31_spill]]  ;;  %s4713_s8 = scalar_lea.vmem %s567_s17, 1024 }
  0x36   : > { %p4714_p0 = scmp.ne.s32.totalorder %s567_s17, %s4713_s8  ;;  %p4721_p7 = scmp.lt.s32.totalorder %s567_s17, %s567_s17 }
  0x37   : > { %p4722_p8 = scmp.lt.s32.totalorder %s4713_s8, %s4713_s8 }
  0x38   : > { %p4716_p2 = pnand %p4714_p0, %p5195_p6 }
  0x39   : > { %p4723_p9 = por %p4722_p8, %p4721_p7 }
  0x3a   : > { %p4717_p4 = pneg %p4716_p2 }
  0x3b   : > { %4390 = dma.hbm_to_vmem [thread:$0]  (!%p5189_p5), %s6271_s9, 2048, %s532_s20, [#allocation12], %s4997_s29, %s4997_s29, %s4998_s16  }
  0x3c   : > { %p4724_p10 = pnand %p4723_p9, %p4717_p4 }
  0x3e   : > { %4727 = shalt.err (!%p4724_p10)
}
  0x3f   : > { %s6272_s6 = sld [smem:[#allocation35_spill]]  ;;  %s4739_s9 = scalar_lea.vmem %s611_s15, 1024 }
  0x40   : > { %p4740_p11 = scmp.ne.s32.totalorder %s611_s15, %s4739_s9  ;;  %p4747_p0 = scmp.lt.s32.totalorder %s611_s15, %s611_s15 }
  0x41   : > { %p4748_p2 = scmp.lt.s32.totalorder %s4739_s9, %s4739_s9 }
  0x42   : > { %p4742_p12 = pnand %p4740_p11, %p5195_p6 }
  0x43   : > { %p4749_p4 = por %p4748_p2, %p4747_p0 }
  0x44   : > { %p4743_p13 = pneg %p4742_p12 }
  0x45   : > { %4396 = dma.hbm_to_vmem [thread:$0]  (!%p5189_p5), %s6272_s6, 1024, %s567_s17, [#allocation15], %s4997_s29, %s4997_s29, %s4998_s16  }
  0x46   : > { %p4750_p7 = pnand %p4749_p4, %p4743_p13 }
  0x48   : > { %4753 = shalt.err (!%p4750_p7)
}
  0x49   : > { %s6273_s14 = sld [smem:[#allocation43_spill]]  ;;  %s4999_s11 = smov [#allocation13]  }
  0x4a   : > { %s544_s12 = sshll.u32 %s4999_s11, 4  ;;  %s5000_s17 = smov [#allocation16]   ;;  %s545_s12 = int_to_ptr.vmem [resolvable:$true] %s544_s12 }
  0x4b   : > { %s588_s20 = sshll.u32 %s5000_s17, 4  ;;  %s4765_s21 = scalar_lea.vmem %s545_s12, 1024  ;;  %s589_s20 = int_to_ptr.vmem [resolvable:$true] %s588_s20 }
  0x4c   : > { %p4766_p8 = scmp.ne.s32.totalorder %s545_s12, %s4765_s21  ;;  %p4773_p11 = scmp.lt.s32.totalorder %s545_s12, %s545_s12 }
  0x4d   : > { %p4774_p12 = scmp.lt.s32.totalorder %s4765_s21, %s4765_s21 }
  0x4e   : > { %p4768_p9 = pnand %p4766_p8, %p5195_p6 }
  0x4f   : > { %4402 = dma.hbm_to_vmem [thread:$0]  (!%p5189_p5), %s6273_s14, 1024, %s611_s15, [#allocation18], %s4997_s29, %s4997_s29, %s4998_s16  }
  0x50   : > { %p4769_p10 = pneg %p4768_p9  ;;  %p4775_p13 = por %p4774_p12, %p4773_p11 }
  0x52   : > { %p4776_p0 = pnand %p4775_p13, %p4769_p10 }
  0x54   : > { %4779 = shalt.err (!%p4776_p0)
}
  0x55   : > { %s6274_s8 = sld [smem:[#allocation32_spill]]  ;;  %s4791_s7 = scalar_lea.vmem %s589_s20, 1024 }
  0x56   : > { %p4792_p2 = scmp.ne.s32.totalorder %s589_s20, %s4791_s7  ;;  %p4799_p8 = scmp.lt.s32.totalorder %s589_s20, %s589_s20 }
  0x57   : > { %p4800_p9 = scmp.lt.s32.totalorder %s4791_s7, %s4791_s7 }
  0x58   : > { %p4794_p4 = pnand %p4792_p2, %p5195_p6 }
  0x59   : > { %p4801_p10 = por %p4800_p9, %p4799_p8 }
  0x5a   : > { %p4795_p7 = pneg %p4794_p4 }
  0x5b   : > { %4393 = dma.hbm_to_vmem [thread:$0]  (!%p5189_p5), %s6274_s8, 1024, %s545_s12, [#allocation12], %s4997_s29, %s4997_s29, %s4998_s16  }
  0x5c   : > { %p4802_p11 = pnand %p4801_p10, %p4795_p7 }
  0x5e   : > { %4805 = shalt.err (!%p4802_p11)
}
  0x5f   : > { %s6275_s10 = sld [smem:[#allocation39_spill]]  ;;  %s5001_s12 = smov [#allocation19]  }
  0x60   : > { %s632_s21 = sshll.u32 %s5001_s12, 4  ;;  %s633_s21 = int_to_ptr.vmem [resolvable:$true] %s632_s21 }
  0x61   : > { %s4817_s15 = scalar_lea.vmem %s633_s21, 2048  ;;  %p4825_p2 = scmp.lt.s32.totalorder %s633_s21, %s633_s21 }
  0x62   : > { %p4818_p12 = scmp.ne.s32.totalorder %s633_s21, %s4817_s15  ;;  %p4826_p4 = scmp.lt.s32.totalorder %s4817_s15, %s4817_s15 }
  0x64   : > { %p4820_p13 = pnand %p4818_p12, %p5195_p6  ;;  %p4827_p7 = por %p4826_p4, %p4825_p2 }
  0x65   : > { %4399 = dma.hbm_to_vmem [thread:$0]  (!%p5189_p5), %s6275_s10, 1024, %s589_s20, [#allocation15], %s4997_s29, %s4997_s29, %s4998_s16  }
  0x66   : > { %p4821_p0 = pneg %p4820_p13 }
  0x68   : > { %p4828_p8 = pnand %p4827_p7, %p4821_p0 }
  0x6a   : > { %4831 = shalt.err (!%p4828_p8)
}
  0x6b   : > { %s6276_s18 = sld [smem:[#allocation47_spill]]  ;;  %s48_s19 = sadd.s32 1, %s4984_s27 }
  0x6c   : > { %p49_p6 = scmp.ge.s32.totalorder %s48_s19, 2  ;;  %s51_s8 = sadd.s32 1, %s4988_s28 }
  0x6d   : > { %p55_p9 = scmp.eq.s32.totalorder %s4988_s28, 0  ;;  %p56_p10 = scmp.eq.s32.totalorder %s4988_s28, 3 }
  0x6e   : > { %s6317_s19 = smov (%p49_p6, %s48_s19), 0  ;;  %s6319_s8 = smov (!%p49_p6, %s51_s8), %s4988_s28 }
  0x6f   : > { %6277 = sst [smem:[#allocation28_spill]] %s6317_s19  ;;  %p57_p11 = por %p56_p10, %p55_p9 }
  0x70   : > { %s66_s7 = sadd.s32 1, %s4972_s25  ;;  %p53_p12 = scmp.ge.s32.totalorder %s6319_s8, 6 }
  0x71   : > { %4405 = dma.hbm_to_vmem [thread:$0]  (!%p5189_p5), %s6276_s18, 2048, %s633_s21, [#allocation18], %s4997_s29, %s4997_s29, %s4998_s16  }
  0x72   : > { %p73_p5 = scmp.ne.s32.totalorder %s4972_s25, %s4968_s2  ;;  %s6321_s8 = smov (%p53_p12, %s6319_s8), 0 }
  0x73   : > { %s5271_s29 = scalar_select %p57_p11, %s4984_s27, 0 }
  0x74   : > { %6278 = sst [smem:[#allocation29_spill]] %s6321_s8  ;;  %p74_p13 = scmp.eq.s32.totalorder %s4992_s4, 0 }
  0x75   : > { %p79_p0 = scmp.ne.s32.totalorder %s4968_s2, %s4964_s24  ;;  %p59_p2 = scmp.eq.s32.totalorder %s6321_s8, 0 }
  0x76   : > { %p60_p4 = scmp.eq.s32.totalorder %s6321_s8, 3  ;;  %p5280_p7 = por %p74_p13, %p73_p5 }
  0x77   : > { %p5286_p8 = por %p5176_p1, %p79_p0  ;;  %p488_p9 = scmp.eq.s32.totalorder %s4988_s28, 5 }
  0x78   : > { %p61_p6 = por %p60_p4, %p59_p2  ;;  %p490_p10 = scmp.eq.s32.totalorder %s6321_s8, 5 }
  0x79   : > { %s495_s24 = sadd.s32 1, %s4960_s23  ;;  %p505_p11 = scmp.ne.s32.totalorder %s4960_s23, %s4956_s22 }
  0x7a   : > { %s62_s17 = scalar_select %p61_p6, %s6317_s19, 0 }
  0x7b   : > { %s489_s12 = scalar_select %p488_p9, %s4984_s27, 0 }
  0x7c   : > { %s63_s21 = ssub.s32 %s5271_s29, %s62_s17  ;;  %s6281_s15 = sadd.s32 4294967295, %s4992_s4  }
  0x7d   : > { %p64_p12 = scmp.eq.s32.totalorder %s63_s21, 0  ;;  %p506_p5 = scmp.eq.s32.totalorder %s6281_s15, 11 }
  0x7e   : > { %s491_s9 = scalar_select %p490_p10, %s6317_s19, 0 }
  0x7f   : > { %s5302_s20 = scalar_select %p64_p12, %s4972_s25, %s66_s7  }
  0x80   : > { %s492_s13 = ssub.s32 %s489_s12, %s491_s9  ;;  %p5304_p13 = por %p506_p5, %p505_p11 }
  0x81   : > { %p493_p0 = scmp.eq.s32.totalorder %s492_s13, 0  ;;  %p511_p2 = scmp.ne.s32.totalorder %s4956_s22, %s4952_s1 }
  0x82   : > { %s6282_s6 = scalar_select %p5304_p13, 1, 0 }
  0x83   : > { %s6283_s10 = sadd.s32 4294967294, %s4992_s4   ;;  %p4420_p6 = scmp.lt.s32.totalorder %s4992_s4, 12 }
  0x84   : > { %p512_p4 = scmp.eq.s32.totalorder %s6283_s10, 11  ;;  %s649_s15 = sand.u32 1, %s4972_s25  }
  0x85   : > { %s5314_s17 = scalar_select %p493_p0, %s4960_s23, %s495_s24  }
  0x86   : > { %p5316_p9 = por %p512_p4, %p511_p2  ;;  %s3681_s7 = sshll.u32 %s649_s15, 7 }
  0x87   : > { %s3862_s14 = sshll.u32 %s5271_s29, 11  ;;  %s6285_s9 = sld [smem:[#allocation30_spill]] }
  0x88   : > { %s6284_s21 = scalar_select %p5316_p9, 1, 0 }
  0x89   : > { %s653_s19 = scalar_lea.vmem [#allocation8], %s3681_s7  ;;  %p5327_p10 = pnand %p4420_p6, %p5280_p7 }
  0x8a   : > { %s665_s28 = sshll.u32 %s653_s19, 4  ;;  %s650_s13 = scalar_lea.sflag [#allocation9], %s649_s15  ;;  %s666_s28 = int_to_ptr.vmem [resolvable:$true] %s665_s28 }
  0x8b   : > { %p4834_p11 = pneg %p5327_p10  ;;  %s4845_s24 = scalar_lea.vmem %s666_s28, 2048 }
  0x8c   : > { %p4846_p12 = scmp.ne.s32.totalorder %s666_s28, %s4845_s24  ;;  %s5002_s29 = smov [#allocation8]  }
  0x8d   : > { %s664_s8 = scalar_lea.hbm %s6285_s9, %s3862_s14  ;;  %s4850_s27 = sshll.u32 %s5002_s29, 4  ;;  %s4851_s27 = int_to_ptr.vmem [resolvable:$false] %s4850_s27 }
  0x8e   : > { %p4848_p5 = pnand %p4846_p12, %p4834_p11  ;;  %s4852_s14 = scalar_lea.vmem %s4851_s27, 4096 }
  0x8f   : > { %p4853_p2 = scmp.lt.s32.totalorder %s666_s28, %s4851_s27  ;;  %p4854_p4 = scmp.lt.s32.totalorder %s4852_s14, %s4845_s24 }
  0x90   : > { %p4849_p0 = pneg %p4848_p5 }
  0x91   : > { %p4855_p9 = por %p4854_p4, %p4853_p2 }
  0x93   : > { %p4856_p13 = pnand %p4855_p9, %p4849_p0 }
  0x95   : > { %4859 = shalt.err (!%p4856_p13)
}
  0x96   : > { %s5003_s18 = smov 128   ;;  %s5004_s19 = smov 8  }
  0x97   : > { %4409 = dma.hbm_to_vmem [thread:$0]  (!%p5327_p10), %s664_s8, 2048, %s666_s28, %s650_s13, %s5003_s18, %s5003_s18, %s5004_s19  }
  0x98   : > { %677 = sbr.rel (%p5181_p3) target bundleno = 2244 (0x8c4), region = 100  ;;  %s679_s16 = sand.u32 (!%p5181_p3), 1, %s4968_s2  }
  0x99   : > { %s3686_s15 = sshll.u32 (!%p5181_p3), %s679_s16, 7  ;;  %s680_s7 = scalar_lea.sflag (!%p5181_p3), [#allocation9], %s679_s16 }
  0x9a   : > { %s5338_s12 = scalar_lea.vmem (!%p5181_p3), [#allocation8], %s3686_s15 }
  0x9d   : > { %4931 = dma.done.wait (%p5286_p8), %s680_s7, 2048  }
  0x9e   : > { %4933 = vsyncadd (%p5286_p8), %s680_s7, 4294965248 }
  0x9f   : > { %4935 = dma.done.wait (%p5176_p1), [#allocation12], 3072  }
  0xa0   : > { %4937 = vsyncadd (%p5176_p1), [#allocation12], 4294964224 }
  0xa1   : > { %4939 = dma.done.wait (%p5176_p1), [#allocation15], 2048  }
  0xa2   : > { %4941 = vsyncadd (%p5176_p1), [#allocation15], 4294965248 }
  0xa3   : > { %4943 = dma.done.wait (%p5176_p1), [#allocation18], 3072  }
  0xa4   : > { %4945 = vsyncadd (%p5176_p1), [#allocation18], 4294964224  ;;  %s761_s27 = sand.u32 1, %s4956_s22   ;;  %s5358_s28 = sshll.u32 %s4976_s3, 7 }
  0xa5   : > { %s3693_s0 = sshll.u32 %s761_s27, 7  ;;  %p3695_p3 = scmp.ne.s32.totalorder %s4980_s26, 0 }
  0xa6   : > { %s5362_s8 = scalar_lea.vmem [#allocation20], %s3693_s0  ;;  %s6287_s9 = sld [smem:[#allocation33_spill]] (!%p3695_p3) }
  0xa7   : > { %777 = sbr.rel (%p3695_p3) target bundleno = 715 (0x2cb), region = 132  ;;  %p3737_p1 = scmp.ne.s32.totalorder (!%p3695_p3), %s4976_s3, 0 }
  0xac   : > { %v4532_v0 = vld [vmem:[#allocation11 + $0x78] sm:$0xff]   ;;  %v4534_v2 = vld [vmem:[#allocation11 + $0x70] sm:$0xff]   ;;  %v4536_v4 = vld [vmem:[#allocation11 + $0x68] sm:$0xff]  }
  0xad   : > { %v4533_v1 = vld [vmem:[#allocation11 + $0x38] sm:$0xff]   ;;  %3927 = vmatprep.subr.bf16.mxu0 %v4532_v0  ;;  %v4535_v3 = vld [vmem:[#allocation11 + $0x30] sm:$0xff]   ;;  %v4537_v5 = vld [vmem:[#allocation11 + $0x28] sm:$0xff]  }
  0xae   : > { %3928 = vmatpush3.bf16.msra.mxu0 %v4533_v1  ;;  %v4538_v6 = vld [vmem:[#allocation11 + $0x60] sm:$0xff]   ;;  %v4540_v8 = vld [vmem:[#allocation11 + $0x58] sm:$0xff]   ;;  %v4542_v10 = vld [vmem:[#allocation11 + $0x50] sm:$0xff]  }
  0xaf   : > { %3929 = vmatprep.subr.bf16.mxu0 %v4534_v2  ;;  %v4539_v7 = vld [vmem:[#allocation11 + $0x20] sm:$0xff]   ;;  %v4541_v9 = vld [vmem:[#allocation11 + $0x18] sm:$0xff]   ;;  %v4543_v12 = vld [vmem:[#allocation11 + $0x10] sm:$0xff]  }
  0xb0   : > { %v4550_v11 = vld [vmem:[%s5338_s12 + $0x4] ss:$8 sps:$4 sm:$0xff]   ;;  %v4572_v17 = vld [vmem:[#allocation13 + $0x38] sm:$0xff]   ;;  %v4548_v18 = vld [vmem:[%s5338_s12] ss:$8 sps:$4 sm:$0xff]  }
  0xb1   : > { %1034 = vmatprep.mubr.bf16.mxu0 %v4550_v11  ;;  %v4544_v13 = vld [vmem:[#allocation11 + $0x48] sm:$0xff]   ;;  %v4546_v15 = vld [vmem:[#allocation11 + $0x40] sm:$0xff]   ;;  %v4573_v19 = vld [vmem:[#allocation13 + $0x30] sm:$0xff]   ;;  %4183 = vmatprep.subr.bf16.mxu1 %v4572_v17 }
  0xb2   : > { %3930 = vmatpush3.bf16.msra.mxu0 %v4535_v3  ;;  %v4545_v14 = vld [vmem:[#allocation11 + $0x8] sm:$0xff]   ;;  %v4547_v16 = vld [vmem:[#allocation11] sm:$0xff]   ;;  %v4551_v20 = vld [vmem:[%s5338_s12 + $0x14] ss:$8 sps:$4 sm:$0xff]   ;;  %4184 = vmatpush3.bf16.msra.mxu1 %v4572_v17 }
  0xb3   : > { %3931 = vmatprep.subr.bf16.mxu0 %v4536_v4  ;;  %v4574_v21 = vld [vmem:[#allocation13 + $0x28] sm:$0xff]   ;;  %4185 = vmatprep.subr.bf16.mxu1 %v4573_v19  ;;  %v4575_v22 = vld [vmem:[#allocation13 + $0x20] sm:$0xff]   ;;  %v4553_v23 = vld [vmem:[%s5338_s12 + $0x10] ss:$8 sps:$4 sm:$0xff]  }
  0xb4   : > { %v4554_v24 = vld [vmem:[%s5338_s12 + $0x24] ss:$8 sps:$4 sm:$0xff]   ;;  %v4556_v25 = vld [vmem:[%s5338_s12 + $0x20] ss:$8 sps:$4 sm:$0xff]   ;;  %v4557_v26 = vld [vmem:[%s5338_s12 + $0x34] ss:$8 sps:$4 sm:$0xff]  }
  0xb5   : > { %v4559_v27 = vld [vmem:[%s5338_s12 + $0x30] ss:$8 sps:$4 sm:$0xff]   ;;  %v4560_v28 = vld [vmem:[%s5338_s12 + $0x44] ss:$8 sps:$4 sm:$0xff]   ;;  %v4562_v29 = vld [vmem:[%s5338_s12 + $0x40] ss:$8 sps:$4 sm:$0xff]  }
  0xb6   : > { %3932 = vmatpush3.bf16.msra.mxu0 %v4537_v5  ;;  %4186 = vmatpush3.bf16.msra.mxu1 %v4573_v19  ;;  %v4563_v30 = vld [vmem:[%s5338_s12 + $0x54] ss:$8 sps:$4 sm:$0xff]   ;;  %v4565_v31 = vld [vmem:[%s5338_s12 + $0x50] ss:$8 sps:$4 sm:$0xff]   ;;  %v4566_v32 = vld [vmem:[%s5338_s12 + $0x64] ss:$8 sps:$4 sm:$0xff]  }
  0xb7   : > { %3933 = vmatprep.subr.bf16.mxu0 %v4538_v6  ;;  %4187 = vmatprep.subr.bf16.mxu1 %v4574_v21  ;;  %v4568_v33 = vld [vmem:[%s5338_s12 + $0x60] ss:$8 sps:$4 sm:$0xff]   ;;  %v4569_v34 = vld [vmem:[%s5338_s12 + $0x74] ss:$8 sps:$4 sm:$0xff]   ;;  %v4571_v35 = vld [vmem:[%s5338_s12 + $0x70] ss:$8 sps:$4 sm:$0xff]  }
  0xb8   : > { %v4576_v36 = vld [vmem:[#allocation13 + $0x18] sm:$0xff]   ;;  %v4577_v37 = vld [vmem:[#allocation13 + $0x10] sm:$0xff]   ;;  %v4578_v38 = vld [vmem:[#allocation13 + $0x8] sm:$0xff]  }
  0xb9   : > { %v4579_v39 = vld [vmem:[#allocation13] sm:$0xff]  }
  0xba   : > { %3934 = vmatpush3.bf16.msra.mxu0 %v4539_v7  ;;  %4188 = vmatpush3.bf16.msra.mxu1 %v4574_v21 }
  0xbb   : > { %3935 = vmatprep.subr.bf16.mxu0 %v4540_v8  ;;  %4189 = vmatprep.subr.bf16.mxu1 %v4575_v22 }
  0xbe   : > { %3936 = vmatpush3.bf16.msra.mxu0 %v4541_v9  ;;  %4190 = vmatpush3.bf16.msra.mxu1 %v4575_v22 }
  0xbf   : > { %3937 = vmatprep.subr.bf16.mxu0 %v4542_v10  ;;  %4191 = vmatprep.subr.bf16.mxu1 %v4576_v36 }
  0xc2   : > { %3938 = vmatpush3.bf16.msra.mxu0 %v4543_v12  ;;  %4192 = vmatpush3.bf16.msra.mxu1 %v4576_v36 }
  0xc3   : > { %3939 = vmatprep.subr.bf16.mxu0 %v4544_v13  ;;  %4193 = vmatprep.subr.bf16.mxu1 %v4577_v37 }
  0xc6   : > { %3940 = vmatpush3.bf16.msra.mxu0 %v4545_v14  ;;  %4194 = vmatpush3.bf16.msra.mxu1 %v4577_v37 }
  0xc7   : > { %3941 = vmatprep.subr.bf16.mxu0 %v4546_v15  ;;  %4195 = vmatprep.subr.bf16.mxu1 %v4578_v38 }
  0xca   : > { %3942 = vmatpush3.bf16.msra.mxu0 %v4547_v16  ;;  %4196 = vmatpush3.bf16.msra.mxu1 %v4578_v38 }
  0xcb   : > { %4197 = vmatprep.subr.bf16.mxu1 %v4579_v39 }
  0xcd   : > { %1035 = vmatmul.mubr.bf16.vlgmr.msra.gmra.mxu0 %v4548_v18 }
  0xce   : > { %1042 = vmatprep.mubr.bf16.mxu0 %v4551_v20  ;;  %4198 = vmatpush3.bf16.msra.mxu1 %v4579_v39 }
  0xd5   : > { %1043 = vmatmul.mubr.bf16.gmra.mxu0 %v4553_v23 }
  0xd6   : > { %1050 = vmatprep.mubr.bf16.mxu0 %v4554_v24 }
  0xdd   : > { %1051 = vmatmul.mubr.bf16.gmra.mxu0 %v4556_v25 }
  0xde   : > { %1058 = vmatprep.mubr.bf16.mxu0 %v4557_v26 }
  0xe5   : > { %1059 = vmatmul.mubr.bf16.gmra.mxu0 %v4559_v27 }
  0xe6   : > { %1066 = vmatprep.mubr.bf16.mxu0 %v4560_v28 }
  0xed   : > { %1067 = vmatmul.mubr.bf16.gmra.mxu0 %v4562_v29 }
  0xee   : > { %1074 = vmatprep.mubr.bf16.mxu0 %v4563_v30 }
  0xf5   : > { %1075 = vmatmul.mubr.bf16.gmra.mxu0 %v4565_v31 }
  0xf6   : > { %1082 = vmatprep.mubr.bf16.mxu0 %v4566_v32  ;;  %v3728_v32 = vld [vmem:[%s6287_s9] ss:$0 sm:$0xff] }
  0xfd   : > { %1083 = vmatmul.mubr.bf16.gmra.mxu0 %v4568_v33 }
  0xfe   : > { %1090 = vmatprep.mubr.bf16.mxu0 %v4569_v34 }
 0x105   : > { %1091 = vmatmul.mubr.bf16.gmra.mxu0 %v4571_v35 }
 0x18d   : > { %v3943_v40 = vpop.f32.mrf.mxu0 }
 0x18f   : > { %v3944_v41 = vpop.f32.mrf.mxu0 }
 0x190   : > { %v3945_v44 = vadd.f32 %v3944_v41, %v3943_v40 }
 0x191   : > { %v3946_v42 = vpop.f32.mrf.mxu0 }
 0x193   : > { %v3947_v43 = vpop.f32.mrf.mxu0 }
 0x194   : > { %v3948_v45 = vadd.f32 %v3947_v43, %v3946_v42 }
 0x195   : > { %v3949_v46 = vpop.f32.mrf.mxu0 }
 0x196   : > { %v1099_v47 = vpack.c.bf16 %v3948_v45, %v3945_v44 }
 0x197   : > { %v3950_v48 = vpop.f32.mrf.mxu0 }
 0x198   : > { %4199 = vmatprep.mubr.bf16.mxu1 %v1099_v47  ;;  %v3951_v51 = vadd.f32 %v3950_v48, %v3949_v46 }
 0x199   : > { %v3952_v49 = vpop.f32.mrf.mxu0 }
 0x19b   : > { %v3953_v50 = vpop.f32.mrf.mxu0 }
 0x19c   : > { %v3954_v52 = vadd.f32 %v3953_v50, %v3952_v49 }
 0x19d   : > { %v3955_v53 = vpop.f32.mrf.mxu0 }
 0x19e   : > { %v1100_v54 = vpack.c.bf16 %v3954_v52, %v3951_v51 }
 0x19f   : > { %v3956_v55 = vpop.f32.mrf.mxu0 }
 0x1a0   : > { %4200 = vmatmul.mubr.bf16.vlgmr.msra.gmra.mxu1 %v1100_v54  ;;  %v3957_v58 = vadd.f32 %v3956_v55, %v3955_v53 }
 0x1a1   : > { %v3958_v56 = vpop.f32.mrf.mxu0 }
 0x1a3   : > { %v3959_v57 = vpop.f32.mrf.mxu0 }
 0x1a4   : > { %v3960_v59 = vadd.f32 %v3959_v57, %v3958_v56 }
 0x1a5   : > { %v3961_v60 = vpop.f32.mrf.mxu0 }
 0x1a6   : > { %v1101_v61 = vpack.c.bf16 %v3960_v59, %v3957_v58 }
 0x1a7   : > { %v3962_v62 = vpop.f32.mrf.mxu0 }
 0x1a8   : > { %4203 = vmatprep.mubr.bf16.mxu1 %v1101_v61  ;;  %v3963_v1 = vadd.f32 %v3962_v62, %v3961_v60 }
 0x1a9   : > { %v3964_v63 = vpop.f32.mrf.mxu0 }
 0x1ab   : > { %v3965_v0 = vpop.f32.mrf.mxu0 }
 0x1ac   : > { %v3966_v2 = vadd.f32 %v3965_v0, %v3964_v63 }
 0x1ad   : > { %v3967_v3 = vpop.f32.mrf.mxu0 }
 0x1ae   : > { %v1102_v4 = vpack.c.bf16 %v3966_v2, %v3963_v1 }
 0x1af   : > { %v3968_v5 = vpop.f32.mrf.mxu0 }
 0x1b0   : > { %4204 = vmatmul.mubr.bf16.gmra.mxu1 %v1102_v4  ;;  %v3969_v8 = vadd.f32 %v3968_v5, %v3967_v3 }
 0x1b1   : > { %v3970_v6 = vpop.f32.mrf.mxu0 }
 0x1b3   : > { %v3971_v7 = vpop.f32.mrf.mxu0 }
 0x1b4   : > { %v3972_v9 = vadd.f32 %v3971_v7, %v3970_v6 }
 0x1b5   : > { %v3973_v10 = vpop.f32.mrf.mxu0 }
 0x1b6   : > { %v1103_v11 = vpack.c.bf16 %v3972_v9, %v3969_v8 }
 0x1b7   : > { %v3974_v12 = vpop.f32.mrf.mxu0 }
 0x1b8   : > { %4207 = vmatprep.mubr.bf16.mxu1 %v1103_v11  ;;  %v3975_v15 = vadd.f32 %v3974_v12, %v3973_v10 }
 0x1b9   : > { %v3976_v13 = vpop.f32.mrf.mxu0 }
 0x1bb   : > { %v3977_v14 = vpop.f32.mrf.mxu0 }
 0x1bc   : > { %v3978_v16 = vadd.f32 %v3977_v14, %v3976_v13 }
 0x1bd   : > { %v3979_v17 = vpop.f32.mrf.mxu0 }
 0x1be   : > { %v1104_v18 = vpack.c.bf16 %v3978_v16, %v3975_v15 }
 0x1bf   : > { %v3980_v19 = vpop.f32.mrf.mxu0 }
 0x1c0   : > { %4208 = vmatmul.mubr.bf16.gmra.mxu1 %v1104_v18  ;;  %v3981_v22 = vadd.f32 %v3980_v19, %v3979_v17 }
 0x1c1   : > { %v3982_v20 = vpop.f32.mrf.mxu0 }
 0x1c3   : > { %v3983_v21 = vpop.f32.mrf.mxu0 }
 0x1c4   : > { %v3984_v23 = vadd.f32 %v3983_v21, %v3982_v20 }
 0x1c5   : > { %v3985_v24 = vpop.f32.mrf.mxu0 }
 0x1c6   : > { %v1105_v25 = vpack.c.bf16 %v3984_v23, %v3981_v22 }
 0x1c7   : > { %v3986_v26 = vpop.f32.mrf.mxu0 }
 0x1c8   : > { %4211 = vmatprep.mubr.bf16.mxu1 %v1105_v25  ;;  %v3987_v29 = vadd.f32 %v3986_v26, %v3985_v24 }
 0x1c9   : > { %v3988_v27 = vpop.f32.mrf.mxu0 }
 0x1cb   : > { %v3989_v28 = vpop.f32.mrf.mxu0 }
 0x1cc   : > { %v3990_v30 = vadd.f32 %v3989_v28, %v3988_v27 }
 0x1ce   : > { %v1106_v31 = vpack.c.bf16 %v3990_v30, %v3987_v29 }
 0x1d0   : > { %4212 = vmatmul.mubr.bf16.gmra.mxu1 %v1106_v31 }
 0x260   : > { %v4201_v33 = vpop.f32.mrf.mxu1 }
 0x261   : > { %v1221_v34 = vadd.f32 %v4201_v33, %v3728_v32 }
 0x262   : > { %v1212_v35 = vpop.f32.mrf.mxu1 }
 0x263   : > { %v5384_v36 = vsub.f32 %v1221_v34, %v3728_v32  ;;  %v1213_v37 = vadd.f32 %v3728_v32, %v1212_v35 }
 0x264   : > { %v4202_v38 = vpop.f32.mrf.mxu1 }
 0x265   : > { %v1275_v39 = vsub.f32 %v1213_v37, %v3728_v32  ;;  %v1224_v40 = vadd.f32 %v4202_v38, %v3728_v32 }
 0x266   : > { %v1215_v41 = vpop.f32.mrf.mxu1 }
 0x267   : > { %v5386_v42 = vsub.f32 %v1224_v40, %v3728_v32  ;;  %v1216_v43 = vadd.f32 %v3728_v32, %v1215_v41 }
 0x269   : > { %v1276_v44 = vsub.f32 %v1216_v43, %v3728_v32 }
 0x270   : > { %v4205_v45 = vpop.f32.mrf.mxu1 }
 0x271   : > { %v1237_v46 = vadd.f32 %v4205_v45, %v3728_v32 }
 0x272   : > { %v1228_v47 = vpop.f32.mrf.mxu1 }
 0x273   : > { %v5388_v48 = vsub.f32 %v1237_v46, %v3728_v32  ;;  %v1229_v49 = vadd.f32 %v3728_v32, %v1228_v47 }
 0x274   : > { %v4206_v50 = vpop.f32.mrf.mxu1 }
 0x275   : > { %v1279_v51 = vsub.f32 %v1229_v49, %v3728_v32  ;;  %v1240_v52 = vadd.f32 %v4206_v50, %v3728_v32 }
 0x276   : > { %v1231_v53 = vpop.f32.mrf.mxu1 }
 0x277   : > { %v5390_v54 = vsub.f32 %v1240_v52, %v3728_v32  ;;  %v1232_v55 = vadd.f32 %v3728_v32, %v1231_v53 }
 0x279   : > { %v1280_v56 = vsub.f32 %v1232_v55, %v3728_v32 }
 0x280   : > { %v4209_v57 = vpop.f32.mrf.mxu1 }
 0x281   : > { %v1253_v58 = vadd.f32 %v4209_v57, %v3728_v32 }
 0x282   : > { %v1244_v59 = vpop.f32.mrf.mxu1 }
 0x283   : > { %v5392_v60 = vsub.f32 %v1253_v58, %v3728_v32  ;;  %v1245_v61 = vadd.f32 %v3728_v32, %v1244_v59 }
 0x284   : > { %v4210_v62 = vpop.f32.mrf.mxu1 }
 0x285   : > { %v1283_v63 = vsub.f32 %v1245_v61, %v3728_v32  ;;  %v1256_v0 = vadd.f32 %v4210_v62, %v3728_v32 }
 0x286   : > { %v1247_v1 = vpop.f32.mrf.mxu1 }
 0x287   : > { %v5394_v2 = vsub.f32 %v1256_v0, %v3728_v32  ;;  %v1248_v3 = vadd.f32 %v3728_v32, %v1247_v1 }
 0x289   : > { %v1284_v4 = vsub.f32 %v1248_v3, %v3728_v32 }
 0x290   : > { %v4213_v5 = vpop.f32.mrf.mxu1 }
 0x291   : > { %v1269_v6 = vadd.f32 %v4213_v5, %v3728_v32 }
 0x292   : > { %v1260_v7 = vpop.f32.mrf.mxu1 }
 0x293   : > { %v5396_v8 = vsub.f32 %v1269_v6, %v3728_v32  ;;  %v1261_v9 = vadd.f32 %v3728_v32, %v1260_v7 }
 0x294   : > { %v4214_v10 = vpop.f32.mrf.mxu1 }
 0x295   : > { %v1287_v11 = vsub.f32 %v1261_v9, %v3728_v32  ;;  %v1272_v12 = vadd.f32 %v4214_v10, %v3728_v32  ;;  %1294 = sbr.rel (%p3737_p1) target bundleno = 668 (0x29c), region = 136 }
 0x296   : > { %v1263_v13 = vpop.f32.mrf.mxu1 }
 0x297   : > { %v5398_v14 = vsub.f32 %v1272_v12, %v3728_v32  ;;  %v1264_v15 = vadd.f32 %v3728_v32, %v1263_v13 }
 0x299   : > { %v1288_v16 = vsub.f32 %v1264_v15, %v3728_v32 }
 0x29a   : > { %v5005_v17 = vmov 0.0  }
 0x29b   : > { %1295 = vst [vmem:[#allocation4] sm:$0x1] %v5005_v17  ;;  %1296 = vst [vmem:[#allocation5] sm:$0x1] %v5005_v17 }
 0x29c PF: > { %v1298_v18 = vadd.f32 %v1276_v44, %v1275_v39  ;;  %v1322_v19 = vmul.f32 %v1275_v39, %v1275_v39  ;;  %v1323_v20 = vmul.f32 %v1276_v44, %v1276_v44  ;;  %s1361_s10 = scalar_lea.vmem [#allocation2], %s5358_s28  ;;  %v1324_v22 = vmul.f32 %v5384_v36, %v5384_v36 }
 0x29d   : > { %1362 = vst [vmem:[%s1361_s10] sm:$0xff] %v1213_v37  ;;  %1363 = vst [vmem:[%s1361_s10 + $0x8] sm:$0xff] %v1216_v43  ;;  %v1325_v24 = vmul.f32 %v5386_v42, %v5386_v42  ;;  %v1326_v27 = vmul.f32 %v1279_v51, %v1279_v51  ;;  %v1327_v30 = vmul.f32 %v1280_v56, %v1280_v56 }
 0x29e   : > { %1364 = vst [vmem:[%s1361_s10 + $0x10] sm:$0xff] %v1221_v34  ;;  %1365 = vst [vmem:[%s1361_s10 + $0x18] sm:$0xff] %v1224_v40  ;;  %v1299_v21 = vadd.f32 %v1298_v18, %v5384_v36  ;;  %v1338_v25 = vadd.f32 %v1323_v20, %v1322_v19  ;;  %v1328_v33 = vmul.f32 %v5388_v48, %v5388_v48 }
 0x29f   : > { %1366 = vst [vmem:[%s1361_s10 + $0x20] sm:$0xff] %v1229_v49  ;;  %1367 = vst [vmem:[%s1361_s10 + $0x28] sm:$0xff] %v1232_v55  ;;  %v1329_v36 = vmul.f32 %v5390_v54, %v5390_v54  ;;  %v1330_v39 = vmul.f32 %v1283_v63, %v1283_v63  ;;  %v1332_v45 = vmul.f32 %v5392_v60, %v5392_v60 }
 0x2a0   : > { %1368 = vst [vmem:[%s1361_s10 + $0x30] sm:$0xff] %v1237_v46  ;;  %1369 = vst [vmem:[%s1361_s10 + $0x38] sm:$0xff] %v1240_v52  ;;  %v1300_v23 = vadd.f32 %v1299_v21, %v5386_v42  ;;  %v1339_v28 = vadd.f32 %v1338_v25, %v1324_v22  ;;  %v1331_v42 = vmul.f32 %v1284_v4, %v1284_v4 }
 0x2a1   : > { %1370 = vst [vmem:[%s1361_s10 + $0x40] sm:$0xff] %v1245_v61  ;;  %1371 = vst [vmem:[%s1361_s10 + $0x48] sm:$0xff] %v1248_v3  ;;  %v1336_v57 = vmul.f32 %v5396_v8, %v5396_v8 }
 0x2a2   : > { %1372 = vst [vmem:[%s1361_s10 + $0x50] sm:$0xff] %v1253_v58  ;;  %1373 = vst [vmem:[%s1361_s10 + $0x58] sm:$0xff] %v1256_v0  ;;  %v1301_v26 = vadd.f32 %v1300_v23, %v1279_v51  ;;  %v1340_v31 = vadd.f32 %v1339_v28, %v1325_v24  ;;  %v1334_v51 = vmul.f32 %v1287_v11, %v1287_v11  ;;  %v1321_v13 = vld [vmem:[#allocation5] sm:$0x1] }
 0x2a3   : > { %1374 = vst [vmem:[%s1361_s10 + $0x60] sm:$0xff] %v1261_v9  ;;  %1375 = vst [vmem:[%s1361_s10 + $0x68] sm:$0xff] %v1264_v15  ;;  %v1297_v9 = vld [vmem:[#allocation4] sm:$0x1] }
 0x2a4   : > { %1376 = vst [vmem:[%s1361_s10 + $0x70] sm:$0xff] %v1269_v6  ;;  %1377 = vst [vmem:[%s1361_s10 + $0x78] sm:$0xff] %v1272_v12  ;;  %v1302_v29 = vadd.f32 %v1301_v26, %v1280_v56  ;;  %v1341_v34 = vadd.f32 %v1340_v31, %v1326_v27 }
 0x2a6   : > { %v1303_v32 = vadd.f32 %v1302_v29, %v5388_v48  ;;  %v1342_v37 = vadd.f32 %v1341_v34, %v1327_v30  ;;  %v1333_v48 = vmul.f32 %v5394_v2, %v5394_v2 }
 0x2a8   : > { %v1304_v35 = vadd.f32 %v1303_v32, %v5390_v54  ;;  %v1343_v40 = vadd.f32 %v1342_v37, %v1328_v33  ;;  %v1335_v54 = vmul.f32 %v1288_v16, %v1288_v16 }
 0x2aa   : > { %v1305_v38 = vadd.f32 %v1304_v35, %v1283_v63  ;;  %v1344_v43 = vadd.f32 %v1343_v40, %v1329_v36 }
 0x2ac   : > { %v1306_v41 = vadd.f32 %v1305_v38, %v1284_v4  ;;  %v1345_v46 = vadd.f32 %v1344_v43, %v1330_v39 }
 0x2ae   : > { %v1307_v44 = vadd.f32 %v1306_v41, %v5392_v60  ;;  %v1346_v49 = vadd.f32 %v1345_v46, %v1331_v42  ;;  %v1337_v60 = vmul.f32 %v5398_v14, %v5398_v14 }
 0x2b0   : > { %v1308_v47 = vadd.f32 %v1307_v44, %v5394_v2  ;;  %v1347_v52 = vadd.f32 %v1346_v49, %v1332_v45 }
 0x2b2   : > { %v1309_v50 = vadd.f32 %v1308_v47, %v1287_v11  ;;  %v1348_v55 = vadd.f32 %v1347_v52, %v1333_v48 }
 0x2b4   : > { %v1310_v53 = vadd.f32 %v1309_v50, %v1288_v16  ;;  %v1349_v58 = vadd.f32 %v1348_v55, %v1334_v51 }
 0x2b6   : > { %v1311_v56 = vadd.f32 %v1310_v53, %v5396_v8  ;;  %v1350_v61 = vadd.f32 %v1349_v58, %v1335_v54 }
 0x2b8   : > { %v1312_v59 = vadd.f32 %v1311_v56, %v5398_v14  ;;  %v1351_v63 = vadd.f32 %v1350_v61, %v1336_v57 }
 0x2ba   : > { %v1313_v62 = vrot.slane %v1312_v59, 4  ;;  %v1352_v1 = vadd.f32 %v1351_v63, %v1337_v60 }
 0x2bc   : > { %v1314_v0 = vadd.f32 %v1313_v62, %v1312_v59  ;;  %v1353_v3 = vrot.slane %v1352_v1, 4 }
 0x2be   : > { %v1315_v2 = vrot.slane %v1314_v0, 2  ;;  %v1354_v5 = vadd.f32 %v1353_v3, %v1352_v1 }
 0x2c0   : > { %v1316_v4 = vadd.f32 %v1315_v2, %v1314_v0  ;;  %v1355_v7 = vrot.slane %v1354_v5, 2 }
 0x2c2   : > { %v1317_v6 = vrot.slane %v1316_v4, 1  ;;  %v1356_v8 = vadd.f32 %v1355_v7, %v1354_v5 }
 0x2c4   : > { %v1318_v10 = vadd.f32 %v1317_v6, %v1316_v4  ;;  %v1357_v12 = vrot.slane %v1356_v8, 1 }
 0x2c6   : > { %v1319_v11 = vadd.f32 %v1318_v10, %v1297_v9  ;;  %v1358_v15 = vadd.f32 %v1357_v12, %v1356_v8 }
 0x2c8   : > { %1320 = vst [vmem:[#allocation4] sm:$0x1] %v1319_v11  ;;  %v1359_v14 = vadd.f32 %v1358_v15, %v1321_v13 }
 0x2ca   : > { %1360 = vst [vmem:[#allocation5] sm:$0x1] %v1359_v14 }
 0x2cb PF: > { %p3738_p7 = scmp.ne.s32.totalorder %s4980_s26, 1 }
 0x2cc   : > { %s6288_s29 = sld [smem:[#allocation33_spill]] (!%p3738_p7)  ;;  %s5431_s14 = scalar_lea.vmem (!%p3738_p7), [#allocation2], %s5358_s28 }
 0x2cd   : > { %1381 = sbr.rel (%p3738_p7) target bundleno = 1024 (0x400), region = 140  ;;  %s6289_s16 = sld [smem:[#allocation34_spill]] (!%p3738_p7) }
 0x2ce   : > { %s6290_s11 = sld [smem:[#allocation36_spill]] (!%p3738_p7)  ;;  %p3750_p8 = scmp.ne.s32.totalorder (!%p3738_p7), %s4976_s3, 0 }
 0x2d2   : > { %v4580_v16 = vld [vmem:[#allocation14 + $0x38] sm:$0xff]   ;;  %v4581_v17 = vld [vmem:[#allocation14 + $0x30] sm:$0xff]   ;;  %v4582_v18 = vld [vmem:[#allocation14 + $0x28] sm:$0xff]   ;;  %v1411_v27 = vlaneseq }
 0x2d3   : > { %4215 = vmatprep.subr.bf16.mxu0 %v4580_v16  ;;  %4311 = vmatprep.subr.bf16.mxu1 %v4580_v16  ;;  %v4583_v19 = vld [vmem:[#allocation14 + $0x20] sm:$0xff]   ;;  %v1402_v20 = vld [vmem:[#allocation4] sm:$0x1]  ;;  %v1403_v21 = vld [vmem:[#allocation5] sm:$0x1] }
 0x2d4   : > { %4216 = vmatpush3.bf16.msra.mxu0 %v4580_v16  ;;  %4319 = vmatpush3.bf16.msra.mxu1 %v4580_v16  ;;  %v1404_v22 = vmul.f32 0.00390625, %v1402_v20  ;;  %v1405_v23 = vmul.f32 0.00390625, %v1403_v21  ;;  %v4584_v24 = vld [vmem:[#allocation14 + $0x18] sm:$0xff]   ;;  %v4585_v28 = vld [vmem:[#allocation14 + $0x10] sm:$0xff]   ;;  %v1412_v31 = vshrl.u32 %v1411_v27, 7  ;;  %v4586_v32 = vld [vmem:[#allocation14 + $0x8] sm:$0xff]  }
 0x2d5   : > { %4217 = vmatprep.subr.bf16.mxu0 %v4581_v17  ;;  %4312 = vmatprep.subr.bf16.mxu1 %v4581_v17  ;;  %v1399_v33 = vld [vmem:[%s6288_s29] sm:$0x1]  ;;  %v4587_v36 = vld [vmem:[#allocation14] sm:$0xff]   ;;  %v1385_v42 = vld [vmem:[%s5431_s14 + $0x10] sm:$0xff] }
 0x2d6   : > { %v1406_v25 = vmul.f32 %v1404_v22, %v1404_v22  ;;  %v1409_v34 = vadd.f32 %v1404_v22, %v1399_v33  ;;  %v1413_v35 = vsub.s32 0, %v1412_v31  ;;  %v1383_v37 = vld [vmem:[%s5431_s14] sm:$0xff]  ;;  %v1384_v39 = vld [vmem:[%s5431_s14 + $0x8] sm:$0xff]  ;;  %v1386_v43 = vld [vmem:[%s5431_s14 + $0x18] sm:$0xff] }
 0x2d7   : > { %v1391_v40 = vld [vmem:[%s5431_s14 + $0x40] sm:$0xff]  ;;  %v1392_v41 = vld [vmem:[%s5431_s14 + $0x48] sm:$0xff]  ;;  %v1393_v44 = vld [vmem:[%s5431_s14 + $0x50] sm:$0xff] }
 0x2d8   : > { %4218 = vmatpush3.bf16.msra.mxu0 %v4581_v17  ;;  %4320 = vmatpush3.bf16.msra.mxu1 %v4581_v17  ;;  %v1407_v26 = vsub.f32 %v1405_v23, %v1406_v25  ;;  %v5434_v38 = vrot.slane %v1409_v34, %v1413_v35  ;;  %v1394_v45 = vld [vmem:[%s5431_s14 + $0x58] sm:$0xff]  ;;  %v5444_v46 = vld [vmem:[%s5431_s14 + $0x20] sm:$0xff]  ;;  %v5447_v47 = vld [vmem:[%s5431_s14 + $0x28] sm:$0xff] }
 0x2d9   : > { %4219 = vmatprep.subr.bf16.mxu0 %v4582_v18  ;;  %4313 = vmatprep.subr.bf16.mxu1 %v4582_v18  ;;  %v5451_v49 = vld [vmem:[%s5431_s14 + $0x60] sm:$0xff]  ;;  %v5454_v50 = vld [vmem:[%s5431_s14 + $0x68] sm:$0xff]  ;;  %v5457_v51 = vld [vmem:[%s5431_s14 + $0x30] sm:$0xff] }
 0x2da   : > { %v1408_v29 = vmax.f32 %v1407_v26, 0.0  ;;  %v1416_v48 = vsub.f32 %v1383_v37, %v5434_v38  ;;  %v1417_v52 = vsub.f32 %v1384_v39, %v5434_v38  ;;  %v1424_v53 = vsub.f32 %v1391_v40, %v5434_v38  ;;  %v5464_v56 = vld [vmem:[%s5431_s14 + $0x38] sm:$0xff]  ;;  %v5467_v57 = vld [vmem:[%s5431_s14 + $0x70] sm:$0xff]  ;;  %v5488_v4 = vld [vmem:[%s6289_s16] ss:$0 sm:$0xff] }
 0x2db   : > { %v1425_v54 = vsub.f32 %v1392_v41, %v5434_v38  ;;  %v1418_v55 = vsub.f32 %v1385_v42, %v5434_v38  ;;  %v5470_v58 = vld [vmem:[%s5431_s14 + $0x78] sm:$0xff]  ;;  %v1419_v60 = vsub.f32 %v1386_v43, %v5434_v38  ;;  %v1426_v61 = vsub.f32 %v1393_v44, %v5434_v38  ;;  %v5505_v13 = vld [vmem:[%s6222_s5] ss:$0 sm:$0xff] }
 0x2dc   : > { %4220 = vmatpush3.bf16.msra.mxu0 %v4582_v18  ;;  %4321 = vmatpush3.bf16.msra.mxu1 %v4582_v18  ;;  %v1432_v30 = vadd.f32 1e-05, %v1408_v29  ;;  %v1427_v62 = vsub.f32 %v1394_v45, %v5434_v38  ;;  %v1420_v63 = vsub.f32 %v5444_v46, %v5434_v38  ;;  %v1421_v1 = vsub.f32 %v5447_v47, %v5434_v38 }
 0x2dd   : > { %4221 = vmatprep.subr.bf16.mxu0 %v4583_v19  ;;  %4314 = vmatprep.subr.bf16.mxu1 %v4583_v19  ;;  %v1428_v2 = vsub.f32 %v5451_v49, %v5434_v38  ;;  %v1429_v3 = vsub.f32 %v5454_v50, %v5434_v38  ;;  %v1422_v5 = vsub.f32 %v5457_v51, %v5434_v38 }
 0x2de   : > { %4588 = vrsqrt.f32 %v1432_v30  ;;  %v1423_v6 = vsub.f32 %v5464_v56, %v5434_v38  ;;  %v1430_v7 = vsub.f32 %v5467_v57, %v5434_v38  ;;  %v1431_v9 = vsub.f32 %v5470_v58, %v5434_v38 }
 0x2e0   : > { %4222 = vmatpush3.bf16.msra.mxu0 %v4583_v19  ;;  %4322 = vmatpush3.bf16.msra.mxu1 %v4583_v19 }
 0x2e1   : > { %4223 = vmatprep.subr.bf16.mxu0 %v4584_v24  ;;  %4315 = vmatprep.subr.bf16.mxu1 %v4584_v24 }
 0x2e4   : > { %4224 = vmatpush3.bf16.msra.mxu0 %v4584_v24  ;;  %4323 = vmatpush3.bf16.msra.mxu1 %v4584_v24 }
 0x2e5   : > { %4225 = vmatprep.subr.bf16.mxu0 %v4585_v28  ;;  %4316 = vmatprep.subr.bf16.mxu1 %v4585_v28 }
 0x2e8   : > { %4226 = vmatpush3.bf16.msra.mxu0 %v4585_v28  ;;  %4324 = vmatpush3.bf16.msra.mxu1 %v4585_v28 }
 0x2e9   : > { %4227 = vmatprep.subr.bf16.mxu0 %v4586_v32  ;;  %4317 = vmatprep.subr.bf16.mxu1 %v4586_v32 }
 0x2eb   : > { %v4589_v59 = vpop.eup %4588 }
 0x2ec   : > { %4228 = vmatpush3.bf16.msra.mxu0 %v4586_v32  ;;  %4325 = vmatpush3.bf16.msra.mxu1 %v4586_v32  ;;  %v5477_v0 = vrot.slane %v4589_v59, %v1413_v35 }
 0x2ed   : > { %4229 = vmatprep.subr.bf16.mxu0 %v4587_v36  ;;  %4318 = vmatprep.subr.bf16.mxu1 %v4587_v36 }
 0x2ee   : > { %v1440_v10 = vmul.f32 %v5477_v0, %v1416_v48  ;;  %v1441_v8 = vmul.f32 %v5477_v0, %v1417_v52  ;;  %v1448_v11 = vmul.f32 %v5477_v0, %v1424_v53  ;;  %v1449_v12 = vmul.f32 %v5477_v0, %v1425_v54 }
 0x2ef   : > { %v1442_v15 = vmul.f32 %v5477_v0, %v1418_v55  ;;  %v1443_v14 = vmul.f32 %v5477_v0, %v1419_v60  ;;  %v1450_v16 = vmul.f32 %v5477_v0, %v1426_v61  ;;  %v1451_v17 = vmul.f32 %v5477_v0, %v1427_v62 }
 0x2f0   : > { %4230 = vmatpush3.bf16.msra.mxu0 %v4587_v36  ;;  %4326 = vmatpush3.bf16.msra.mxu1 %v4587_v36  ;;  %v1462_v18 = vmul.f32 %v5488_v4, %v1440_v10  ;;  %v1463_v19 = vmul.f32 %v5488_v4, %v1441_v8  ;;  %v1470_v20 = vmul.f32 %v5488_v4, %v1448_v11 }
 0x2f1   : > { %v1471_v21 = vmul.f32 %v5488_v4, %v1449_v12  ;;  %v1464_v22 = vmul.f32 %v5488_v4, %v1442_v15  ;;  %v1465_v23 = vmul.f32 %v5488_v4, %v1443_v14  ;;  %v1472_v24 = vmul.f32 %v5488_v4, %v1450_v16 }
 0x2f2   : > { %v1473_v25 = vmul.f32 %v5488_v4, %v1451_v17  ;;  %v1484_v26 = vadd.f32 %v5505_v13, %v1462_v18  ;;  %v1485_v27 = vadd.f32 %v5505_v13, %v1463_v19  ;;  %v1492_v28 = vadd.f32 %v5505_v13, %v1470_v20 }
 0x2f3   : > { %v1493_v29 = vadd.f32 %v5505_v13, %v1471_v21  ;;  %v1486_v30 = vadd.f32 %v5505_v13, %v1464_v22  ;;  %v1487_v31 = vadd.f32 %v5505_v13, %v1465_v23  ;;  %v1494_v32 = vadd.f32 %v5505_v13, %v1472_v24 }
 0x2f4   : > { %v1495_v33 = vadd.f32 %v5505_v13, %v1473_v25  ;;  %v1500_v34 = vmax.f32 %v1484_v26, 0.0  ;;  %v1501_v35 = vmax.f32 %v1485_v27, 0.0  ;;  %v1508_v36 = vmax.f32 %v1492_v28, 0.0 }
 0x2f5   : > { %v1509_v37 = vmax.f32 %v1493_v29, 0.0  ;;  %v1502_v38 = vmax.f32 %v1486_v30, 0.0  ;;  %v1503_v39 = vmax.f32 %v1487_v31, 0.0  ;;  %v1510_v40 = vmax.f32 %v1494_v32, 0.0 }
 0x2f6   : > { %v1511_v41 = vmax.f32 %v1495_v33, 0.0  ;;  %v1516_v42 = vpack.c.bf16 %v1501_v35, %v1500_v34  ;;  %v1444_v44 = vmul.f32 %v5477_v0, %v1420_v63  ;;  %v1445_v45 = vmul.f32 %v5477_v0, %v1421_v1 }
 0x2f7   : > { %v1520_v43 = vpack.c.bf16 %v1509_v37, %v1508_v36  ;;  %v1517_v46 = vpack.c.bf16 %v1503_v39, %v1502_v38  ;;  %v1452_v48 = vmul.f32 %v5477_v0, %v1428_v2  ;;  %v1453_v49 = vmul.f32 %v5477_v0, %v1429_v3 }
 0x2f8   : > { %v1521_v47 = vpack.c.bf16 %v1511_v41, %v1510_v40  ;;  %4231 = vmatprep.mubr.bf16.mxu0 %v1516_v42  ;;  %v1466_v50 = vmul.f32 %v5488_v4, %v1444_v44  ;;  %v1467_v51 = vmul.f32 %v5488_v4, %v1445_v45  ;;  %v1446_v52 = vmul.f32 %v5477_v0, %v1422_v5 }
 0x2f9   : > { %4239 = vmatprep.mubr.bf16.mxu1 %v1520_v43  ;;  %4232 = vmatmul.mubr.bf16.vlgmr.msra.gmra.mxu0 %v1517_v46  ;;  %v1474_v53 = vmul.f32 %v5488_v4, %v1452_v48  ;;  %v1475_v54 = vmul.f32 %v5488_v4, %v1453_v49  ;;  %v1447_v55 = vmul.f32 %v5477_v0, %v1423_v6 }
 0x2fa   : > { %4240 = vmatmul.mubr.bf16.vlgmr.msra.gmra.mxu1 %v1521_v47  ;;  %v1488_v56 = vadd.f32 %v5505_v13, %v1466_v50  ;;  %v1489_v57 = vadd.f32 %v5505_v13, %v1467_v51  ;;  %v1468_v58 = vmul.f32 %v5488_v4, %v1446_v52  ;;  %v1454_v59 = vmul.f32 %v5477_v0, %v1430_v7 }
 0x2fb   : > { %v1496_v60 = vadd.f32 %v5505_v13, %v1474_v53  ;;  %v1497_v61 = vadd.f32 %v5505_v13, %v1475_v54  ;;  %v1469_v62 = vmul.f32 %v5488_v4, %v1447_v55  ;;  %v1455_v63 = vmul.f32 %v5477_v0, %v1431_v9 }
 0x2fc   : > { %v1504_v1 = vmax.f32 %v1488_v56, 0.0  ;;  %v1505_v2 = vmax.f32 %v1489_v57, 0.0  ;;  %v1490_v3 = vadd.f32 %v5505_v13, %v1468_v58  ;;  %v1476_v5 = vmul.f32 %v5488_v4, %v1454_v59 }
 0x2fd   : > { %v1512_v6 = vmax.f32 %v1496_v60, 0.0  ;;  %v1513_v10 = vmax.f32 %v1497_v61, 0.0  ;;  %v1491_v8 = vadd.f32 %v5505_v13, %v1469_v62  ;;  %v1477_v7 = vmul.f32 %v5488_v4, %v1455_v63  ;;  %v3741_v4 = vld [vmem:[%s6290_s11] ss:$0 sm:$0xff] }
 0x2fe   : > { %v1518_v11 = vpack.c.bf16 %v1505_v2, %v1504_v1  ;;  %v1506_v12 = vmax.f32 %v1490_v3, 0.0  ;;  %v1498_v15 = vadd.f32 %v5505_v13, %v1476_v5 }
 0x2ff   : > { %v1522_v14 = vpack.c.bf16 %v1513_v10, %v1512_v6  ;;  %v1507_v16 = vmax.f32 %v1491_v8, 0.0  ;;  %v1499_v0 = vadd.f32 %v5505_v13, %v1477_v7 }
 0x300   : > { %4235 = vmatprep.mubr.bf16.mxu0 %v1518_v11  ;;  %v1514_v9 = vmax.f32 %v1498_v15, 0.0 }
 0x301   : > { %4243 = vmatprep.mubr.bf16.mxu1 %v1522_v14  ;;  %v1519_v17 = vpack.c.bf16 %v1507_v16, %v1506_v12  ;;  %v1515_v18 = vmax.f32 %v1499_v0, 0.0 }
 0x303   : > { %4236 = vmatmul.mubr.bf16.gmra.mxu0 %v1519_v17  ;;  %v1523_v19 = vpack.c.bf16 %v1515_v18, %v1514_v9 }
 0x305   : > { %4244 = vmatmul.mubr.bf16.gmra.mxu1 %v1523_v19 }
 0x3b9   : > { %v4233_v20 = vpop.f32.mrf.mxu0 }
 0x3ba   : > { %v4241_v21 = vpop.f32.mrf.mxu1  ;;  %v1638_v22 = vadd.f32 %v4233_v20, %v3741_v4 }
 0x3bb   : > { %v5554_v23 = vadd.f32 %v4241_v21, %v3741_v4  ;;  %v1629_v24 = vpop.f32.mrf.mxu0 }
 0x3bc   : > { %v1661_v25 = vpop.f32.mrf.mxu1  ;;  %v5556_v13 = vsub.f32 %v1638_v22, %v3741_v4  ;;  %v1630_v27 = vadd.f32 %v3741_v4, %v1629_v24 }
 0x3bd   : > { %v5559_v26 = vsub.f32 %v5554_v23, %v3741_v4  ;;  %v1662_v28 = vadd.f32 %v3741_v4, %v1661_v25  ;;  %v4234_v29 = vpop.f32.mrf.mxu0 }
 0x3be   : > { %v4242_v30 = vpop.f32.mrf.mxu1  ;;  %v1692_v31 = vsub.f32 %v1630_v27, %v3741_v4  ;;  %v1641_v33 = vadd.f32 %v4234_v29, %v3741_v4 }
 0x3bf   : > { %v5561_v32 = vsub.f32 %v1662_v28, %v3741_v4  ;;  %v1673_v34 = vadd.f32 %v4242_v30, %v3741_v4  ;;  %v1632_v35 = vpop.f32.mrf.mxu0 }
 0x3c0   : > { %v1664_v36 = vpop.f32.mrf.mxu1  ;;  %v1695_v37 = vsub.f32 %v1641_v33, %v3741_v4  ;;  %v1633_v39 = vadd.f32 %v3741_v4, %v1632_v35 }
 0x3c1   : > { %v5563_v38 = vsub.f32 %v1673_v34, %v3741_v4  ;;  %v1665_v40 = vadd.f32 %v3741_v4, %v1664_v36 }
 0x3c2   : > { %v1693_v41 = vsub.f32 %v1633_v39, %v3741_v4 }
 0x3c3   : > { %v5565_v42 = vsub.f32 %v1665_v40, %v3741_v4  ;;  %v4237_v43 = vpop.f32.mrf.mxu0 }
 0x3c4   : > { %v1654_v44 = vadd.f32 %v4237_v43, %v3741_v4 }
 0x3c5   : > { %v4245_v45 = vpop.f32.mrf.mxu1  ;;  %v1645_v46 = vpop.f32.mrf.mxu0 }
 0x3c6   : > { %v1698_v47 = vsub.f32 %v1654_v44, %v3741_v4  ;;  %v1686_v48 = vadd.f32 %v4245_v45, %v3741_v4  ;;  %v1646_v49 = vadd.f32 %v3741_v4, %v1645_v46 }
 0x3c7   : > { %v1677_v50 = vpop.f32.mrf.mxu1  ;;  %v4238_v51 = vpop.f32.mrf.mxu0 }
 0x3c8   : > { %v5567_v52 = vsub.f32 %v1686_v48, %v3741_v4  ;;  %v1696_v53 = vsub.f32 %v1646_v49, %v3741_v4  ;;  %v1678_v54 = vadd.f32 %v3741_v4, %v1677_v50  ;;  %v1657_v55 = vadd.f32 %v4238_v51, %v3741_v4 }
 0x3c9   : > { %v4246_v56 = vpop.f32.mrf.mxu1  ;;  %v1648_v57 = vpop.f32.mrf.mxu0 }
 0x3ca   : > { %v5569_v58 = vsub.f32 %v1678_v54, %v3741_v4  ;;  %v1699_v59 = vsub.f32 %v1657_v55, %v3741_v4  ;;  %v1689_v60 = vadd.f32 %v4246_v56, %v3741_v4  ;;  %v1649_v61 = vadd.f32 %v3741_v4, %v1648_v57  ;;  %1711 = sbr.rel (%p3750_p8) target bundleno = 977 (0x3d1), region = 144 }
 0x3cb   : > { %v1680_v62 = vpop.f32.mrf.mxu1 }
 0x3cc   : > { %v5571_v63 = vsub.f32 %v1689_v60, %v3741_v4  ;;  %v1697_v1 = vsub.f32 %v1649_v61, %v3741_v4  ;;  %v1681_v2 = vadd.f32 %v3741_v4, %v1680_v62 }
 0x3ce   : > { %v1705_v3 = vsub.f32 %v1681_v2, %v3741_v4 }
 0x3cf   : > { %v5006_v5 = vmov 0.0  }
 0x3d0   : > { %1712 = vst [vmem:[#allocation6] sm:$0x1] %v5006_v5  ;;  %1713 = vst [vmem:[#allocation7] sm:$0x1] %v5006_v5 }
 0x3d1 PF: > { %v1715_v6 = vadd.f32 %v1693_v41, %v1692_v31  ;;  %v1739_v10 = vmul.f32 %v1692_v31, %v1692_v31  ;;  %v1740_v8 = vmul.f32 %v1693_v41, %v1693_v41  ;;  %1778 = vst [vmem:[%s5431_s14] sm:$0xff] %v1630_v27  ;;  %1779 = vst [vmem:[%s5431_s14 + $0x8] sm:$0xff] %v1633_v39 }
 0x3d2   : > { %1780 = vst [vmem:[%s5431_s14 + $0x10] sm:$0xff] %v1638_v22  ;;  %1781 = vst [vmem:[%s5431_s14 + $0x18] sm:$0xff] %v1641_v33  ;;  %v1741_v11 = vmul.f32 %v5556_v13, %v5556_v13  ;;  %v1742_v15 = vmul.f32 %v1695_v37, %v1695_v37  ;;  %v1743_v0 = vmul.f32 %v1696_v53, %v1696_v53 }
 0x3d3   : > { %1782 = vst [vmem:[%s5431_s14 + $0x20] sm:$0xff] %v1646_v49  ;;  %1783 = vst [vmem:[%s5431_s14 + $0x28] sm:$0xff] %v1649_v61  ;;  %v1716_v7 = vadd.f32 %v1715_v6, %v5556_v13  ;;  %v1755_v14 = vadd.f32 %v1740_v8, %v1739_v10  ;;  %v1744_v18 = vmul.f32 %v1697_v1, %v1697_v1 }
 0x3d4   : > { %1784 = vst [vmem:[%s5431_s14 + $0x30] sm:$0xff] %v1654_v44  ;;  %1785 = vst [vmem:[%s5431_s14 + $0x38] sm:$0xff] %v1657_v55  ;;  %v1745_v20 = vmul.f32 %v1698_v47, %v1698_v47  ;;  %v1747_v13 = vmul.f32 %v5561_v32, %v5561_v32  ;;  %v1748_v29 = vmul.f32 %v5565_v42, %v5565_v42 }
 0x3d5   : > { %1786 = vst [vmem:[%s5431_s14 + $0x40] sm:$0xff] %v1662_v28  ;;  %1787 = vst [vmem:[%s5431_s14 + $0x48] sm:$0xff] %v1665_v40  ;;  %v1717_v12 = vadd.f32 %v1716_v7, %v1695_v37  ;;  %v1756_v9 = vadd.f32 %v1755_v14, %v1741_v11  ;;  %v1749_v33 = vmul.f32 %v5559_v26, %v5559_v26 }
 0x3d6   : > { %1788 = vst [vmem:[%s5431_s14 + $0x50] sm:$0xff] %v5554_v23  ;;  %1789 = vst [vmem:[%s5431_s14 + $0x58] sm:$0xff] %v1673_v34  ;;  %v1746_v23 = vmul.f32 %v1699_v59, %v1699_v59  ;;  %v1750_v36 = vmul.f32 %v5563_v38, %v5563_v38  ;;  %v1751_v39 = vmul.f32 %v5569_v58, %v5569_v58 }
 0x3d7   : > { %1790 = vst [vmem:[%s5431_s14 + $0x60] sm:$0xff] %v1678_v54  ;;  %1791 = vst [vmem:[%s5431_s14 + $0x68] sm:$0xff] %v1681_v2  ;;  %v1718_v16 = vadd.f32 %v1717_v12, %v1696_v53  ;;  %v1757_v19 = vadd.f32 %v1756_v9, %v1742_v15 }
 0x3d8   : > { %1792 = vst [vmem:[%s5431_s14 + $0x70] sm:$0xff] %v1686_v48  ;;  %1793 = vst [vmem:[%s5431_s14 + $0x78] sm:$0xff] %v1689_v60 }
 0x3d9   : > { %v1719_v17 = vadd.f32 %v1718_v16, %v1697_v1  ;;  %v1758_v21 = vadd.f32 %v1757_v19, %v1743_v0  ;;  %v1738_v1 = vld [vmem:[#allocation7] sm:$0x1] }
 0x3db   : > { %v1720_v4 = vadd.f32 %v1719_v17, %v1698_v47  ;;  %v1759_v24 = vadd.f32 %v1758_v21, %v1744_v18 }
 0x3dd   : > { %v1721_v22 = vadd.f32 %v1720_v4, %v1699_v59  ;;  %v1760_v27 = vadd.f32 %v1759_v24, %v1745_v20  ;;  %v1714_v59 = vld [vmem:[#allocation6] sm:$0x1] }
 0x3df   : > { %v1722_v25 = vadd.f32 %v1721_v22, %v5561_v32  ;;  %v1761_v30 = vadd.f32 %v1760_v27, %v1746_v23 }
 0x3e1   : > { %v1723_v28 = vadd.f32 %v1722_v25, %v5565_v42  ;;  %v1762_v34 = vadd.f32 %v1761_v30, %v1747_v13  ;;  %v1752_v42 = vmul.f32 %v1705_v3, %v1705_v3 }
 0x3e3   : > { %v1724_v31 = vadd.f32 %v1723_v28, %v5559_v26  ;;  %v1763_v37 = vadd.f32 %v1762_v34, %v1748_v29  ;;  %v1753_v26 = vmul.f32 %v5567_v52, %v5567_v52 }
 0x3e5   : > { %v1725_v35 = vadd.f32 %v1724_v31, %v5563_v38  ;;  %v1764_v40 = vadd.f32 %v1763_v37, %v1749_v33  ;;  %v1754_v38 = vmul.f32 %v5571_v63, %v5571_v63 }
 0x3e7   : > { %v1726_v32 = vadd.f32 %v1725_v35, %v5569_v58  ;;  %v1765_v43 = vadd.f32 %v1764_v40, %v1750_v36 }
 0x3e9   : > { %v1727_v41 = vadd.f32 %v1726_v32, %v1705_v3  ;;  %v1766_v45 = vadd.f32 %v1765_v43, %v1751_v39 }
 0x3eb   : > { %v1728_v44 = vadd.f32 %v1727_v41, %v5567_v52  ;;  %v1767_v47 = vadd.f32 %v1766_v45, %v1752_v42 }
 0x3ed   : > { %v1729_v46 = vadd.f32 %v1728_v44, %v5571_v63  ;;  %v1768_v49 = vadd.f32 %v1767_v47, %v1753_v26 }
 0x3ef   : > { %v1730_v48 = vrot.slane %v1729_v46, 4  ;;  %v1769_v51 = vadd.f32 %v1768_v49, %v1754_v38 }
 0x3f1   : > { %v1731_v50 = vadd.f32 %v1730_v48, %v1729_v46  ;;  %v1770_v54 = vrot.slane %v1769_v51, 4 }
 0x3f3   : > { %v1732_v53 = vrot.slane %v1731_v50, 2  ;;  %v1771_v56 = vadd.f32 %v1770_v54, %v1769_v51 }
 0x3f5   : > { %v1733_v55 = vadd.f32 %v1732_v53, %v1731_v50  ;;  %v1772_v58 = vrot.slane %v1771_v56, 2 }
 0x3f7   : > { %v1734_v57 = vrot.slane %v1733_v55, 1  ;;  %v1773_v52 = vadd.f32 %v1772_v58, %v1771_v56 }
 0x3f9   : > { %v1735_v60 = vadd.f32 %v1734_v57, %v1733_v55  ;;  %v1774_v62 = vrot.slane %v1773_v52, 1 }
 0x3fb   : > { %v1736_v61 = vadd.f32 %v1735_v60, %v1714_v59  ;;  %v1775_v2 = vadd.f32 %v1774_v62, %v1773_v52 }
 0x3fd   : > { %1737 = vst [vmem:[#allocation6] sm:$0x1] %v1736_v61  ;;  %v1776_v63 = vadd.f32 %v1775_v2, %v1738_v1 }
 0x3ff   : > { %1777 = vst [vmem:[#allocation7] sm:$0x1] %v1776_v63 }
 0x400 PF: > { %p3751_p13 = scmp.ne.s32.totalorder %s4980_s26, 2 }
 0x401   : > { %s6291_s13 = sld [smem:[#allocation36_spill]] (!%p3751_p13)  ;;  %s1798_s24 = scalar_lea.vmem (!%p3751_p13), [#allocation2], %s5358_s28 }
 0x402   : > { %1797 = sbr.rel (%p3751_p13) target bundleno = 1081 (0x439), region = 148  ;;  %s6292_s18 = sld [smem:[#allocation37_spill]] (!%p3751_p13) }
 0x403   : > { %s6293_s15 = sld [smem:[#allocation38_spill]] (!%p3751_p13)  ;;  %s1996_s7 = sshra.s32 (!%p3751_p13), %s5358_s28, 3 }
 0x404   : > { %s3770_s0 = sshll.u32 (!%p3751_p13), %s1996_s7, 2 }
 0x405   : > { %s5703_s30 = scalar_lea.vmem (!%p3751_p13), [#allocation3], %s3770_s0 }
 0x407   : > { %v1818_v3 = vld [vmem:[#allocation6] sm:$0x1]  ;;  %v1819_v5 = vld [vmem:[#allocation7] sm:$0x1]  ;;  %v1827_v11 = vlaneseq  ;;  %v1815_v16 = vld [vmem:[%s6291_s13] sm:$0x1] }
 0x408   : > { %v1820_v6 = vmul.f32 0.00390625, %v1818_v3  ;;  %v1821_v10 = vmul.f32 0.00390625, %v1819_v5  ;;  %v1799_v17 = vld [vmem:[%s1798_s24] sm:$0xff]  ;;  %v1800_v19 = vld [vmem:[%s1798_s24 + $0x8] sm:$0xff]  ;;  %v1801_v4 = vld [vmem:[%s1798_s24 + $0x10] sm:$0xff] }
 0x409   : > { %v1828_v14 = vshrl.u32 %v1827_v11, 7  ;;  %v1802_v20 = vld [vmem:[%s1798_s24 + $0x18] sm:$0xff]  ;;  %v1803_v21 = vld [vmem:[%s1798_s24 + $0x20] sm:$0xff]  ;;  %v1804_v22 = vld [vmem:[%s1798_s24 + $0x28] sm:$0xff] }
 0x40a   : > { %v1822_v8 = vmul.f32 %v1820_v6, %v1820_v6  ;;  %v1825_v0 = vadd.f32 %v1820_v6, %v1815_v16  ;;  %v1805_v23 = vld [vmem:[%s1798_s24 + $0x30] sm:$0xff]  ;;  %v1806_v24 = vld [vmem:[%s1798_s24 + $0x38] sm:$0xff]  ;;  %v5622_v25 = vld [vmem:[%s1798_s24 + $0x40] sm:$0xff] }
 0x40b   : > { %v1829_v9 = vsub.s32 0, %v1828_v14  ;;  %v5624_v13 = vld [vmem:[%s1798_s24 + $0x48] sm:$0xff]  ;;  %v5627_v28 = vld [vmem:[%s1798_s24 + $0x50] sm:$0xff]  ;;  %v5629_v29 = vld [vmem:[%s1798_s24 + $0x58] sm:$0xff] }
 0x40c   : > { %v1823_v7 = vsub.f32 %v1821_v10, %v1822_v8  ;;  %v5631_v30 = vld [vmem:[%s1798_s24 + $0x60] sm:$0xff]  ;;  %v5637_v36 = vld [vmem:[%s1798_s24 + $0x68] sm:$0xff]  ;;  %v5639_v37 = vld [vmem:[%s1798_s24 + $0x70] sm:$0xff] }
 0x40d   : > { %v5620_v18 = vrot.slane %v1825_v0, %v1829_v9  ;;  %v5641_v32 = vld [vmem:[%s1798_s24 + $0x78] sm:$0xff]  ;;  %v5659_v38 = vld [vmem:[%s6292_s18] ss:$0 sm:$0xff] }
 0x40e   : > { %v1824_v12 = vmax.f32 %v1823_v7, 0.0  ;;  %v5676_v56 = vld [vmem:[%s6293_s15] ss:$0 sm:$0xff] }
 0x40f   : > { %v1832_v27 = vsub.f32 %v1799_v17, %v5620_v18  ;;  %v1833_v31 = vsub.f32 %v1800_v19, %v5620_v18  ;;  %v1834_v33 = vsub.f32 %v1801_v4, %v5620_v18  ;;  %v1835_v34 = vsub.f32 %v1802_v20, %v5620_v18 }
 0x410   : > { %v1848_v15 = vadd.f32 1e-05, %v1824_v12  ;;  %v1836_v35 = vsub.f32 %v1803_v21, %v5620_v18  ;;  %v1837_v40 = vsub.f32 %v1804_v22, %v5620_v18  ;;  %v1838_v41 = vsub.f32 %v1805_v23, %v5620_v18 }
 0x411   : > { %v1839_v42 = vsub.f32 %v1806_v24, %v5620_v18  ;;  %v1840_v43 = vsub.f32 %v5622_v25, %v5620_v18  ;;  %v1841_v26 = vsub.f32 %v5624_v13, %v5620_v18  ;;  %v1842_v45 = vsub.f32 %v5627_v28, %v5620_v18 }
 0x412   : > { %4590 = vrsqrt.f32 %v1848_v15  ;;  %v1843_v46 = vsub.f32 %v5629_v29, %v5620_v18  ;;  %v1844_v47 = vsub.f32 %v5631_v30, %v5620_v18  ;;  %v1845_v48 = vsub.f32 %v5637_v36, %v5620_v18 }
 0x413   : > { %v1846_v49 = vsub.f32 %v5639_v37, %v5620_v18  ;;  %v1847_v50 = vsub.f32 %v5641_v32, %v5620_v18 }
 0x41f   : > { %v4591_v39 = vpop.eup %4590 }
 0x420   : > { %v5648_v44 = vrot.slane %v4591_v39, %v1829_v9 }
 0x422   : > { %v1856_v51 = vmul.f32 %v5648_v44, %v1832_v27  ;;  %v1857_v53 = vmul.f32 %v5648_v44, %v1833_v31  ;;  %v1858_v54 = vmul.f32 %v5648_v44, %v1834_v33  ;;  %v1859_v55 = vmul.f32 %v5648_v44, %v1835_v34 }
 0x423   : > { %v1860_v57 = vmul.f32 %v5648_v44, %v1836_v35  ;;  %v1861_v58 = vmul.f32 %v5648_v44, %v1837_v40  ;;  %v1862_v59 = vmul.f32 %v5648_v44, %v1838_v41  ;;  %v1863_v60 = vmul.f32 %v5648_v44, %v1839_v42 }
 0x424   : > { %v1878_v52 = vmul.f32 %v5659_v38, %v1856_v51  ;;  %v1879_v61 = vmul.f32 %v5659_v38, %v1857_v53  ;;  %v1880_v62 = vmul.f32 %v5659_v38, %v1858_v54  ;;  %v1881_v1 = vmul.f32 %v5659_v38, %v1859_v55 }
 0x425   : > { %v1882_v2 = vmul.f32 %v5659_v38, %v1860_v57  ;;  %v1883_v63 = vmul.f32 %v5659_v38, %v1861_v58  ;;  %v1884_v3 = vmul.f32 %v5659_v38, %v1862_v59  ;;  %v1885_v5 = vmul.f32 %v5659_v38, %v1863_v60 }
 0x426   : > { %v1900_v6 = vadd.f32 %v5676_v56, %v1878_v52  ;;  %v1901_v10 = vadd.f32 %v5676_v56, %v1879_v61  ;;  %v1902_v8 = vadd.f32 %v5676_v56, %v1880_v62  ;;  %v1903_v7 = vadd.f32 %v5676_v56, %v1881_v1 }
 0x427   : > { %v1904_v11 = vadd.f32 %v5676_v56, %v1882_v2  ;;  %v1905_v12 = vadd.f32 %v5676_v56, %v1883_v63  ;;  %v1906_v15 = vadd.f32 %v5676_v56, %v1884_v3  ;;  %v1907_v14 = vadd.f32 %v5676_v56, %v1885_v5 }
 0x428   : > { %v1916_v16 = vmax.f32 %v1900_v6, 0.0  ;;  %v1917_v0 = vmax.f32 %v1901_v10, 0.0  ;;  %v1918_v9 = vmax.f32 %v1902_v8, 0.0  ;;  %v1919_v17 = vmax.f32 %v1903_v7, 0.0 }
 0x429   : > { %v1920_v18 = vmax.f32 %v1904_v11, 0.0  ;;  %v1921_v19 = vmax.f32 %v1905_v12, 0.0  ;;  %v1922_v4 = vmax.f32 %v1906_v15, 0.0  ;;  %v1923_v20 = vmax.f32 %v1907_v14, 0.0 }
 0x42a   : > { %v3883_v21 = vpack.c.bf16 %v1917_v0, %v1916_v16  ;;  %v3888_v22 = vpack.c.bf16 %v1919_v17, %v1918_v9  ;;  %v1864_v23 = vmul.f32 %v5648_v44, %v1840_v43  ;;  %v1865_v24 = vmul.f32 %v5648_v44, %v1841_v26 }
 0x42b   : > { %v3893_v25 = vpack.c.bf16 %v1921_v19, %v1920_v18  ;;  %v3898_v13 = vpack.c.bf16 %v1923_v20, %v1922_v4  ;;  %v1866_v27 = vmul.f32 %v5648_v44, %v1842_v45  ;;  %v1867_v28 = vmul.f32 %v5648_v44, %v1843_v46 }
 0x42c   : > { %3884 = vst [vmem:[%s5703_s30] sm:$0xff] %v3883_v21   ;;  %3920 = vst [vmem:[%s5703_s30 + $0x8] sm:$0xff] %v3888_v22   ;;  %v1886_v29 = vmul.f32 %v5659_v38, %v1864_v23  ;;  %v1887_v30 = vmul.f32 %v5659_v38, %v1865_v24  ;;  %v1868_v31 = vmul.f32 %v5648_v44, %v1844_v47 }
 0x42d   : > { %v1869_v33 = vmul.f32 %v5648_v44, %v1845_v48  ;;  %3921 = vst [vmem:[%s5703_s30 + $0x10] sm:$0xff] %v3893_v25   ;;  %3922 = vst [vmem:[%s5703_s30 + $0x18] sm:$0xff] %v3898_v13   ;;  %v1888_v34 = vmul.f32 %v5659_v38, %v1866_v27  ;;  %v1889_v35 = vmul.f32 %v5659_v38, %v1867_v28 }
 0x42e   : > { %v1870_v36 = vmul.f32 %v5648_v44, %v1846_v49  ;;  %v1871_v37 = vmul.f32 %v5648_v44, %v1847_v50  ;;  %v1908_v32 = vadd.f32 %v5676_v56, %v1886_v29  ;;  %v1909_v39 = vadd.f32 %v5676_v56, %v1887_v30 }
 0x42f   : > { %v1890_v40 = vmul.f32 %v5659_v38, %v1868_v31  ;;  %v1891_v41 = vmul.f32 %v5659_v38, %v1869_v33  ;;  %v1910_v42 = vadd.f32 %v5676_v56, %v1888_v34  ;;  %v1911_v43 = vadd.f32 %v5676_v56, %v1889_v35 }
 0x430   : > { %v1892_v26 = vmul.f32 %v5659_v38, %v1870_v36  ;;  %v1893_v45 = vmul.f32 %v5659_v38, %v1871_v37  ;;  %v1924_v46 = vmax.f32 %v1908_v32, 0.0  ;;  %v1925_v44 = vmax.f32 %v1909_v39, 0.0 }
 0x431   : > { %v1912_v47 = vadd.f32 %v5676_v56, %v1890_v40  ;;  %v1913_v48 = vadd.f32 %v5676_v56, %v1891_v41  ;;  %v1926_v49 = vmax.f32 %v1910_v42, 0.0  ;;  %v1927_v50 = vmax.f32 %v1911_v43, 0.0 }
 0x432   : > { %v1914_v51 = vadd.f32 %v5676_v56, %v1892_v26  ;;  %v1915_v53 = vadd.f32 %v5676_v56, %v1893_v45  ;;  %v3903_v54 = vpack.c.bf16 %v1925_v44, %v1924_v46 }
 0x433   : > { %v1928_v55 = vmax.f32 %v1912_v47, 0.0  ;;  %v1929_v57 = vmax.f32 %v1913_v48, 0.0  ;;  %v3908_v58 = vpack.c.bf16 %v1927_v50, %v1926_v49 }
 0x434   : > { %v1930_v38 = vmax.f32 %v1914_v51, 0.0  ;;  %v1931_v59 = vmax.f32 %v1915_v53, 0.0  ;;  %3923 = vst [vmem:[%s5703_s30 + $0x20] sm:$0xff] %v3903_v54  }
 0x435   : > { %v3913_v60 = vpack.c.bf16 %v1929_v57, %v1928_v55  ;;  %3924 = vst [vmem:[%s5703_s30 + $0x28] sm:$0xff] %v3908_v58  }
 0x436   : > { %v3918_v52 = vpack.c.bf16 %v1931_v59, %v1930_v38 }
 0x437   : > { %3925 = vst [vmem:[%s5703_s30 + $0x30] sm:$0xff] %v3913_v60  }
 0x438   : > { %3926 = vst [vmem:[%s5703_s30 + $0x38] sm:$0xff] %v3918_v52  }
 0x439 PF: > { %p3771_p6 = scmp.ne.s32.totalorder %s4980_s26, 3 }
 0x43a   : > { %s6294_s9 = sld [smem:[#allocation40_spill]] (!%p3771_p6)  ;;  %p3813_p9 = scmp.ne.s32.totalorder (!%p3771_p6), %s4976_s3, 0 }
 0x43b   : > { %2019 = sbr.rel (%p3771_p6) target bundleno = 1631 (0x65f), region = 152 }
 0x440   : > { %v4592_v61 = vld [vmem:[#allocation3 + $0x78] sm:$0xff]   ;;  %v4594_v56 = vld [vmem:[#allocation3 + $0x70] sm:$0xff]   ;;  %v4596_v2 = vld [vmem:[#allocation3 + $0x68] sm:$0xff]  }
 0x441   : > { %v4593_v62 = vld [vmem:[#allocation3 + $0x38] sm:$0xff]   ;;  %4023 = vmatprep.subr.bf16.mxu0 %v4592_v61  ;;  %v4595_v1 = vld [vmem:[#allocation3 + $0x30] sm:$0xff]   ;;  %v4597_v63 = vld [vmem:[#allocation3 + $0x28] sm:$0xff]  }
 0x442   : > { %4024 = vmatpush3.bf16.msra.mxu0 %v4593_v62  ;;  %v4598_v3 = vld [vmem:[#allocation3 + $0x60] sm:$0xff]   ;;  %v4600_v6 = vld [vmem:[#allocation3 + $0x58] sm:$0xff]   ;;  %v4602_v8 = vld [vmem:[#allocation3 + $0x50] sm:$0xff]  }
 0x443   : > { %4025 = vmatprep.subr.bf16.mxu0 %v4594_v56  ;;  %v4599_v5 = vld [vmem:[#allocation3 + $0x20] sm:$0xff]   ;;  %v4601_v10 = vld [vmem:[#allocation3 + $0x18] sm:$0xff]   ;;  %v4610_v7 = vld [vmem:[%s5338_s12 + $0x4] ss:$8 sps:$4 sm:$0xff]  }
 0x444   : > { %v4603_v11 = vld [vmem:[#allocation3 + $0x10] sm:$0xff]   ;;  %2276 = vmatprep.mubr.bf16.mxu0 %v4610_v7  ;;  %v4604_v12 = vld [vmem:[#allocation3 + $0x48] sm:$0xff]   ;;  %v4606_v14 = vld [vmem:[#allocation3 + $0x40] sm:$0xff]  }
 0x445   : > { %v4605_v15 = vld [vmem:[#allocation3 + $0x8] sm:$0xff]   ;;  %v4607_v16 = vld [vmem:[#allocation3] sm:$0xff]   ;;  %v4633_v17 = vld [vmem:[#allocation16 + $0x30] sm:$0xff]  }
 0x446   : > { %4026 = vmatpush3.bf16.msra.mxu0 %v4595_v1  ;;  %v4632_v0 = vld [vmem:[#allocation16 + $0x38] sm:$0xff]   ;;  %v4608_v9 = vld [vmem:[%s5338_s12] ss:$8 sps:$4 sm:$0xff]   ;;  %v4614_v21 = vld [vmem:[%s5338_s12 + $0x24] ss:$8 sps:$4 sm:$0xff]  }
 0x447   : > { %4027 = vmatprep.subr.bf16.mxu0 %v4596_v2  ;;  %v4611_v18 = vld [vmem:[%s5338_s12 + $0x14] ss:$8 sps:$4 sm:$0xff]   ;;  %4247 = vmatprep.subr.bf16.mxu1 %v4632_v0  ;;  %v4634_v19 = vld [vmem:[#allocation16 + $0x28] sm:$0xff]   ;;  %v4635_v4 = vld [vmem:[#allocation16 + $0x20] sm:$0xff]  }
 0x448   : > { %4248 = vmatpush3.bf16.msra.mxu1 %v4632_v0  ;;  %v4613_v20 = vld [vmem:[%s5338_s12 + $0x10] ss:$8 sps:$4 sm:$0xff]   ;;  %v4616_v22 = vld [vmem:[%s5338_s12 + $0x20] ss:$8 sps:$4 sm:$0xff]   ;;  %v4617_v23 = vld [vmem:[%s5338_s12 + $0x34] ss:$8 sps:$4 sm:$0xff]  }
 0x449   : > { %4249 = vmatprep.subr.bf16.mxu1 %v4633_v17  ;;  %v4619_v24 = vld [vmem:[%s5338_s12 + $0x30] ss:$8 sps:$4 sm:$0xff]   ;;  %v4620_v25 = vld [vmem:[%s5338_s12 + $0x44] ss:$8 sps:$4 sm:$0xff]   ;;  %v4622_v13 = vld [vmem:[%s5338_s12 + $0x40] ss:$8 sps:$4 sm:$0xff]  }
 0x44a   : > { %4028 = vmatpush3.bf16.msra.mxu0 %v4597_v63  ;;  %v4623_v27 = vld [vmem:[%s5338_s12 + $0x54] ss:$8 sps:$4 sm:$0xff]   ;;  %v4625_v28 = vld [vmem:[%s5338_s12 + $0x50] ss:$8 sps:$4 sm:$0xff]   ;;  %v4626_v29 = vld [vmem:[%s5338_s12 + $0x64] ss:$8 sps:$4 sm:$0xff]  }
 0x44b   : > { %4029 = vmatprep.subr.bf16.mxu0 %v4598_v3  ;;  %v4628_v30 = vld [vmem:[%s5338_s12 + $0x60] ss:$8 sps:$4 sm:$0xff]   ;;  %v4629_v31 = vld [vmem:[%s5338_s12 + $0x74] ss:$8 sps:$4 sm:$0xff]   ;;  %v4631_v33 = vld [vmem:[%s5338_s12 + $0x70] ss:$8 sps:$4 sm:$0xff]  }
 0x44c   : > { %4250 = vmatpush3.bf16.msra.mxu1 %v4633_v17  ;;  %v4636_v34 = vld [vmem:[#allocation16 + $0x18] sm:$0xff]   ;;  %v4637_v35 = vld [vmem:[#allocation16 + $0x10] sm:$0xff]   ;;  %v4638_v36 = vld [vmem:[#allocation16 + $0x8] sm:$0xff]  }
 0x44d   : > { %4251 = vmatprep.subr.bf16.mxu1 %v4634_v19  ;;  %v4639_v37 = vld [vmem:[#allocation16] sm:$0xff]  }
 0x44e   : > { %4030 = vmatpush3.bf16.msra.mxu0 %v4599_v5 }
 0x44f   : > { %4031 = vmatprep.subr.bf16.mxu0 %v4600_v6 }
 0x450   : > { %4252 = vmatpush3.bf16.msra.mxu1 %v4634_v19 }
 0x451   : > { %4253 = vmatprep.subr.bf16.mxu1 %v4635_v4 }
 0x452   : > { %4032 = vmatpush3.bf16.msra.mxu0 %v4601_v10 }
 0x453   : > { %4033 = vmatprep.subr.bf16.mxu0 %v4602_v8 }
 0x454   : > { %4254 = vmatpush3.bf16.msra.mxu1 %v4635_v4 }
 0x455   : > { %4255 = vmatprep.subr.bf16.mxu1 %v4636_v34 }
 0x456   : > { %4034 = vmatpush3.bf16.msra.mxu0 %v4603_v11 }
 0x457   : > { %4035 = vmatprep.subr.bf16.mxu0 %v4604_v12 }
 0x458   : > { %4256 = vmatpush3.bf16.msra.mxu1 %v4636_v34 }
 0x459   : > { %4257 = vmatprep.subr.bf16.mxu1 %v4637_v35 }
 0x45a   : > { %4036 = vmatpush3.bf16.msra.mxu0 %v4605_v15 }
 0x45b   : > { %4037 = vmatprep.subr.bf16.mxu0 %v4606_v14 }
 0x45c   : > { %4258 = vmatpush3.bf16.msra.mxu1 %v4637_v35 }
 0x45d   : > { %4259 = vmatprep.subr.bf16.mxu1 %v4638_v36 }
 0x45e   : > { %4038 = vmatpush3.bf16.msra.mxu0 %v4607_v16 }
 0x460   : > { %4260 = vmatpush3.bf16.msra.mxu1 %v4638_v36 }
 0x461   : > { %2277 = vmatmul.mubr.bf16.vlgmr.msra.gmra.mxu0 %v4608_v9  ;;  %4261 = vmatprep.subr.bf16.mxu1 %v4639_v37 }
 0x462   : > { %2284 = vmatprep.mubr.bf16.mxu0 %v4611_v18 }
 0x464   : > { %4262 = vmatpush3.bf16.msra.mxu1 %v4639_v37 }
 0x469   : > { %2285 = vmatmul.mubr.bf16.gmra.mxu0 %v4613_v20 }
 0x46a   : > { %2292 = vmatprep.mubr.bf16.mxu0 %v4614_v21 }
 0x471   : > { %2293 = vmatmul.mubr.bf16.gmra.mxu0 %v4616_v22 }
 0x472   : > { %2300 = vmatprep.mubr.bf16.mxu0 %v4617_v23 }
 0x479   : > { %2301 = vmatmul.mubr.bf16.gmra.mxu0 %v4619_v24 }
 0x47a   : > { %2308 = vmatprep.mubr.bf16.mxu0 %v4620_v25 }
 0x481   : > { %2309 = vmatmul.mubr.bf16.gmra.mxu0 %v4622_v13 }
 0x482   : > { %2316 = vmatprep.mubr.bf16.mxu0 %v4623_v27 }
 0x489   : > { %2317 = vmatmul.mubr.bf16.gmra.mxu0 %v4625_v28 }
 0x48a   : > { %2324 = vmatprep.mubr.bf16.mxu0 %v4626_v29  ;;  %v3804_v29 = vld [vmem:[%s6294_s9] ss:$0 sm:$0xff] }
 0x491   : > { %2325 = vmatmul.mubr.bf16.gmra.mxu0 %v4628_v30 }
 0x492   : > { %2332 = vmatprep.mubr.bf16.mxu0 %v4629_v31 }
 0x499   : > { %2333 = vmatmul.mubr.bf16.gmra.mxu0 %v4631_v33 }
 0x521   : > { %v4039_v32 = vpop.f32.mrf.mxu0 }
 0x523   : > { %v4040_v39 = vpop.f32.mrf.mxu0 }
 0x524   : > { %v4041_v42 = vadd.f32 %v4040_v39, %v4039_v32 }
 0x525   : > { %v4042_v40 = vpop.f32.mrf.mxu0 }
 0x527   : > { %v4043_v41 = vpop.f32.mrf.mxu0 }
 0x528   : > { %v4044_v43 = vadd.f32 %v4043_v41, %v4042_v40 }
 0x529   : > { %v4045_v26 = vpop.f32.mrf.mxu0 }
 0x52a   : > { %v2341_v45 = vpack.c.bf16 %v4044_v43, %v4041_v42 }
 0x52b   : > { %v4046_v46 = vpop.f32.mrf.mxu0 }
 0x52c   : > { %4263 = vmatprep.mubr.bf16.mxu1 %v2341_v45  ;;  %v4047_v48 = vadd.f32 %v4046_v46, %v4045_v26 }
 0x52d   : > { %v4048_v44 = vpop.f32.mrf.mxu0 }
 0x52f   : > { %v4049_v47 = vpop.f32.mrf.mxu0 }
 0x530   : > { %v4050_v49 = vadd.f32 %v4049_v47, %v4048_v44 }
 0x531   : > { %v4051_v50 = vpop.f32.mrf.mxu0 }
 0x532   : > { %v2342_v51 = vpack.c.bf16 %v4050_v49, %v4047_v48 }
 0x533   : > { %v4052_v53 = vpop.f32.mrf.mxu0 }
 0x534   : > { %4264 = vmatmul.mubr.bf16.vlgmr.msra.gmra.mxu1 %v2342_v51  ;;  %v4053_v57 = vadd.f32 %v4052_v53, %v4051_v50 }
 0x535   : > { %v4054_v54 = vpop.f32.mrf.mxu0 }
 0x537   : > { %v4055_v55 = vpop.f32.mrf.mxu0 }
 0x538   : > { %v4056_v58 = vadd.f32 %v4055_v55, %v4054_v54 }
 0x539   : > { %v4057_v38 = vpop.f32.mrf.mxu0 }
 0x53a   : > { %v2343_v59 = vpack.c.bf16 %v4056_v58, %v4053_v57 }
 0x53b   : > { %v4058_v60 = vpop.f32.mrf.mxu0 }
 0x53c   : > { %4267 = vmatprep.mubr.bf16.mxu1 %v2343_v59  ;;  %v4059_v62 = vadd.f32 %v4058_v60, %v4057_v38 }
 0x53d   : > { %v4060_v52 = vpop.f32.mrf.mxu0 }
 0x53f   : > { %v4061_v61 = vpop.f32.mrf.mxu0 }
 0x540   : > { %v4062_v56 = vadd.f32 %v4061_v61, %v4060_v52 }
 0x541   : > { %v4063_v1 = vpop.f32.mrf.mxu0 }
 0x542   : > { %v2344_v2 = vpack.c.bf16 %v4062_v56, %v4059_v62 }
 0x543   : > { %v4064_v63 = vpop.f32.mrf.mxu0 }
 0x544   : > { %4268 = vmatmul.mubr.bf16.gmra.mxu1 %v2344_v2  ;;  %v4065_v6 = vadd.f32 %v4064_v63, %v4063_v1 }
 0x545   : > { %v4066_v3 = vpop.f32.mrf.mxu0 }
 0x547   : > { %v4067_v5 = vpop.f32.mrf.mxu0 }
 0x548   : > { %v4068_v10 = vadd.f32 %v4067_v5, %v4066_v3 }
 0x549   : > { %v4069_v8 = vpop.f32.mrf.mxu0 }
 0x54a   : > { %v2345_v7 = vpack.c.bf16 %v4068_v10, %v4065_v6 }
 0x54b   : > { %v4070_v11 = vpop.f32.mrf.mxu0 }
 0x54c   : > { %4271 = vmatprep.mubr.bf16.mxu1 %v2345_v7  ;;  %v4071_v14 = vadd.f32 %v4070_v11, %v4069_v8 }
 0x54d   : > { %v4072_v12 = vpop.f32.mrf.mxu0 }
 0x54f   : > { %v4073_v15 = vpop.f32.mrf.mxu0 }
 0x550   : > { %v4074_v16 = vadd.f32 %v4073_v15, %v4072_v12 }
 0x551   : > { %v4075_v0 = vpop.f32.mrf.mxu0 }
 0x552   : > { %v2346_v9 = vpack.c.bf16 %v4074_v16, %v4071_v14 }
 0x553   : > { %v4076_v17 = vpop.f32.mrf.mxu0 }
 0x554   : > { %4272 = vmatmul.mubr.bf16.gmra.mxu1 %v2346_v9  ;;  %v4077_v4 = vadd.f32 %v4076_v17, %v4075_v0 }
 0x555   : > { %v4078_v18 = vpop.f32.mrf.mxu0 }
 0x557   : > { %v4079_v19 = vpop.f32.mrf.mxu0 }
 0x558   : > { %v4080_v20 = vadd.f32 %v4079_v19, %v4078_v18 }
 0x559   : > { %v4081_v21 = vpop.f32.mrf.mxu0 }
 0x55a   : > { %v2347_v22 = vpack.c.bf16 %v4080_v20, %v4077_v4 }
 0x55b   : > { %v4082_v23 = vpop.f32.mrf.mxu0 }
 0x55c   : > { %4275 = vmatprep.mubr.bf16.mxu1 %v2347_v22  ;;  %v4083_v13 = vadd.f32 %v4082_v23, %v4081_v21 }
 0x55d   : > { %v4084_v24 = vpop.f32.mrf.mxu0 }
 0x55f   : > { %v4085_v25 = vpop.f32.mrf.mxu0 }
 0x560   : > { %v4086_v27 = vadd.f32 %v4085_v25, %v4084_v24 }
 0x562   : > { %v2348_v28 = vpack.c.bf16 %v4086_v27, %v4083_v13 }
 0x564   : > { %4276 = vmatmul.mubr.bf16.gmra.mxu1 %v2348_v28 }
 0x5f4   : > { %v4265_v30 = vpop.f32.mrf.mxu1 }
 0x5f5   : > { %v2463_v31 = vadd.f32 %v4265_v30, %v3804_v29 }
 0x5f6   : > { %v2454_v33 = vpop.f32.mrf.mxu1 }
 0x5f7   : > { %v5753_v34 = vsub.f32 %v2463_v31, %v3804_v29  ;;  %v2455_v35 = vadd.f32 %v3804_v29, %v2454_v33 }
 0x5f8   : > { %v4266_v36 = vpop.f32.mrf.mxu1 }
 0x5f9   : > { %v2517_v37 = vsub.f32 %v2455_v35, %v3804_v29  ;;  %v2466_v32 = vadd.f32 %v4266_v36, %v3804_v29 }
 0x5fa   : > { %v2457_v39 = vpop.f32.mrf.mxu1 }
 0x5fb   : > { %v5755_v40 = vsub.f32 %v2466_v32, %v3804_v29  ;;  %v2458_v41 = vadd.f32 %v3804_v29, %v2457_v39 }
 0x5fd   : > { %v2518_v42 = vsub.f32 %v2458_v41, %v3804_v29 }
 0x604   : > { %v4269_v43 = vpop.f32.mrf.mxu1 }
 0x605   : > { %v2479_v26 = vadd.f32 %v4269_v43, %v3804_v29 }
 0x606   : > { %v2470_v45 = vpop.f32.mrf.mxu1 }
 0x607   : > { %v5757_v46 = vsub.f32 %v2479_v26, %v3804_v29  ;;  %v2471_v44 = vadd.f32 %v3804_v29, %v2470_v45 }
 0x608   : > { %v4270_v47 = vpop.f32.mrf.mxu1 }
 0x609   : > { %v2521_v48 = vsub.f32 %v2471_v44, %v3804_v29  ;;  %v2482_v49 = vadd.f32 %v4270_v47, %v3804_v29 }
 0x60a   : > { %v2473_v50 = vpop.f32.mrf.mxu1 }
 0x60b   : > { %v5759_v51 = vsub.f32 %v2482_v49, %v3804_v29  ;;  %v2474_v53 = vadd.f32 %v3804_v29, %v2473_v50 }
 0x60d   : > { %v2522_v54 = vsub.f32 %v2474_v53, %v3804_v29 }
 0x614   : > { %v4273_v55 = vpop.f32.mrf.mxu1 }
 0x615   : > { %v2495_v57 = vadd.f32 %v4273_v55, %v3804_v29 }
 0x616   : > { %v2486_v58 = vpop.f32.mrf.mxu1 }
 0x617   : > { %v5761_v38 = vsub.f32 %v2495_v57, %v3804_v29  ;;  %v2487_v59 = vadd.f32 %v3804_v29, %v2486_v58 }
 0x618   : > { %v4274_v60 = vpop.f32.mrf.mxu1 }
 0x619   : > { %v2525_v52 = vsub.f32 %v2487_v59, %v3804_v29  ;;  %v2498_v61 = vadd.f32 %v4274_v60, %v3804_v29 }
 0x61a   : > { %v2489_v62 = vpop.f32.mrf.mxu1 }
 0x61b   : > { %v5763_v56 = vsub.f32 %v2498_v61, %v3804_v29  ;;  %v2490_v1 = vadd.f32 %v3804_v29, %v2489_v62 }
 0x61d   : > { %v2526_v2 = vsub.f32 %v2490_v1, %v3804_v29 }
 0x624   : > { %v4277_v63 = vpop.f32.mrf.mxu1 }
 0x625   : > { %v2511_v3 = vadd.f32 %v4277_v63, %v3804_v29 }
 0x626   : > { %v2502_v5 = vpop.f32.mrf.mxu1 }
 0x627   : > { %v5765_v6 = vsub.f32 %v2511_v3, %v3804_v29  ;;  %v2503_v10 = vadd.f32 %v3804_v29, %v2502_v5 }
 0x628   : > { %v4278_v8 = vpop.f32.mrf.mxu1 }
 0x629   : > { %v2529_v7 = vsub.f32 %v2503_v10, %v3804_v29  ;;  %v2514_v11 = vadd.f32 %v4278_v8, %v3804_v29  ;;  %2536 = sbr.rel (%p3813_p9) target bundleno = 1584 (0x630), region = 156 }
 0x62a   : > { %v2505_v12 = vpop.f32.mrf.mxu1 }
 0x62b   : > { %v5767_v15 = vsub.f32 %v2514_v11, %v3804_v29  ;;  %v2506_v14 = vadd.f32 %v3804_v29, %v2505_v12 }
 0x62d   : > { %v2530_v16 = vsub.f32 %v2506_v14, %v3804_v29 }
 0x62e   : > { %v5007_v0 = vmov 0.0  }
 0x62f   : > { %2537 = vst [vmem:[#allocation4] sm:$0x1] %v5007_v0  ;;  %2538 = vst [vmem:[#allocation5] sm:$0x1] %v5007_v0 }
 0x630 PF: > { %v2540_v9 = vadd.f32 %v2518_v42, %v2517_v37  ;;  %v2564_v17 = vmul.f32 %v2517_v37, %v2517_v37  ;;  %v2565_v18 = vmul.f32 %v2518_v42, %v2518_v42  ;;  %s2603_s10 = scalar_lea.vmem [#allocation2], %s5358_s28  ;;  %v2566_v4 = vmul.f32 %v5753_v34, %v5753_v34 }
 0x631   : > { %2604 = vst [vmem:[%s2603_s10] sm:$0xff] %v2455_v35  ;;  %2605 = vst [vmem:[%s2603_s10 + $0x8] sm:$0xff] %v2458_v41  ;;  %v2567_v21 = vmul.f32 %v5755_v40, %v5755_v40  ;;  %v2568_v24 = vmul.f32 %v2521_v48, %v2521_v48  ;;  %v2569_v27 = vmul.f32 %v2522_v54, %v2522_v54 }
 0x632   : > { %2606 = vst [vmem:[%s2603_s10 + $0x10] sm:$0xff] %v2463_v31  ;;  %2607 = vst [vmem:[%s2603_s10 + $0x18] sm:$0xff] %v2466_v32  ;;  %v2541_v19 = vadd.f32 %v2540_v9, %v5753_v34  ;;  %v2580_v22 = vadd.f32 %v2565_v18, %v2564_v17  ;;  %v2570_v30 = vmul.f32 %v5757_v46, %v5757_v46 }
 0x633   : > { %2608 = vst [vmem:[%s2603_s10 + $0x20] sm:$0xff] %v2471_v44  ;;  %2609 = vst [vmem:[%s2603_s10 + $0x28] sm:$0xff] %v2474_v53  ;;  %v2571_v34 = vmul.f32 %v5759_v51, %v5759_v51  ;;  %v2572_v37 = vmul.f32 %v2525_v52, %v2525_v52  ;;  %v2574_v43 = vmul.f32 %v5761_v38, %v5761_v38 }
 0x634   : > { %2610 = vst [vmem:[%s2603_s10 + $0x30] sm:$0xff] %v2479_v26  ;;  %2611 = vst [vmem:[%s2603_s10 + $0x38] sm:$0xff] %v2482_v49  ;;  %v2542_v20 = vadd.f32 %v2541_v19, %v5755_v40  ;;  %v2581_v25 = vadd.f32 %v2580_v22, %v2566_v4  ;;  %v2573_v40 = vmul.f32 %v2526_v2, %v2526_v2 }
 0x635   : > { %2612 = vst [vmem:[%s2603_s10 + $0x40] sm:$0xff] %v2487_v59  ;;  %2613 = vst [vmem:[%s2603_s10 + $0x48] sm:$0xff] %v2490_v1  ;;  %v2578_v55 = vmul.f32 %v5765_v6, %v5765_v6 }
 0x636   : > { %2614 = vst [vmem:[%s2603_s10 + $0x50] sm:$0xff] %v2495_v57  ;;  %2615 = vst [vmem:[%s2603_s10 + $0x58] sm:$0xff] %v2498_v61  ;;  %v2543_v23 = vadd.f32 %v2542_v20, %v2521_v48  ;;  %v2582_v28 = vadd.f32 %v2581_v25, %v2567_v21  ;;  %v2576_v48 = vmul.f32 %v2529_v7, %v2529_v7  ;;  %v2563_v12 = vld [vmem:[#allocation5] sm:$0x1] }
 0x637   : > { %2616 = vst [vmem:[%s2603_s10 + $0x60] sm:$0xff] %v2503_v10  ;;  %2617 = vst [vmem:[%s2603_s10 + $0x68] sm:$0xff] %v2506_v14  ;;  %v2539_v10 = vld [vmem:[#allocation4] sm:$0x1] }
 0x638   : > { %2618 = vst [vmem:[%s2603_s10 + $0x70] sm:$0xff] %v2511_v3  ;;  %2619 = vst [vmem:[%s2603_s10 + $0x78] sm:$0xff] %v2514_v11  ;;  %v2544_v13 = vadd.f32 %v2543_v23, %v2522_v54  ;;  %v2583_v31 = vadd.f32 %v2582_v28, %v2568_v24 }
 0x63a   : > { %v2545_v29 = vadd.f32 %v2544_v13, %v5757_v46  ;;  %v2584_v35 = vadd.f32 %v2583_v31, %v2569_v27  ;;  %v2575_v46 = vmul.f32 %v5763_v56, %v5763_v56 }
 0x63c   : > { %v2546_v33 = vadd.f32 %v2545_v29, %v5759_v51  ;;  %v2585_v32 = vadd.f32 %v2584_v35, %v2570_v30  ;;  %v2577_v51 = vmul.f32 %v2530_v16, %v2530_v16 }
 0x63e   : > { %v2547_v36 = vadd.f32 %v2546_v33, %v2525_v52  ;;  %v2586_v41 = vadd.f32 %v2585_v32, %v2571_v34 }
 0x640   : > { %v2548_v39 = vadd.f32 %v2547_v36, %v2526_v2  ;;  %v2587_v26 = vadd.f32 %v2586_v41, %v2572_v37 }
 0x642   : > { %v2549_v42 = vadd.f32 %v2548_v39, %v5761_v38  ;;  %v2588_v44 = vadd.f32 %v2587_v26, %v2573_v40  ;;  %v2579_v38 = vmul.f32 %v5767_v15, %v5767_v15 }
 0x644   : > { %v2550_v45 = vadd.f32 %v2549_v42, %v5763_v56  ;;  %v2589_v49 = vadd.f32 %v2588_v44, %v2574_v43 }
 0x646   : > { %v2551_v47 = vadd.f32 %v2550_v45, %v2529_v7  ;;  %v2590_v53 = vadd.f32 %v2589_v49, %v2575_v46 }
 0x648   : > { %v2552_v50 = vadd.f32 %v2551_v47, %v2530_v16  ;;  %v2591_v57 = vadd.f32 %v2590_v53, %v2576_v48 }
 0x64a   : > { %v2553_v54 = vadd.f32 %v2552_v50, %v5765_v6  ;;  %v2592_v59 = vadd.f32 %v2591_v57, %v2577_v51 }
 0x64c   : > { %v2554_v58 = vadd.f32 %v2553_v54, %v5767_v15  ;;  %v2593_v52 = vadd.f32 %v2592_v59, %v2578_v55 }
 0x64e   : > { %v2555_v60 = vrot.slane %v2554_v58, 4  ;;  %v2594_v62 = vadd.f32 %v2593_v52, %v2579_v38 }
 0x650   : > { %v2556_v61 = vadd.f32 %v2555_v60, %v2554_v58  ;;  %v2595_v1 = vrot.slane %v2594_v62, 4 }
 0x652   : > { %v2557_v56 = vrot.slane %v2556_v61, 2  ;;  %v2596_v63 = vadd.f32 %v2595_v1, %v2594_v62 }
 0x654   : > { %v2558_v2 = vadd.f32 %v2557_v56, %v2556_v61  ;;  %v2597_v5 = vrot.slane %v2596_v63, 2 }
 0x656   : > { %v2559_v3 = vrot.slane %v2558_v2, 1  ;;  %v2598_v6 = vadd.f32 %v2597_v5, %v2596_v63 }
 0x658   : > { %v2560_v8 = vadd.f32 %v2559_v3, %v2558_v2  ;;  %v2599_v11 = vrot.slane %v2598_v6, 1 }
 0x65a   : > { %v2561_v7 = vadd.f32 %v2560_v8, %v2539_v10  ;;  %v2600_v14 = vadd.f32 %v2599_v11, %v2598_v6 }
 0x65c   : > { %2562 = vst [vmem:[#allocation4] sm:$0x1] %v2561_v7  ;;  %v2601_v15 = vadd.f32 %v2600_v14, %v2563_v12 }
 0x65e   : > { %2602 = vst [vmem:[#allocation5] sm:$0x1] %v2601_v15 }
 0x65f PF: > { %p3814_p10 = scmp.ne.s32.totalorder %s4980_s26, 4 }
 0x660   : > { %s6295_s29 = sld [smem:[#allocation40_spill]] (!%p3814_p10)  ;;  %s5800_s14 = scalar_lea.vmem (!%p3814_p10), [#allocation2], %s5358_s28 }
 0x661   : > { %2623 = sbr.rel (%p3814_p10) target bundleno = 1940 (0x794), region = 160  ;;  %s6296_s16 = sld [smem:[#allocation41_spill]] (!%p3814_p10) }
 0x662   : > { %s6297_s0 = sld [smem:[#allocation42_spill]] (!%p3814_p10)  ;;  %p3826_p11 = scmp.ne.s32.totalorder (!%p3814_p10), %s4976_s3, 0 }
 0x663   : > { %s6298_s11 = sld [smem:[#allocation44_spill]] (!%p3814_p10) }
 0x666   : > { %v4640_v16 = vld [vmem:[#allocation17 + $0x38] sm:$0xff]   ;;  %v4641_v0 = vld [vmem:[#allocation17 + $0x30] sm:$0xff]   ;;  %v4642_v9 = vld [vmem:[#allocation17 + $0x28] sm:$0xff]   ;;  %v2653_v24 = vlaneseq }
 0x667   : > { %4279 = vmatprep.subr.bf16.mxu0 %v4640_v16  ;;  %4327 = vmatprep.subr.bf16.mxu1 %v4640_v16  ;;  %v4643_v17 = vld [vmem:[#allocation17 + $0x20] sm:$0xff]   ;;  %v2644_v18 = vld [vmem:[#allocation4] sm:$0x1]  ;;  %v2645_v19 = vld [vmem:[#allocation5] sm:$0x1] }
 0x668   : > { %4280 = vmatpush3.bf16.msra.mxu0 %v4640_v16  ;;  %4335 = vmatpush3.bf16.msra.mxu1 %v4640_v16  ;;  %v2646_v4 = vmul.f32 0.00390625, %v2644_v18  ;;  %v2647_v20 = vmul.f32 0.00390625, %v2645_v19  ;;  %v4644_v21 = vld [vmem:[#allocation17 + $0x18] sm:$0xff]   ;;  %v4645_v25 = vld [vmem:[#allocation17 + $0x10] sm:$0xff]   ;;  %v2654_v28 = vshrl.u32 %v2653_v24, 7  ;;  %v4646_v29 = vld [vmem:[#allocation17 + $0x8] sm:$0xff]  }
 0x669   : > { %4281 = vmatprep.subr.bf16.mxu0 %v4641_v0  ;;  %4328 = vmatprep.subr.bf16.mxu1 %v4641_v0  ;;  %v2641_v30 = vld [vmem:[%s6295_s29] sm:$0x1]  ;;  %v4647_v34 = vld [vmem:[#allocation17] sm:$0xff]   ;;  %v2627_v40 = vld [vmem:[%s5800_s14 + $0x10] sm:$0xff] }
 0x66a   : > { %v2648_v22 = vmul.f32 %v2646_v4, %v2646_v4  ;;  %v2651_v31 = vadd.f32 %v2646_v4, %v2641_v30  ;;  %v2655_v33 = vsub.s32 0, %v2654_v28  ;;  %v2625_v35 = vld [vmem:[%s5800_s14] sm:$0xff]  ;;  %v2626_v37 = vld [vmem:[%s5800_s14 + $0x8] sm:$0xff]  ;;  %v2628_v41 = vld [vmem:[%s5800_s14 + $0x18] sm:$0xff] }
 0x66b   : > { %v2633_v32 = vld [vmem:[%s5800_s14 + $0x40] sm:$0xff]  ;;  %v2634_v39 = vld [vmem:[%s5800_s14 + $0x48] sm:$0xff]  ;;  %v2635_v42 = vld [vmem:[%s5800_s14 + $0x50] sm:$0xff] }
 0x66c   : > { %4282 = vmatpush3.bf16.msra.mxu0 %v4641_v0  ;;  %4336 = vmatpush3.bf16.msra.mxu1 %v4641_v0  ;;  %v2649_v23 = vsub.f32 %v2647_v20, %v2648_v22  ;;  %v5803_v36 = vrot.slane %v2651_v31, %v2655_v33  ;;  %v2636_v43 = vld [vmem:[%s5800_s14 + $0x58] sm:$0xff]  ;;  %v5813_v26 = vld [vmem:[%s5800_s14 + $0x20] sm:$0xff]  ;;  %v5816_v45 = vld [vmem:[%s5800_s14 + $0x28] sm:$0xff] }
 0x66d   : > { %4283 = vmatprep.subr.bf16.mxu0 %v4642_v9  ;;  %4329 = vmatprep.subr.bf16.mxu1 %v4642_v9  ;;  %v5820_v44 = vld [vmem:[%s5800_s14 + $0x60] sm:$0xff]  ;;  %v5823_v47 = vld [vmem:[%s5800_s14 + $0x68] sm:$0xff]  ;;  %v5826_v48 = vld [vmem:[%s5800_s14 + $0x30] sm:$0xff] }
 0x66e   : > { %v2650_v13 = vmax.f32 %v2649_v23, 0.0  ;;  %v2658_v46 = vsub.f32 %v2625_v35, %v5803_v36  ;;  %v2659_v49 = vsub.f32 %v2626_v37, %v5803_v36  ;;  %v2666_v50 = vsub.f32 %v2633_v32, %v5803_v36  ;;  %v5833_v54 = vld [vmem:[%s5800_s14 + $0x38] sm:$0xff]  ;;  %v5836_v55 = vld [vmem:[%s5800_s14 + $0x70] sm:$0xff]  ;;  %v5857_v2 = vld [vmem:[%s6296_s16] ss:$0 sm:$0xff] }
 0x66f   : > { %v2667_v51 = vsub.f32 %v2634_v39, %v5803_v36  ;;  %v2660_v53 = vsub.f32 %v2627_v40, %v5803_v36  ;;  %v5839_v57 = vld [vmem:[%s5800_s14 + $0x78] sm:$0xff]  ;;  %v2661_v38 = vsub.f32 %v2628_v41, %v5803_v36  ;;  %v2668_v59 = vsub.f32 %v2635_v42, %v5803_v36  ;;  %v5874_v12 = vld [vmem:[%s6297_s0] ss:$0 sm:$0xff] }
 0x670   : > { %4284 = vmatpush3.bf16.msra.mxu0 %v4642_v9  ;;  %4337 = vmatpush3.bf16.msra.mxu1 %v4642_v9  ;;  %v2674_v27 = vadd.f32 1e-05, %v2650_v13  ;;  %v2669_v60 = vsub.f32 %v2636_v43, %v5803_v36  ;;  %v2662_v52 = vsub.f32 %v5813_v26, %v5803_v36  ;;  %v2663_v62 = vsub.f32 %v5816_v45, %v5803_v36 }
 0x671   : > { %4285 = vmatprep.subr.bf16.mxu0 %v4643_v17  ;;  %4330 = vmatprep.subr.bf16.mxu1 %v4643_v17  ;;  %v2670_v56 = vsub.f32 %v5820_v44, %v5803_v36  ;;  %v2671_v1 = vsub.f32 %v5823_v47, %v5803_v36  ;;  %v2664_v63 = vsub.f32 %v5826_v48, %v5803_v36 }
 0x672   : > { %4648 = vrsqrt.f32 %v2674_v27  ;;  %v2665_v3 = vsub.f32 %v5833_v54, %v5803_v36  ;;  %v2672_v5 = vsub.f32 %v5836_v55, %v5803_v36  ;;  %v2673_v10 = vsub.f32 %v5839_v57, %v5803_v36 }
 0x674   : > { %4286 = vmatpush3.bf16.msra.mxu0 %v4643_v17  ;;  %4338 = vmatpush3.bf16.msra.mxu1 %v4643_v17 }
 0x675   : > { %4287 = vmatprep.subr.bf16.mxu0 %v4644_v21  ;;  %4331 = vmatprep.subr.bf16.mxu1 %v4644_v21 }
 0x678   : > { %4288 = vmatpush3.bf16.msra.mxu0 %v4644_v21  ;;  %4339 = vmatpush3.bf16.msra.mxu1 %v4644_v21 }
 0x679   : > { %4289 = vmatprep.subr.bf16.mxu0 %v4645_v25  ;;  %4332 = vmatprep.subr.bf16.mxu1 %v4645_v25 }
 0x67c   : > { %4290 = vmatpush3.bf16.msra.mxu0 %v4645_v25  ;;  %4340 = vmatpush3.bf16.msra.mxu1 %v4645_v25 }
 0x67d   : > { %4291 = vmatprep.subr.bf16.mxu0 %v4646_v29  ;;  %4333 = vmatprep.subr.bf16.mxu1 %v4646_v29 }
 0x67f   : > { %v4649_v58 = vpop.eup %4648 }
 0x680   : > { %4292 = vmatpush3.bf16.msra.mxu0 %v4646_v29  ;;  %4341 = vmatpush3.bf16.msra.mxu1 %v4646_v29  ;;  %v5846_v61 = vrot.slane %v4649_v58, %v2655_v33 }
 0x681   : > { %4293 = vmatprep.subr.bf16.mxu0 %v4647_v34  ;;  %4334 = vmatprep.subr.bf16.mxu1 %v4647_v34 }
 0x682   : > { %v2682_v8 = vmul.f32 %v5846_v61, %v2658_v46  ;;  %v2683_v6 = vmul.f32 %v5846_v61, %v2659_v49  ;;  %v2690_v7 = vmul.f32 %v5846_v61, %v2666_v50  ;;  %v2691_v11 = vmul.f32 %v5846_v61, %v2667_v51 }
 0x683   : > { %v2684_v14 = vmul.f32 %v5846_v61, %v2660_v53  ;;  %v2685_v15 = vmul.f32 %v5846_v61, %v2661_v38  ;;  %v2692_v16 = vmul.f32 %v5846_v61, %v2668_v59  ;;  %v2693_v0 = vmul.f32 %v5846_v61, %v2669_v60 }
 0x684   : > { %4294 = vmatpush3.bf16.msra.mxu0 %v4647_v34  ;;  %4342 = vmatpush3.bf16.msra.mxu1 %v4647_v34  ;;  %v2704_v9 = vmul.f32 %v5857_v2, %v2682_v8  ;;  %v2705_v17 = vmul.f32 %v5857_v2, %v2683_v6  ;;  %v2712_v18 = vmul.f32 %v5857_v2, %v2690_v7 }
 0x685   : > { %v2713_v19 = vmul.f32 %v5857_v2, %v2691_v11  ;;  %v2706_v4 = vmul.f32 %v5857_v2, %v2684_v14  ;;  %v2707_v20 = vmul.f32 %v5857_v2, %v2685_v15  ;;  %v2714_v21 = vmul.f32 %v5857_v2, %v2692_v16 }
 0x686   : > { %v2715_v22 = vmul.f32 %v5857_v2, %v2693_v0  ;;  %v2726_v23 = vadd.f32 %v5874_v12, %v2704_v9  ;;  %v2727_v24 = vadd.f32 %v5874_v12, %v2705_v17  ;;  %v2734_v25 = vadd.f32 %v5874_v12, %v2712_v18 }
 0x687   : > { %v2735_v13 = vadd.f32 %v5874_v12, %v2713_v19  ;;  %v2728_v27 = vadd.f32 %v5874_v12, %v2706_v4  ;;  %v2729_v28 = vadd.f32 %v5874_v12, %v2707_v20  ;;  %v2736_v29 = vadd.f32 %v5874_v12, %v2714_v21 }
 0x688   : > { %v2737_v30 = vadd.f32 %v5874_v12, %v2715_v22  ;;  %v2742_v31 = vmax.f32 %v2726_v23, 0.0  ;;  %v2743_v33 = vmax.f32 %v2727_v24, 0.0  ;;  %v2750_v34 = vmax.f32 %v2734_v25, 0.0 }
 0x689   : > { %v2751_v35 = vmax.f32 %v2735_v13, 0.0  ;;  %v2744_v36 = vmax.f32 %v2728_v27, 0.0  ;;  %v2745_v37 = vmax.f32 %v2729_v28, 0.0  ;;  %v2752_v32 = vmax.f32 %v2736_v29, 0.0 }
 0x68a   : > { %v2753_v39 = vmax.f32 %v2737_v30, 0.0  ;;  %v2758_v40 = vpack.c.bf16 %v2743_v33, %v2742_v31  ;;  %v2686_v42 = vmul.f32 %v5846_v61, %v2662_v52  ;;  %v2687_v43 = vmul.f32 %v5846_v61, %v2663_v62 }
 0x68b   : > { %v2762_v41 = vpack.c.bf16 %v2751_v35, %v2750_v34  ;;  %v2759_v26 = vpack.c.bf16 %v2745_v37, %v2744_v36  ;;  %v2694_v46 = vmul.f32 %v5846_v61, %v2670_v56  ;;  %v2695_v44 = vmul.f32 %v5846_v61, %v2671_v1 }
 0x68c   : > { %v2763_v45 = vpack.c.bf16 %v2753_v39, %v2752_v32  ;;  %4295 = vmatprep.mubr.bf16.mxu0 %v2758_v40  ;;  %v2708_v47 = vmul.f32 %v5857_v2, %v2686_v42  ;;  %v2709_v48 = vmul.f32 %v5857_v2, %v2687_v43  ;;  %v2688_v49 = vmul.f32 %v5846_v61, %v2664_v63 }
 0x68d   : > { %4303 = vmatprep.mubr.bf16.mxu1 %v2762_v41  ;;  %4296 = vmatmul.mubr.bf16.vlgmr.msra.gmra.mxu0 %v2759_v26  ;;  %v2716_v50 = vmul.f32 %v5857_v2, %v2694_v46  ;;  %v2717_v51 = vmul.f32 %v5857_v2, %v2695_v44  ;;  %v2689_v53 = vmul.f32 %v5846_v61, %v2665_v3 }
 0x68e   : > { %4304 = vmatmul.mubr.bf16.vlgmr.msra.gmra.mxu1 %v2763_v45  ;;  %v2730_v54 = vadd.f32 %v5874_v12, %v2708_v47  ;;  %v2731_v55 = vadd.f32 %v5874_v12, %v2709_v48  ;;  %v2710_v57 = vmul.f32 %v5857_v2, %v2688_v49  ;;  %v2696_v58 = vmul.f32 %v5846_v61, %v2672_v5 }
 0x68f   : > { %v2738_v38 = vadd.f32 %v5874_v12, %v2716_v50  ;;  %v2739_v59 = vadd.f32 %v5874_v12, %v2717_v51  ;;  %v2711_v60 = vmul.f32 %v5857_v2, %v2689_v53  ;;  %v2697_v52 = vmul.f32 %v5846_v61, %v2673_v10 }
 0x690   : > { %v2746_v62 = vmax.f32 %v2730_v54, 0.0  ;;  %v2747_v56 = vmax.f32 %v2731_v55, 0.0  ;;  %v2732_v1 = vadd.f32 %v5874_v12, %v2710_v57  ;;  %v2718_v63 = vmul.f32 %v5857_v2, %v2696_v58 }
 0x691   : > { %v2754_v3 = vmax.f32 %v2738_v38, 0.0  ;;  %v2755_v8 = vmax.f32 %v2739_v59, 0.0  ;;  %v2733_v6 = vadd.f32 %v5874_v12, %v2711_v60  ;;  %v2719_v5 = vmul.f32 %v5857_v2, %v2697_v52  ;;  %v3817_v2 = vld [vmem:[%s6298_s11] ss:$0 sm:$0xff] }
 0x692   : > { %v2760_v7 = vpack.c.bf16 %v2747_v56, %v2746_v62  ;;  %v2748_v11 = vmax.f32 %v2732_v1, 0.0  ;;  %v2740_v14 = vadd.f32 %v5874_v12, %v2718_v63 }
 0x693   : > { %v2764_v15 = vpack.c.bf16 %v2755_v8, %v2754_v3  ;;  %v2749_v16 = vmax.f32 %v2733_v6, 0.0  ;;  %v2741_v61 = vadd.f32 %v5874_v12, %v2719_v5 }
 0x694   : > { %4299 = vmatprep.mubr.bf16.mxu0 %v2760_v7  ;;  %v2756_v10 = vmax.f32 %v2740_v14, 0.0 }
 0x695   : > { %4307 = vmatprep.mubr.bf16.mxu1 %v2764_v15  ;;  %v2761_v0 = vpack.c.bf16 %v2749_v16, %v2748_v11  ;;  %v2757_v9 = vmax.f32 %v2741_v61, 0.0 }
 0x697   : > { %4300 = vmatmul.mubr.bf16.gmra.mxu0 %v2761_v0  ;;  %v2765_v17 = vpack.c.bf16 %v2757_v9, %v2756_v10 }
 0x699   : > { %4308 = vmatmul.mubr.bf16.gmra.mxu1 %v2765_v17 }
 0x74d   : > { %v4297_v18 = vpop.f32.mrf.mxu0 }
 0x74e   : > { %v4305_v19 = vpop.f32.mrf.mxu1  ;;  %v2880_v4 = vadd.f32 %v4297_v18, %v3817_v2 }
 0x74f   : > { %v5923_v20 = vadd.f32 %v4305_v19, %v3817_v2  ;;  %v2871_v21 = vpop.f32.mrf.mxu0 }
 0x750   : > { %v2903_v22 = vpop.f32.mrf.mxu1  ;;  %v5925_v12 = vsub.f32 %v2880_v4, %v3817_v2  ;;  %v2872_v24 = vadd.f32 %v3817_v2, %v2871_v21 }
 0x751   : > { %v5928_v23 = vsub.f32 %v5923_v20, %v3817_v2  ;;  %v2904_v25 = vadd.f32 %v3817_v2, %v2903_v22  ;;  %v4298_v13 = vpop.f32.mrf.mxu0 }
 0x752   : > { %v4306_v27 = vpop.f32.mrf.mxu1  ;;  %v2934_v28 = vsub.f32 %v2872_v24, %v3817_v2  ;;  %v2883_v30 = vadd.f32 %v4298_v13, %v3817_v2 }
 0x753   : > { %v5930_v29 = vsub.f32 %v2904_v25, %v3817_v2  ;;  %v2915_v31 = vadd.f32 %v4306_v27, %v3817_v2  ;;  %v2874_v33 = vpop.f32.mrf.mxu0 }
 0x754   : > { %v2906_v34 = vpop.f32.mrf.mxu1  ;;  %v2937_v35 = vsub.f32 %v2883_v30, %v3817_v2  ;;  %v2875_v37 = vadd.f32 %v3817_v2, %v2874_v33 }
 0x755   : > { %v5932_v36 = vsub.f32 %v2915_v31, %v3817_v2  ;;  %v2907_v32 = vadd.f32 %v3817_v2, %v2906_v34 }
 0x756   : > { %v2935_v39 = vsub.f32 %v2875_v37, %v3817_v2 }
 0x757   : > { %v5934_v40 = vsub.f32 %v2907_v32, %v3817_v2  ;;  %v4301_v41 = vpop.f32.mrf.mxu0 }
 0x758   : > { %v2896_v42 = vadd.f32 %v4301_v41, %v3817_v2 }
 0x759   : > { %v4309_v43 = vpop.f32.mrf.mxu1  ;;  %v2887_v26 = vpop.f32.mrf.mxu0 }
 0x75a   : > { %v2940_v45 = vsub.f32 %v2896_v42, %v3817_v2  ;;  %v2928_v46 = vadd.f32 %v4309_v43, %v3817_v2  ;;  %v2888_v44 = vadd.f32 %v3817_v2, %v2887_v26 }
 0x75b   : > { %v2919_v47 = vpop.f32.mrf.mxu1  ;;  %v4302_v48 = vpop.f32.mrf.mxu0 }
 0x75c   : > { %v5936_v49 = vsub.f32 %v2928_v46, %v3817_v2  ;;  %v2938_v50 = vsub.f32 %v2888_v44, %v3817_v2  ;;  %v2920_v51 = vadd.f32 %v3817_v2, %v2919_v47  ;;  %v2899_v53 = vadd.f32 %v4302_v48, %v3817_v2 }
 0x75d   : > { %v4310_v54 = vpop.f32.mrf.mxu1  ;;  %v2890_v55 = vpop.f32.mrf.mxu0 }
 0x75e   : > { %v5938_v57 = vsub.f32 %v2920_v51, %v3817_v2  ;;  %v2941_v58 = vsub.f32 %v2899_v53, %v3817_v2  ;;  %v2931_v38 = vadd.f32 %v4310_v54, %v3817_v2  ;;  %v2891_v59 = vadd.f32 %v3817_v2, %v2890_v55  ;;  %2953 = sbr.rel (%p3826_p11) target bundleno = 1893 (0x765), region = 164 }
 0x75f   : > { %v2922_v60 = vpop.f32.mrf.mxu1 }
 0x760   : > { %v5940_v52 = vsub.f32 %v2931_v38, %v3817_v2  ;;  %v2939_v62 = vsub.f32 %v2891_v59, %v3817_v2  ;;  %v2923_v56 = vadd.f32 %v3817_v2, %v2922_v60 }
 0x762   : > { %v2947_v1 = vsub.f32 %v2923_v56, %v3817_v2 }
 0x763   : > { %v5008_v63 = vmov 0.0  }
 0x764   : > { %2954 = vst [vmem:[#allocation6] sm:$0x1] %v5008_v63  ;;  %2955 = vst [vmem:[#allocation7] sm:$0x1] %v5008_v63 }
 0x765 PF: > { %v2957_v3 = vadd.f32 %v2935_v39, %v2934_v28  ;;  %v2981_v8 = vmul.f32 %v2934_v28, %v2934_v28  ;;  %v2982_v6 = vmul.f32 %v2935_v39, %v2935_v39  ;;  %3020 = vst [vmem:[%s5800_s14] sm:$0xff] %v2872_v24  ;;  %3021 = vst [vmem:[%s5800_s14 + $0x8] sm:$0xff] %v2875_v37 }
 0x766   : > { %3022 = vst [vmem:[%s5800_s14 + $0x10] sm:$0xff] %v2880_v4  ;;  %3023 = vst [vmem:[%s5800_s14 + $0x18] sm:$0xff] %v2883_v30  ;;  %v2983_v7 = vmul.f32 %v5925_v12, %v5925_v12  ;;  %v2984_v14 = vmul.f32 %v2937_v35, %v2937_v35  ;;  %v2985_v61 = vmul.f32 %v2938_v50, %v2938_v50 }
 0x767   : > { %3024 = vst [vmem:[%s5800_s14 + $0x20] sm:$0xff] %v2888_v44  ;;  %3025 = vst [vmem:[%s5800_s14 + $0x28] sm:$0xff] %v2891_v59  ;;  %v2958_v5 = vadd.f32 %v2957_v3, %v5925_v12  ;;  %v2997_v15 = vadd.f32 %v2982_v6, %v2981_v8  ;;  %v2986_v9 = vmul.f32 %v2939_v62, %v2939_v62 }
 0x768   : > { %3026 = vst [vmem:[%s5800_s14 + $0x30] sm:$0xff] %v2896_v42  ;;  %3027 = vst [vmem:[%s5800_s14 + $0x38] sm:$0xff] %v2899_v53  ;;  %v2987_v18 = vmul.f32 %v2940_v45, %v2940_v45  ;;  %v2989_v12 = vmul.f32 %v5930_v29, %v5930_v29  ;;  %v2990_v13 = vmul.f32 %v5934_v40, %v5934_v40 }
 0x769   : > { %3028 = vst [vmem:[%s5800_s14 + $0x40] sm:$0xff] %v2904_v25  ;;  %3029 = vst [vmem:[%s5800_s14 + $0x48] sm:$0xff] %v2907_v32  ;;  %v2959_v11 = vadd.f32 %v2958_v5, %v2937_v35  ;;  %v2998_v10 = vadd.f32 %v2997_v15, %v2983_v7  ;;  %v2991_v30 = vmul.f32 %v5928_v23, %v5928_v23 }
 0x76a   : > { %3030 = vst [vmem:[%s5800_s14 + $0x50] sm:$0xff] %v5923_v20  ;;  %3031 = vst [vmem:[%s5800_s14 + $0x58] sm:$0xff] %v2915_v31  ;;  %v2988_v20 = vmul.f32 %v2941_v58, %v2941_v58  ;;  %v2992_v34 = vmul.f32 %v5932_v36, %v5932_v36  ;;  %v2993_v37 = vmul.f32 %v5938_v57, %v5938_v57 }
 0x76b   : > { %3032 = vst [vmem:[%s5800_s14 + $0x60] sm:$0xff] %v2920_v51  ;;  %3033 = vst [vmem:[%s5800_s14 + $0x68] sm:$0xff] %v2923_v56  ;;  %v2960_v16 = vadd.f32 %v2959_v11, %v2938_v50  ;;  %v2999_v17 = vadd.f32 %v2998_v10, %v2984_v14 }
 0x76c   : > { %3034 = vst [vmem:[%s5800_s14 + $0x70] sm:$0xff] %v2928_v46  ;;  %3035 = vst [vmem:[%s5800_s14 + $0x78] sm:$0xff] %v2931_v38 }
 0x76d   : > { %v2961_v0 = vadd.f32 %v2960_v16, %v2939_v62  ;;  %v3000_v19 = vadd.f32 %v2999_v17, %v2985_v61  ;;  %v2980_v62 = vld [vmem:[#allocation7] sm:$0x1] }
 0x76f   : > { %v2962_v2 = vadd.f32 %v2961_v0, %v2940_v45  ;;  %v3001_v21 = vadd.f32 %v3000_v19, %v2986_v9 }
 0x771   : > { %v2963_v4 = vadd.f32 %v2962_v2, %v2941_v58  ;;  %v3002_v24 = vadd.f32 %v3001_v21, %v2987_v18  ;;  %v2956_v58 = vld [vmem:[#allocation6] sm:$0x1] }
 0x773   : > { %v2964_v22 = vadd.f32 %v2963_v4, %v5930_v29  ;;  %v3003_v27 = vadd.f32 %v3002_v24, %v2988_v20 }
 0x775   : > { %v2965_v25 = vadd.f32 %v2964_v22, %v5934_v40  ;;  %v3004_v31 = vadd.f32 %v3003_v27, %v2989_v12  ;;  %v2994_v40 = vmul.f32 %v2947_v1, %v2947_v1 }
 0x777   : > { %v2966_v28 = vadd.f32 %v2965_v25, %v5928_v23  ;;  %v3005_v35 = vadd.f32 %v3004_v31, %v2990_v13  ;;  %v2995_v23 = vmul.f32 %v5936_v49, %v5936_v49 }
 0x779   : > { %v2967_v33 = vadd.f32 %v2966_v28, %v5932_v36  ;;  %v3006_v32 = vadd.f32 %v3005_v35, %v2991_v30  ;;  %v2996_v36 = vmul.f32 %v5940_v52, %v5940_v52 }
 0x77b   : > { %v2968_v29 = vadd.f32 %v2967_v33, %v5938_v57  ;;  %v3007_v41 = vadd.f32 %v3006_v32, %v2992_v34 }
 0x77d   : > { %v2969_v39 = vadd.f32 %v2968_v29, %v2947_v1  ;;  %v3008_v43 = vadd.f32 %v3007_v41, %v2993_v37 }
 0x77f   : > { %v2970_v42 = vadd.f32 %v2969_v39, %v5936_v49  ;;  %v3009_v45 = vadd.f32 %v3008_v43, %v2994_v40 }
 0x781   : > { %v2971_v26 = vadd.f32 %v2970_v42, %v5940_v52  ;;  %v3010_v44 = vadd.f32 %v3009_v45, %v2995_v23 }
 0x783   : > { %v2972_v46 = vrot.slane %v2971_v26, 4  ;;  %v3011_v48 = vadd.f32 %v3010_v44, %v2996_v36 }
 0x785   : > { %v2973_v47 = vadd.f32 %v2972_v46, %v2971_v26  ;;  %v3012_v51 = vrot.slane %v3011_v48, 4 }
 0x787   : > { %v2974_v50 = vrot.slane %v2973_v47, 2  ;;  %v3013_v54 = vadd.f32 %v3012_v51, %v3011_v48 }
 0x789   : > { %v2975_v53 = vadd.f32 %v2974_v50, %v2973_v47  ;;  %v3014_v57 = vrot.slane %v3013_v54, 2 }
 0x78b   : > { %v2976_v55 = vrot.slane %v2975_v53, 1  ;;  %v3015_v49 = vadd.f32 %v3014_v57, %v3013_v54 }
 0x78d   : > { %v2977_v38 = vadd.f32 %v2976_v55, %v2975_v53  ;;  %v3016_v60 = vrot.slane %v3015_v49, 1 }
 0x78f   : > { %v2978_v59 = vadd.f32 %v2977_v38, %v2956_v58  ;;  %v3017_v56 = vadd.f32 %v3016_v60, %v3015_v49 }
 0x791   : > { %2979 = vst [vmem:[#allocation6] sm:$0x1] %v2978_v59  ;;  %v3018_v52 = vadd.f32 %v3017_v56, %v2980_v62 }
 0x793   : > { %3019 = vst [vmem:[#allocation7] sm:$0x1] %v3018_v52 }
 0x794 PF: > { %p3827_p12 = scmp.ne.s32.totalorder %s4980_s26, 5 }
 0x795   : > { %s3174_s9 = sshra.s32 (!%p3827_p12), %s5358_s28, 3  ;;  %s6299_s14 = sld [smem:[#allocation44_spill]] (!%p3827_p12) }
 0x796   : > { %3039 = sbr.rel (%p3827_p12) target bundleno = 2217 (0x8a9), region = 168  ;;  %s3830_s10 = sshll.u32 (!%p3827_p12), %s3174_s9, 2 }
 0x797   : > { %s5986_s13 = scalar_lea.vmem (!%p3827_p12), [#allocation3], %s3830_s10  ;;  %s3040_s18 = scalar_lea.vmem (!%p3827_p12), [#allocation2], %s5358_s28 }
 0x798   : > { %s6300_s16 = sld [smem:[#allocation45_spill]] (!%p3827_p12) }
 0x799   : > { %s6301_s0 = sld [smem:[#allocation46_spill]] (!%p3827_p12) }
 0x79a   : > { %s6302_s11 = sld [smem:[#allocation48_spill]] (!%p3827_p12) }
 0x79b   : > { %v4650_v1 = vld [vmem:[#allocation19 + $0x78] sm:$0xff]   ;;  %v4652_v3 = vld [vmem:[#allocation19 + $0x70] sm:$0xff]   ;;  %v4654_v6 = vld [vmem:[#allocation19 + $0x68] sm:$0xff]   ;;  %v3069_v20 = vlaneseq }
 0x79c   : > { %v4651_v63 = vld [vmem:[#allocation19 + $0x38] sm:$0xff]   ;;  %4119 = vmatprep.subr.bf16.mxu0 %v4650_v1  ;;  %4343 = vmatprep.subr.bf16.mxu1 %v4650_v1  ;;  %v4653_v8 = vld [vmem:[#allocation19 + $0x30] sm:$0xff]   ;;  %v4655_v5 = vld [vmem:[#allocation19 + $0x28] sm:$0xff]  }
 0x79d   : > { %4120 = vmatpush3.bf16.msra.mxu0 %v4651_v63  ;;  %4351 = vmatpush3.bf16.msra.mxu1 %v4651_v63  ;;  %v4656_v7 = vld [vmem:[#allocation19 + $0x60] sm:$0xff]   ;;  %v4658_v14 = vld [vmem:[#allocation19 + $0x58] sm:$0xff]   ;;  %v4660_v16 = vld [vmem:[#allocation19 + $0x50] sm:$0xff]   ;;  %v3070_v25 = vshrl.u32 %v3069_v20, 7 }
 0x79e   : > { %4121 = vmatprep.subr.bf16.mxu0 %v4652_v3  ;;  %4344 = vmatprep.subr.bf16.mxu1 %v4652_v3  ;;  %v4657_v11 = vld [vmem:[#allocation19 + $0x20] sm:$0xff]   ;;  %v4659_v15 = vld [vmem:[#allocation19 + $0x18] sm:$0xff]   ;;  %v4661_v9 = vld [vmem:[#allocation19 + $0x10] sm:$0xff]  }
 0x79f   : > { %v3060_v61 = vld [vmem:[#allocation6] sm:$0x1]  ;;  %v3061_v10 = vld [vmem:[#allocation7] sm:$0x1]  ;;  %v4662_v2 = vld [vmem:[#allocation19 + $0x48] sm:$0xff]   ;;  %v3071_v28 = vsub.s32 0, %v3070_v25 }
 0x7a0   : > { %v3062_v0 = vmul.f32 0.00390625, %v3060_v61  ;;  %v3063_v17 = vmul.f32 0.00390625, %v3061_v10  ;;  %v4663_v4 = vld [vmem:[#allocation19 + $0x8] sm:$0xff]   ;;  %v4664_v21 = vld [vmem:[#allocation19 + $0x40] sm:$0xff]   ;;  %v3057_v13 = vld [vmem:[%s6299_s14] sm:$0x1] }
 0x7a1   : > { %4122 = vmatpush3.bf16.msra.mxu0 %v4653_v8  ;;  %4352 = vmatpush3.bf16.msra.mxu1 %v4653_v8  ;;  %v4665_v24 = vld [vmem:[#allocation19] sm:$0xff]   ;;  %v3043_v29 = vld [vmem:[%s3040_s18 + $0x10] sm:$0xff]  ;;  %v3044_v37 = vld [vmem:[%s3040_s18 + $0x18] sm:$0xff] }
 0x7a2   : > { %4123 = vmatprep.subr.bf16.mxu0 %v4654_v6  ;;  %4345 = vmatprep.subr.bf16.mxu1 %v4654_v6  ;;  %v3064_v18 = vmul.f32 %v3062_v0, %v3062_v0  ;;  %v3067_v27 = vadd.f32 %v3062_v0, %v3057_v13  ;;  %v3041_v30 = vld [vmem:[%s3040_s18] sm:$0xff]  ;;  %v3042_v33 = vld [vmem:[%s3040_s18 + $0x8] sm:$0xff]  ;;  %v3051_v32 = vld [vmem:[%s3040_s18 + $0x50] sm:$0xff] }
 0x7a3   : > { %v3049_v34 = vld [vmem:[%s3040_s18 + $0x40] sm:$0xff]  ;;  %v3050_v35 = vld [vmem:[%s3040_s18 + $0x48] sm:$0xff]  ;;  %v3052_v39 = vld [vmem:[%s3040_s18 + $0x58] sm:$0xff] }
 0x7a4   : > { %v3065_v19 = vsub.f32 %v3063_v17, %v3064_v18  ;;  %v5992_v31 = vrot.slane %v3067_v27, %v3071_v28  ;;  %v5994_v40 = vld [vmem:[%s3040_s18 + $0x20] sm:$0xff]  ;;  %v5996_v41 = vld [vmem:[%s3040_s18 + $0x28] sm:$0xff]  ;;  %v6003_v26 = vld [vmem:[%s3040_s18 + $0x30] sm:$0xff] }
 0x7a5   : > { %4124 = vmatpush3.bf16.msra.mxu0 %v4655_v5  ;;  %4353 = vmatpush3.bf16.msra.mxu1 %v4655_v5  ;;  %v5999_v23 = vld [vmem:[%s3040_s18 + $0x60] sm:$0xff]  ;;  %v6001_v43 = vld [vmem:[%s3040_s18 + $0x68] sm:$0xff]  ;;  %v6009_v47 = vld [vmem:[%s3040_s18 + $0x38] sm:$0xff] }
 0x7a6   : > { %4125 = vmatprep.subr.bf16.mxu0 %v4656_v7  ;;  %4346 = vmatprep.subr.bf16.mxu1 %v4656_v7  ;;  %v3066_v22 = vmax.f32 %v3065_v19, 0.0  ;;  %v3074_v42 = vsub.f32 %v3041_v30, %v5992_v31  ;;  %v3075_v36 = vsub.f32 %v3042_v33, %v5992_v31  ;;  %v3082_v45 = vsub.f32 %v3049_v34, %v5992_v31  ;;  %v6011_v48 = vld [vmem:[%s3040_s18 + $0x70] sm:$0xff]  ;;  %v6013_v50 = vld [vmem:[%s3040_s18 + $0x78] sm:$0xff]  ;;  %v6031_v60 = vld [vmem:[%s6300_s16] ss:$0 sm:$0xff] }
 0x7a7   : > { %v3083_v46 = vsub.f32 %v3050_v35, %v5992_v31  ;;  %v3076_v44 = vsub.f32 %v3043_v29, %v5992_v31  ;;  %v3077_v53 = vsub.f32 %v3044_v37, %v5992_v31  ;;  %v3084_v54 = vsub.f32 %v3051_v32, %v5992_v31  ;;  %v6048_v5 = vld [vmem:[%s6301_s0] ss:$0 sm:$0xff] }
 0x7a8   : > { %v3090_v12 = vadd.f32 1e-05, %v3066_v22  ;;  %v3085_v55 = vsub.f32 %v3052_v39, %v5992_v31  ;;  %v3078_v57 = vsub.f32 %v5994_v40, %v5992_v31  ;;  %v3079_v38 = vsub.f32 %v5996_v41, %v5992_v31  ;;  %v4666_v33 = vld [vmem:[%s5986_s13] sm:$0xff]  }
 0x7a9   : > { %4126 = vmatpush3.bf16.msra.mxu0 %v4657_v11  ;;  %4354 = vmatpush3.bf16.msra.mxu1 %v4657_v11  ;;  %v3086_v49 = vsub.f32 %v5999_v23, %v5992_v31  ;;  %v3087_v59 = vsub.f32 %v6001_v43, %v5992_v31  ;;  %v3080_v62 = vsub.f32 %v6003_v26, %v5992_v31  ;;  %v4667_v34 = vld [vmem:[%s5986_s13 + $0x20] sm:$0xff]  }
 0x7aa   : > { %4127 = vmatprep.subr.bf16.mxu0 %v4658_v14  ;;  %4347 = vmatprep.subr.bf16.mxu1 %v4658_v14  ;;  %4674 = vrsqrt.f32 %v3090_v12  ;;  %v3081_v56 = vsub.f32 %v6009_v47, %v5992_v31  ;;  %v3088_v52 = vsub.f32 %v6011_v48, %v5992_v31  ;;  %v3089_v1 = vsub.f32 %v6013_v50, %v5992_v31 }
 0x7ad   : > { %4128 = vmatpush3.bf16.msra.mxu0 %v4659_v15  ;;  %4355 = vmatpush3.bf16.msra.mxu1 %v4659_v15 }
 0x7ae   : > { %4129 = vmatprep.subr.bf16.mxu0 %v4660_v16  ;;  %4348 = vmatprep.subr.bf16.mxu1 %v4660_v16 }
 0x7b1   : > { %4130 = vmatpush3.bf16.msra.mxu0 %v4661_v9  ;;  %4356 = vmatpush3.bf16.msra.mxu1 %v4661_v9 }
 0x7b2   : > { %4131 = vmatprep.subr.bf16.mxu0 %v4662_v2  ;;  %4349 = vmatprep.subr.bf16.mxu1 %v4662_v2 }
 0x7b5   : > { %4132 = vmatpush3.bf16.msra.mxu0 %v4663_v4  ;;  %4357 = vmatpush3.bf16.msra.mxu1 %v4663_v4 }
 0x7b6   : > { %4133 = vmatprep.subr.bf16.mxu0 %v4664_v21  ;;  %4350 = vmatprep.subr.bf16.mxu1 %v4664_v21 }
 0x7b7   : > { %v4675_v51 = vpop.eup %4674 }
 0x7b8   : > { %v6020_v58 = vrot.slane %v4675_v51, %v3071_v28 }
 0x7b9   : > { %4134 = vmatpush3.bf16.msra.mxu0 %v4665_v24  ;;  %4358 = vmatpush3.bf16.msra.mxu1 %v4665_v24 }
 0x7ba   : > { %v3098_v63 = vmul.f32 %v6020_v58, %v3074_v42  ;;  %v3099_v3 = vmul.f32 %v6020_v58, %v3075_v36  ;;  %v3106_v8 = vmul.f32 %v6020_v58, %v3082_v45  ;;  %v3107_v6 = vmul.f32 %v6020_v58, %v3083_v46 }
 0x7bb   : > { %v3100_v7 = vmul.f32 %v6020_v58, %v3076_v44  ;;  %v3101_v11 = vmul.f32 %v6020_v58, %v3077_v53  ;;  %v3108_v14 = vmul.f32 %v6020_v58, %v3084_v54  ;;  %v3109_v15 = vmul.f32 %v6020_v58, %v3085_v55 }
 0x7bc   : > { %v3120_v16 = vmul.f32 %v6031_v60, %v3098_v63  ;;  %v3121_v61 = vmul.f32 %v6031_v60, %v3099_v3  ;;  %v3128_v10 = vmul.f32 %v6031_v60, %v3106_v8  ;;  %v3129_v0 = vmul.f32 %v6031_v60, %v3107_v6  ;;  %v4668_v8 = vld [vmem:[%s5986_s13 + $0x8] sm:$0xff]  }
 0x7bd   : > { %v3122_v9 = vmul.f32 %v6031_v60, %v3100_v7  ;;  %v3123_v17 = vmul.f32 %v6031_v60, %v3101_v11  ;;  %v3130_v2 = vmul.f32 %v6031_v60, %v3108_v14  ;;  %v3131_v18 = vmul.f32 %v6031_v60, %v3109_v15  ;;  %v4669_v6 = vld [vmem:[%s5986_s13 + $0x28] sm:$0xff]  }
 0x7be   : > { %v3142_v19 = vadd.f32 %v6048_v5, %v3120_v16  ;;  %v3143_v4 = vadd.f32 %v6048_v5, %v3121_v61  ;;  %v3150_v20 = vadd.f32 %v6048_v5, %v3128_v10  ;;  %v3151_v21 = vadd.f32 %v6048_v5, %v3129_v0 }
 0x7bf   : > { %v3144_v22 = vadd.f32 %v6048_v5, %v3122_v9  ;;  %v3145_v12 = vadd.f32 %v6048_v5, %v3123_v17  ;;  %v3152_v24 = vadd.f32 %v6048_v5, %v3130_v2  ;;  %v3153_v25 = vadd.f32 %v6048_v5, %v3131_v18  ;;  %v4670_v9 = vld [vmem:[%s5986_s13 + $0x10] sm:$0xff]  }
 0x7c0   : > { %v3158_v13 = vmax.f32 %v3142_v19, 0.0  ;;  %v3159_v27 = vmax.f32 %v3143_v4, 0.0  ;;  %v3166_v28 = vmax.f32 %v3150_v20, 0.0  ;;  %v3167_v30 = vmax.f32 %v3151_v21, 0.0  ;;  %v4671_v17 = vld [vmem:[%s5986_s13 + $0x30] sm:$0xff]  }
 0x7c1   : > { %v3160_v35 = vmax.f32 %v3144_v22, 0.0  ;;  %v3161_v29 = vmax.f32 %v3145_v12, 0.0  ;;  %v3168_v37 = vmax.f32 %v3152_v24, 0.0  ;;  %v3169_v32 = vmax.f32 %v3153_v25, 0.0  ;;  %v6111_v20 = vld [vmem:[%s6302_s11] ss:$0 sm:$0xff] }
 0x7c2   : > { %v3194_v39 = vpack.c.bf16 %v3159_v27, %v3158_v13  ;;  %v3198_v40 = vpack.c.bf16 %v3167_v30, %v3166_v28  ;;  %v3102_v41 = vmul.f32 %v6020_v58, %v3078_v57  ;;  %v3103_v42 = vmul.f32 %v6020_v58, %v3079_v38 }
 0x7c3   : > { %v3195_v23 = vpack.c.bf16 %v3161_v29, %v3160_v35  ;;  %v3199_v43 = vpack.c.bf16 %v3169_v32, %v3168_v37  ;;  %v3110_v26 = vmul.f32 %v6020_v58, %v3086_v49  ;;  %v3111_v36 = vmul.f32 %v6020_v58, %v3087_v59 }
 0x7c4   : > { %3417 = vmatprep.mubr.bf16.mxu0 %v3194_v39  ;;  %3449 = vmatprep.mubr.bf16.mxu1 %v3198_v40  ;;  %v3124_v45 = vmul.f32 %v6031_v60, %v3102_v41  ;;  %v3125_v46 = vmul.f32 %v6031_v60, %v3103_v42  ;;  %v3104_v44 = vmul.f32 %v6020_v58, %v3080_v62 }
 0x7c5   : > { %3418 = vmatmul.mubr.bf16.vlgmr.msra.gmra.mxu0 %v4666_v33  ;;  %3450 = vmatmul.mubr.bf16.vlgmr.msra.gmra.mxu1 %v4667_v34  ;;  %v3132_v47 = vmul.f32 %v6031_v60, %v3110_v26  ;;  %v3133_v51 = vmul.f32 %v6031_v60, %v3111_v36  ;;  %v3105_v53 = vmul.f32 %v6020_v58, %v3081_v56 }
 0x7c6   : > { %3425 = vmatprep.mubr.bf16.mxu0 %v3195_v23  ;;  %3457 = vmatprep.mubr.bf16.mxu1 %v3199_v43  ;;  %v3146_v54 = vadd.f32 %v6048_v5, %v3124_v45  ;;  %v3147_v55 = vadd.f32 %v6048_v5, %v3125_v46  ;;  %v3126_v57 = vmul.f32 %v6031_v60, %v3104_v44 }
 0x7c7   : > { %v3154_v38 = vadd.f32 %v6048_v5, %v3132_v47  ;;  %v3155_v49 = vadd.f32 %v6048_v5, %v3133_v51  ;;  %v3127_v59 = vmul.f32 %v6031_v60, %v3105_v53  ;;  %v3112_v62 = vmul.f32 %v6020_v58, %v3088_v52 }
 0x7c8   : > { %v3162_v56 = vmax.f32 %v3146_v54, 0.0  ;;  %v3163_v63 = vmax.f32 %v3147_v55, 0.0  ;;  %v3113_v3 = vmul.f32 %v6020_v58, %v3089_v1  ;;  %v3148_v48 = vadd.f32 %v6048_v5, %v3126_v57 }
 0x7c9   : > { %v3170_v7 = vmax.f32 %v3154_v38, 0.0  ;;  %v3171_v11 = vmax.f32 %v3155_v49, 0.0  ;;  %v3134_v14 = vmul.f32 %v6031_v60, %v3112_v62  ;;  %v3149_v52 = vadd.f32 %v6048_v5, %v3127_v59 }
 0x7ca   : > { %v3196_v15 = vpack.c.bf16 %v3163_v63, %v3162_v56  ;;  %v3135_v16 = vmul.f32 %v6031_v60, %v3113_v3  ;;  %v3164_v58 = vmax.f32 %v3148_v48, 0.0  ;;  %v4672_v60 = vld [vmem:[%s5986_s13 + $0x18] sm:$0xff]  }
 0x7cb   : > { %v3200_v61 = vpack.c.bf16 %v3171_v11, %v3170_v7  ;;  %v3156_v31 = vadd.f32 %v6048_v5, %v3134_v14  ;;  %v3165_v1 = vmax.f32 %v3149_v52, 0.0 }
 0x7cc   : > { %v3157_v50 = vadd.f32 %v6048_v5, %v3135_v16  ;;  %v4673_v5 = vld [vmem:[%s5986_s13 + $0x38] sm:$0xff]  }
 0x7cd   : > { %3426 = vmatmul.mubr.bf16.gmra.mxu0 %v4668_v8  ;;  %3458 = vmatmul.mubr.bf16.gmra.mxu1 %v4669_v6  ;;  %v3172_v10 = vmax.f32 %v3156_v31, 0.0  ;;  %v3197_v2 = vpack.c.bf16 %v3165_v1, %v3164_v58 }
 0x7ce   : > { %3433 = vmatprep.mubr.bf16.mxu0 %v3196_v15  ;;  %3465 = vmatprep.mubr.bf16.mxu1 %v3200_v61  ;;  %v3173_v0 = vmax.f32 %v3157_v50, 0.0 }
 0x7d0   : > { %v3201_v18 = vpack.c.bf16 %v3173_v0, %v3172_v10 }
 0x7d5   : > { %3434 = vmatmul.mubr.bf16.gmra.mxu0 %v4670_v9  ;;  %3466 = vmatmul.mubr.bf16.gmra.mxu1 %v4671_v17 }
 0x7d6   : > { %3441 = vmatprep.mubr.bf16.mxu0 %v3197_v2  ;;  %3473 = vmatprep.mubr.bf16.mxu1 %v3201_v18 }
 0x7dd   : > { %3442 = vmatmul.mubr.bf16.gmra.mxu0 %v4672_v60  ;;  %3474 = vmatmul.mubr.bf16.gmra.mxu1 %v4673_v5 }
 0x885   : > { %v4135_v19 = vpop.f32.mrf.mxu0  ;;  %v4159_v4 = vpop.f32.mrf.mxu1 }
 0x887   : > { %v4136_v21 = vpop.f32.mrf.mxu0  ;;  %v4160_v22 = vpop.f32.mrf.mxu1 }
 0x888   : > { %v4137_v12 = vadd.f32 %v4136_v21, %v4135_v19  ;;  %v4161_v24 = vadd.f32 %v4160_v22, %v4159_v4 }
 0x889   : > { %v4138_v25 = vpop.f32.mrf.mxu0  ;;  %v4162_v13 = vpop.f32.mrf.mxu1 }
 0x88a   : > { %v3420_v27 = vadd.f32 %v4137_v12, %v6111_v20  ;;  %v3452_v28 = vadd.f32 %v4161_v24, %v6111_v20 }
 0x88b   : > { %v4139_v30 = vpop.f32.mrf.mxu0  ;;  %v4163_v33 = vpop.f32.mrf.mxu1 }
 0x88c   : > { %3482 = vst [vmem:[%s5362_s8] sm:$0xff] %v3420_v27  ;;  %3490 = vst [vmem:[%s5362_s8 + $0x40] sm:$0xff] %v3452_v28  ;;  %v4140_v34 = vadd.f32 %v4139_v30, %v4138_v25  ;;  %v4164_v35 = vadd.f32 %v4163_v33, %v4162_v13 }
 0x88d   : > { %v4141_v29 = vpop.f32.mrf.mxu0  ;;  %v4165_v37 = vpop.f32.mrf.mxu1 }
 0x88e   : > { %v3423_v32 = vadd.f32 %v4140_v34, %v6111_v20  ;;  %v3455_v39 = vadd.f32 %v4164_v35, %v6111_v20 }
 0x88f   : > { %v4142_v40 = vpop.f32.mrf.mxu0  ;;  %v4166_v41 = vpop.f32.mrf.mxu1 }
 0x890   : > { %3483 = vst [vmem:[%s5362_s8 + $0x8] sm:$0xff] %v3423_v32  ;;  %3491 = vst [vmem:[%s5362_s8 + $0x48] sm:$0xff] %v3455_v39  ;;  %v4143_v42 = vadd.f32 %v4142_v40, %v4141_v29  ;;  %v4167_v23 = vadd.f32 %v4166_v41, %v4165_v37 }
 0x891   : > { %v4144_v43 = vpop.f32.mrf.mxu0  ;;  %v4168_v26 = vpop.f32.mrf.mxu1 }
 0x892   : > { %v3428_v36 = vadd.f32 %v4143_v42, %v6111_v20  ;;  %v3460_v45 = vadd.f32 %v4167_v23, %v6111_v20 }
 0x893   : > { %v4145_v46 = vpop.f32.mrf.mxu0  ;;  %v4169_v44 = vpop.f32.mrf.mxu1 }
 0x894   : > { %3484 = vst [vmem:[%s5362_s8 + $0x10] sm:$0xff] %v3428_v36  ;;  %3492 = vst [vmem:[%s5362_s8 + $0x50] sm:$0xff] %v3460_v45  ;;  %v4146_v47 = vadd.f32 %v4145_v46, %v4144_v43  ;;  %v4170_v51 = vadd.f32 %v4169_v44, %v4168_v26 }
 0x895   : > { %v4147_v53 = vpop.f32.mrf.mxu0  ;;  %v4171_v54 = vpop.f32.mrf.mxu1 }
 0x896   : > { %v3431_v55 = vadd.f32 %v4146_v47, %v6111_v20  ;;  %v3463_v57 = vadd.f32 %v4170_v51, %v6111_v20 }
 0x897   : > { %v4148_v38 = vpop.f32.mrf.mxu0  ;;  %v4172_v49 = vpop.f32.mrf.mxu1 }
 0x898   : > { %3485 = vst [vmem:[%s5362_s8 + $0x18] sm:$0xff] %v3431_v55  ;;  %3493 = vst [vmem:[%s5362_s8 + $0x58] sm:$0xff] %v3463_v57  ;;  %v4149_v59 = vadd.f32 %v4148_v38, %v4147_v53  ;;  %v4173_v62 = vadd.f32 %v4172_v49, %v4171_v54 }
 0x899   : > { %v4150_v56 = vpop.f32.mrf.mxu0  ;;  %v4174_v63 = vpop.f32.mrf.mxu1 }
 0x89a   : > { %v3436_v3 = vadd.f32 %v4149_v59, %v6111_v20  ;;  %v3468_v8 = vadd.f32 %v4173_v62, %v6111_v20 }
 0x89b   : > { %v4151_v6 = vpop.f32.mrf.mxu0  ;;  %v4175_v7 = vpop.f32.mrf.mxu1 }
 0x89c   : > { %3486 = vst [vmem:[%s5362_s8 + $0x20] sm:$0xff] %v3436_v3  ;;  %3494 = vst [vmem:[%s5362_s8 + $0x60] sm:$0xff] %v3468_v8  ;;  %v4152_v11 = vadd.f32 %v4151_v6, %v4150_v56  ;;  %v4176_v14 = vadd.f32 %v4175_v7, %v4174_v63 }
 0x89d   : > { %v4153_v15 = vpop.f32.mrf.mxu0  ;;  %v4177_v48 = vpop.f32.mrf.mxu1 }
 0x89e   : > { %v3439_v52 = vadd.f32 %v4152_v11, %v6111_v20  ;;  %v3471_v16 = vadd.f32 %v4176_v14, %v6111_v20 }
 0x89f   : > { %v4154_v61 = vpop.f32.mrf.mxu0  ;;  %v4178_v31 = vpop.f32.mrf.mxu1 }
 0x8a0   : > { %3487 = vst [vmem:[%s5362_s8 + $0x28] sm:$0xff] %v3439_v52  ;;  %3495 = vst [vmem:[%s5362_s8 + $0x68] sm:$0xff] %v3471_v16  ;;  %v4155_v50 = vadd.f32 %v4154_v61, %v4153_v15  ;;  %v4179_v58 = vadd.f32 %v4178_v31, %v4177_v48 }
 0x8a1   : > { %v4156_v1 = vpop.f32.mrf.mxu0  ;;  %v4180_v10 = vpop.f32.mrf.mxu1 }
 0x8a2   : > { %v3444_v0 = vadd.f32 %v4155_v50, %v6111_v20  ;;  %v3476_v9 = vadd.f32 %v4179_v58, %v6111_v20 }
 0x8a3   : > { %v4157_v17 = vpop.f32.mrf.mxu0  ;;  %v4181_v2 = vpop.f32.mrf.mxu1 }
 0x8a4   : > { %3488 = vst [vmem:[%s5362_s8 + $0x30] sm:$0xff] %v3444_v0  ;;  %3496 = vst [vmem:[%s5362_s8 + $0x70] sm:$0xff] %v3476_v9  ;;  %v4158_v18 = vadd.f32 %v4157_v17, %v4156_v1  ;;  %v4182_v60 = vadd.f32 %v4181_v2, %v4180_v10 }
 0x8a6   : > { %v3447_v5 = vadd.f32 %v4158_v18, %v6111_v20  ;;  %v3479_v19 = vadd.f32 %v4182_v60, %v6111_v20 }
 0x8a8   : > { %3489 = vst [vmem:[%s5362_s8 + $0x38] sm:$0xff] %v3447_v5  ;;  %3497 = vst [vmem:[%s5362_s8 + $0x78] sm:$0xff] %v3479_v19 }
 0x8a9 PF: > { %p3506_p5 = scmp.eq.s32.totalorder %s4980_s26, 5  ;;  %s3514_s9 = sshll.u32 %s5362_s8, 4  ;;  %s6148_s9 = int_to_ptr.vmem [resolvable:$true] %s3514_s9 }
 0x8aa   : > { %s6303_s29 = sld [smem:[#allocation49_spill]]  ;;  %s6157_s18 = scalar_lea.sflag [#allocation10], %s761_s27 }
 0x8ab   : > { %s6323_s3 = smov (!%p3506_p5, %s4976_s3), 0  ;;  %s4860_s28 = scalar_lea.vmem %s6148_s9, 2048 }
 0x8ac   : > { %s3879_s10 = sshll.u32 %s6323_s3, 11  ;;  %p4861_p0 = scmp.ne.s32.totalorder %s6148_s9, %s4860_s28 }
 0x8ad   : > { %p6304_p2 = scmp.ne.s32.totalorder %s6282_s6, 0  ;;  %s5009_s26 = smov [#allocation20]  }
 0x8ae   : > { %s4864_s8 = sshll.u32 %s5009_s26, 4  ;;  %s4865_s8 = int_to_ptr.vmem [resolvable:$false] %s4864_s8 }
 0x8af   : > { %p4862_p4 = pnand %p4861_p0, %p6304_p2  ;;  %s4866_s19 = scalar_lea.vmem %s4865_s8, 4096 }
 0x8b0   : > { %s6153_s14 = scalar_lea.hbm %s6303_s29, %s3879_s10  ;;  %p4867_p1 = scmp.lt.s32.totalorder %s6148_s9, %s4865_s8 }
 0x8b1   : > { %p4863_p3 = pneg %p4862_p4  ;;  %p4868_p7 = scmp.lt.s32.totalorder %s4866_s19, %s4860_s28 }
 0x8b3   : > { %p4869_p8 = por %p4868_p7, %p4867_p1 }
 0x8b5   : > { %p4870_p13 = pnand %p4869_p8, %p4863_p3 }
 0x8b7   : > { %4873 = shalt.err (!%p4870_p13)
}
 0x8b8   : > { %s4874_s3 = scalar_lea.hbm %s6153_s14, 2048  ;;  %s4878_s15 = scalar_lea.hbm %s6303_s29, 4096 }
 0x8b9   : > { %p4875_p6 = scmp.ne.s32.totalorder %s6153_s14, %s4874_s3  ;;  %p4879_p11 = scmp.lt.s32.totalorder %s6153_s14, %s6303_s29 }
 0x8ba   : > { %p4880_p12 = scmp.lt.s32.totalorder %s4878_s15, %s4874_s3 }
 0x8bb   : > { %p4876_p9 = pnand %p4875_p6, %p6304_p2 }
 0x8bc   : > { %p4881_p5 = por %p4880_p12, %p4879_p11 }
 0x8bd   : > { %p4877_p10 = pneg %p4876_p9 }
 0x8bf   : > { %p4882_p0 = pnand %p4881_p5, %p4877_p10 }
 0x8c1   : > { %4885 = shalt.err (!%p4882_p0)
}
 0x8c2   : > { %s5010_s30 = smov 128   ;;  %s5011_s12 = smov 8  }
 0x8c3   : > { %4385 = dma.vmem_to_hbm [thread:$0]  (%p6304_p2), %s6148_s9, 2048, %s6153_s14, %s6157_s18, %s5010_s30, %s5010_s30, %s5011_s12  }
 0x8c4 PF: > { %p4427_p4 = scmp.ge.s32.totalorder %s4992_s4, 2  ;;  %s3529_s11 = sand.u32 1, %s4952_s1  }
 0x8c5   : > { %p6305_p3 = scmp.ne.s32.totalorder %s6284_s21, 0  ;;  %s3530_s10 = scalar_lea.sflag [#allocation10], %s3529_s11 }
 0x8c7   : > { %p4411_p1 = pnand %p4427_p4, %p6305_p3 }
 0x8c9   : > { %p4412_p7 = pneg %p4411_p1 }
 0x8cb   : > { %4947 = dma.done.wait (%p4412_p7), %s3530_s10, 2048  }
 0x8cc   : > { %4949 = vsyncadd (%p4412_p7), %s3530_s10, 4294965248  ;;  %s39_s4 = sadd.s32 1, %s4992_s4   ;;  %s6306_s3 = sld [smem:[#allocation26_spill]] }
 0x8cd   : > { %p36_p8 = scmp.ge.s32.totalorder %s39_s4, 14   ;;  %s6307_s26 = sld [smem:[#allocation27_spill]] }
 0x8ce   : > { %s6308_s27 = sld [smem:[#allocation28_spill]]  ;;  %s6310_s1 = smov %s4956_s22 }
 0x8cf   : > { %s6309_s28 = sld [smem:[#allocation29_spill]]  ;;  %s6311_s22 = smov %s4960_s23 }
 0x8d0   : > { %s6312_s23 = smov %s5314_s17  ;;  %s6313_s24 = smov %s4968_s2 }
 0x8d1   : > { %s6314_s2 = smov %s4972_s25  ;;  %s6315_s25 = smov %s5302_s20 }
 0x8d2   :  { %38 = sbr.rel (!%p36_p8) target bundleno = 33 (0x21), region = 217 }
 0x8d7   :  { %3535 = vsyncpa [#allocation9], 1 }
 0x8d8   :  { %3537 = vsyncpa [#allocation9 + $0x1], 1 }
 0x8d9   :  { %3538 = vsyncpa [#allocation12], 1 }
 0x8da   :  { %3539 = vsyncpa [#allocation15], 1 }
 0x8db   :  { %3540 = vsyncpa [#allocation18], 1 }
 0x8dc   :  { %3541 = vsyncpa [#allocation10], 1 }
 0x8dd   :  { %3543 = vsyncpa [#allocation10 + $0x1], 1 }

</bundles_post_ra>
